<compile_context>
chip_gen: v5e
topology: v5e:2x2
jax: 0.10.0
libtpu: 0.0.40
codegen_flags: <defaults>
</compile_context>

<pallas_src>
import functools

import jax
import jax.numpy as jnp
from jax import lax
from jax.experimental import pallas as pl
from jax.experimental.pallas import tpu as pltpu


def _round_up(v, m):
    return ((v + m - 1) // m) * m


def _flash_attn_kernel(x_q_ref, k_ref, v_ref, wq_ref, bq_ref, o_ref,
                       q_scr, m_scr, l_scr, acc_scr,
                       *, tk_block, n_valid, mask_keys):
    """One (batch, q-tile, k-tile) step of flash-style attention.

    x_q_ref : (1, TQ, Cp)   input tile (query side; also the residual)
    k_ref   : (1, TK, CqP)  bf16 precomputed key tile
    v_ref   : (1, TK, Cp)   bf16 precomputed value tile
    wq_ref  : (Cp, CqP)     bf16 padded Wq^T;  bq_ref: (1, CqP) f32
    o_ref   : (1, TQ, Cp)
    scratch : q (TQ,CqP) bf16, m (TQ,1) f32, l (TQ,1) f32, acc (TQ,Cp) f32
    """
    ki = pl.program_id(2)

    @pl.when(ki == 0)
    def _init():
        # Project the query tile once per (b, qi); reset online-softmax state.
        q = (jnp.dot(x_q_ref[0].astype(jnp.bfloat16), wq_ref[...],
                     preferred_element_type=jnp.float32) + bq_ref[...])
        q_scr[...] = q.astype(jnp.bfloat16)
        m_scr[...] = jnp.full_like(m_scr, -jnp.inf)
        l_scr[...] = jnp.zeros_like(l_scr)
        acc_scr[...] = jnp.zeros_like(acc_scr)

    # scores[i, j] = <q_i, k_j>: bf16 operands, f32 accumulation on the MXU.
    s = lax.dot_general(q_scr[...], k_ref[0],
                        dimension_numbers=(((1,), (1,)), ((), ())),
                        preferred_element_type=jnp.float32)       # (TQ, TK)

    if mask_keys:
        # Keys beyond the true sequence length are zero padding; mask them out
        # before the row max / exp so they contribute nothing to the softmax.
        key_idx = ki * tk_block + lax.broadcasted_iota(jnp.int32, s.shape, 1)
        s = jnp.where(key_idx < n_valid, s, -jnp.inf)

    # Online softmax update (f32 state, deferred normalization).
    m_prev = m_scr[...]
    m_new = jnp.maximum(m_prev, jnp.max(s, axis=-1, keepdims=True))
    alpha = jnp.exp(m_prev - m_new)
    p = jnp.exp(s - m_new)
    l_scr[...] = alpha * l_scr[...] + jnp.sum(p, axis=-1, keepdims=True)
    acc_scr[...] = alpha * acc_scr[...] + jnp.dot(
        p.astype(jnp.bfloat16), v_ref[0], preferred_element_type=jnp.float32)
    m_scr[...] = m_new

    @pl.when(ki == pl.num_programs(2) - 1)
    def _finalize():
        # Exact reciprocal (once per q tile -> essentially free), broadcast
        # multiply, residual add.
        inv_l = pl.reciprocal(l_scr[...], approx=False)
        out = acc_scr[...] * inv_l + x_q_ref[0].astype(jnp.float32)
        o_ref[0] = out.astype(o_ref.dtype)


def attention_block(x_nchw, wq, bq, wk, bk, wv, bv, *, tq=256, tk=256):
    """x_nchw: (B, C, H, W); conv weights have PyTorch shape (out, in, 1, 1)."""
    B, C, H, W = x_nchw.shape
    N = H * W
    Cq = wq.shape[0]                      # C // 8 in the PyTorch module
    dtype = x_nchw.dtype

    # Padded widths: channels -> multiple of 128 (lane-dense stores),
    # q/k width -> at least 128 (MXU contraction depth). Zero padding is exact.
    Cp = _round_up(C, 128)
    CqP = _round_up(max(Cq, 1), 128)

    # Tile sizes: multiples of 128, capped by the (128-rounded) sequence
    # length; pad N up to a tile multiple and mask padded keys in-kernel.
    TQ = min(tq, _round_up(N, 128))
    TK = min(tk, _round_up(N, 128))
    Np = _round_up(_round_up(N, TQ), TK)
    assert Np % TQ == 0 and Np % TK == 0
    nq, nk = Np // TQ, Np // TK
    mask_keys = (Np != N)
    # NOTE (v7x megacore): keep B * nq >= 2 so both TensorCores get work.

    # NCHW -> channels-last (B, N, C), zero-padded to (B, Np, Cp).
    x_cl = jnp.transpose(x_nchw.reshape(B, C, N), (0, 2, 1))
    x_p = jnp.zeros((B, Np, Cp), dtype).at[:, :N, :C].set(x_cl)

    # Hoisted K/V projection: one XLA GEMM over all positions (f32 math),
    # stored bf16 so the per-step in-kernel matmuls run at bf16 MXU rate.
    xf = x_cl.astype(jnp.float32)
    wk_m = wk.reshape(Cq, C).astype(jnp.float32)
    wv_m = wv.reshape(C, C).astype(jnp.float32)
    k_f = jnp.einsum('bnc,oc->bno', xf, wk_m) + bk.astype(jnp.float32)
    v_f = jnp.einsum('bnc,oc->bno', xf, wv_m) + bv.astype(jnp.float32)
    k_p = jnp.zeros((B, Np, CqP), jnp.bfloat16).at[:, :N, :Cq].set(
        k_f.astype(jnp.bfloat16))
    v_p = jnp.zeros((B, Np, Cp), jnp.bfloat16).at[:, :N, :C].set(
        v_f.astype(jnp.bfloat16))

    # Query projection stays in-kernel (once per q tile): padded Wq^T in bf16,
    # bias in f32 for the f32 accumulator.
    wq_p = jnp.zeros((Cp, CqP), jnp.bfloat16).at[:C, :Cq].set(
        wq.reshape(Cq, C).T.astype(jnp.bfloat16))
    bq_p = jnp.zeros((1, CqP), jnp.float32).at[0, :Cq].set(
        bq.astype(jnp.float32))

    kernel = functools.partial(_flash_attn_kernel, tk_block=TK, n_valid=N,
                               mask_keys=mask_keys)

    out_p = pl.pallas_call(
        kernel,
        out_shape=jax.ShapeDtypeStruct((B, Np, Cp), dtype),
        grid_spec=pltpu.PrefetchScalarGridSpec(
            num_scalar_prefetch=0,
            grid=(B, nq, nk),
            in_specs=[
                pl.BlockSpec((1, TQ, Cp), lambda b, qi, ki: (b, qi, 0)),   # x (q / residual)
                pl.BlockSpec((1, TK, CqP), lambda b, qi, ki: (b, ki, 0)),  # K (bf16)
                pl.BlockSpec((1, TK, Cp), lambda b, qi, ki: (b, ki, 0)),   # V (bf16)
                pl.BlockSpec((Cp, CqP), lambda b, qi, ki: (0, 0)),         # Wq^T (padded)
                pl.BlockSpec((1, CqP), lambda b, qi, ki: (0, 0)),          # bq
            ],
            out_specs=pl.BlockSpec((1, TQ, Cp), lambda b, qi, ki: (b, qi, 0)),
            scratch_shapes=[
                pltpu.VMEM((TQ, CqP), jnp.bfloat16),  # q tile (bf16 MXU feed)
                pltpu.VMEM((TQ, 1), jnp.float32),     # running max
                pltpu.VMEM((TQ, 1), jnp.float32),     # running sum
                pltpu.VMEM((TQ, Cp), jnp.float32),    # output accumulator
            ],
        ),
        compiler_params=pltpu.CompilerParams(
            dimension_semantics=("parallel", "parallel", "arbitrary")),
    )(x_p, k_p, v_p, wq_p, bq_p)

    # Drop padding, (B, N, C) -> NCHW.
    # TODO(synk): if the surrounding model keeps activations channels-last,
    # these wrapper transposes / pads disappear.
    out_cl = out_p[:, :N, :C]
    return jnp.transpose(out_cl, (0, 2, 1)).reshape(B, C, H, W)


def _reference(x_nchw, wq, bq, wk, bk, wv, bv):
    """Pure-JAX f32 reference mirroring the PyTorch forward (no logit scaling)."""
    B, C, H, W = x_nchw.shape
    N = H * W
    Cq = wq.shape[0]
    xf = x_nchw.reshape(B, C, N).astype(jnp.float32)                     # (B,C,N)
    q = jnp.einsum('oc,bcn->bon', wq.reshape(Cq, C), xf) + bq[None, :, None]
    k = jnp.einsum('oc,bcn->bon', wk.reshape(Cq, C), xf) + bk[None, :, None]
    v = jnp.einsum('oc,bcn->bon', wv.reshape(C, C), xf) + bv[None, :, None]
    attn = jnp.einsum('bci,bcj->bij', q, k)                               # (B,N,N)
    attn = jax.nn.softmax(attn, axis=-1)
    out = jnp.einsum('bcj,bij->bci', v, attn)                             # (B,C,N)
    return (out + xf).reshape(B, C, H, W).astype(x_nchw.dtype)


def _make_params(key, C):
    Cq = C // 8
    keys = jax.random.split(key, 7)
    bound = 1.0 / (C ** 0.5)
    x = None  # placeholder (inputs built by caller)
    wq = jax.random.uniform(keys[1], (Cq, C, 1, 1), jnp.float32, -bound, bound)
    bq = jax.random.uniform(keys[2], (Cq,), jnp.float32, -bound, bound)
    wk = jax.random.uniform(keys[3], (Cq, C, 1, 1), jnp.float32, -bound, bound)
    bk = jax.random.uniform(keys[4], (Cq,), jnp.float32, -bound, bound)
    wv = jax.random.uniform(keys[5], (C, C, 1, 1), jnp.float32, -bound, bound)
    bv = jax.random.uniform(keys[6], (C,), jnp.float32, -bound, bound)
    return wq, bq, wk, bk, wv, bv


if __name__ == "__main__":
    key = jax.random.PRNGKey(0)

    # --- Test 1: B=2, C=16, 16x16 spatial (N=256, single 256-wide tile). ---
    B, C, H, W = 2, 16, 16, 16
    k_x, k_p = jax.random.split(key)
    x = jax.random.normal(k_x, (B, C, H, W), dtype=jnp.float32)
    wq, bq, wk, bk, wv, bv = _make_params(k_p, C)

    out = jax.block_until_ready(attention_block(x, wq, bq, wk, bk, wv, bv))
    ref = jax.block_until_ready(_reference(x, wq, bq, wk, bk, wv, bv))
    assert out.shape == (B, C, H, W)
    # Tolerance accounts for bf16 MXU operands (accumulation stays f32).
    assert jnp.max(jnp.abs(out - ref)) < 2e-2, "mismatch vs reference (test 1)"

    # --- Test 2: non-tile-multiple N (12x12 -> N=144) exercises the padded-N
    # key-masking path with 128-wide tiles (nq=nk=2). ---
    B2, C2, H2, W2 = 1, 8, 12, 12
    k_x2, k_p2 = jax.random.split(jax.random.PRNGKey(1))
    x2 = jax.random.normal(k_x2, (B2, C2, H2, W2), dtype=jnp.float32)
    wq2, bq2, wk2, bk2, wv2, bv2 = _make_params(k_p2, C2)

    out2 = jax.block_until_ready(
        attention_block(x2, wq2, bq2, wk2, bk2, wv2, bv2, tq=128, tk=128))
    ref2 = jax.block_until_ready(
        _reference(x2, wq2, bq2, wk2, bk2, wv2, bv2))
    assert out2.shape == (B2, C2, H2, W2)
    assert jnp.max(jnp.abs(out2 - ref2)) < 2e-2, "mismatch vs reference (test 2)"

    print("KERNEL_OK")
</pallas_src>

<mosaic_0001>
module attributes {stable_mosaic.version = 11 : i64} {
  func.func @_flash_attn_kernel(%arg0: i32, %arg1: i32, %arg2: i32, %arg3: memref<1x256x128xf32, #tpu.memory_space<vmem>>, %arg4: memref<1x256x128xbf16, #tpu.memory_space<vmem>>, %arg5: memref<1x256x128xbf16, #tpu.memory_space<vmem>>, %arg6: memref<128x128xbf16, #tpu.memory_space<vmem>>, %arg7: memref<1x128xf32, #tpu.memory_space<vmem>>, %arg8: memref<1x256x128xf32, #tpu.memory_space<vmem>>, %arg9: memref<256x128xbf16, #tpu.memory_space<vmem>>, %arg10: memref<256x1xf32, #tpu.memory_space<vmem>>, %arg11: memref<256x1xf32, #tpu.memory_space<vmem>>, %arg12: memref<256x128xf32, #tpu.memory_space<vmem>>) attributes {dimension_semantics = [#tpu.dimension_semantics<parallel>, #tpu.dimension_semantics<parallel>, #tpu.dimension_semantics<arbitrary>], iteration_bounds = array<i64: 2, 1, 1>, scalar_prefetch = 0 : i64, scratch_operands = 4 : i64, tpu.core_type = #tpu.core_type<tc>, window_params = [{transform_indices = @transform_0, window_bounds = array<i64: 1, 256, 128>}, {transform_indices = @transform_1, window_bounds = array<i64: 1, 256, 128>}, {transform_indices = @transform_2, window_bounds = array<i64: 1, 256, 128>}, {pipeline_mode = #tpu.pipeline_mode<synchronous>, transform_indices = @transform_3, window_bounds = array<i64: 128, 128>}, {pipeline_mode = #tpu.pipeline_mode<synchronous>, transform_indices = @transform_4, window_bounds = array<i64: 1, 128>}, {transform_indices = @transform_5, window_bounds = array<i64: 1, 256, 128>}]} {
    %c0_i32 = arith.constant 0 : i32
    %0 = arith.cmpi eq, %arg2, %c0_i32 : i32
    %1 = arith.extui %0 : i1 to i32
    %c0_i32_0 = arith.constant 0 : i32
    %2 = arith.cmpi ne, %1, %c0_i32_0 : i32
    scf.if %2 {
      %c0_25 = arith.constant 0 : index
      %c0_26 = arith.constant 0 : index
      %c0_27 = arith.constant 0 : index
      %35 = vector.load %arg3[%c0_25, %c0_26, %c0_27] : memref<1x256x128xf32, #tpu.memory_space<vmem>>, vector<1x256x128xf32>
      %36 = vector.shape_cast %35 : vector<1x256x128xf32> to vector<256x128xf32>
      %37 = arith.truncf %36 : vector<256x128xf32> to vector<256x128xbf16>
      %c0_28 = arith.constant 0 : index
      %c0_29 = arith.constant 0 : index
      %38 = vector.load %arg6[%c0_28, %c0_29] : memref<128x128xbf16, #tpu.memory_space<vmem>>, vector<128x128xbf16>
      %cst_30 = arith.constant dense<0.000000e+00> : vector<256x128xf32>
      %39 = tpu.matmul %37, %38, %cst_30 {dimension_numbers = #tpu.dot_dimension_numbers<[1], [0], [0], [1], [0, 0, 1, 1], [], []>} : vector<256x128xbf16>, vector<128x128xbf16>, vector<256x128xf32> -> vector<256x128xf32>
      %c0_31 = arith.constant 0 : index
      %c0_32 = arith.constant 0 : index
      %40 = vector.load %arg7[%c0_31, %c0_32] : memref<1x128xf32, #tpu.memory_space<vmem>>, vector<1x128xf32>
      %41 = vector.broadcast %40 : vector<1x128xf32> to vector<256x128xf32>
      %42 = arith.addf %39, %41 : vector<256x128xf32>
      %43 = arith.truncf %42 : vector<256x128xf32> to vector<256x128xbf16>
      %c0_33 = arith.constant 0 : index
      %c0_34 = arith.constant 0 : index
      %44 = vector.load %arg9[%c0_33, %c0_34] : memref<256x128xbf16, #tpu.memory_space<vmem>>, vector<256x128xbf16>
      tpu.vector_store %arg9[%c0_33, %c0_34], %43 {strides = array<i32>} : memref<256x128xbf16, #tpu.memory_space<vmem>>, vector<256x128xbf16>,
      %cst_35 = arith.constant 0xFF800000 : f32
      %45 = vector.broadcast %cst_35 : f32 to vector<256x1xf32>
      %c0_36 = arith.constant 0 : index
      %c0_37 = arith.constant 0 : index
      %46 = vector.load %arg10[%c0_36, %c0_37] : memref<256x1xf32, #tpu.memory_space<vmem>>, vector<256x1xf32>
      tpu.vector_store %arg10[%c0_36, %c0_37], %45 {strides = array<i32>} : memref<256x1xf32, #tpu.memory_space<vmem>>, vector<256x1xf32>,
      %cst_38 = arith.constant 0.000000e+00 : f32
      %47 = vector.broadcast %cst_38 : f32 to vector<256x1xf32>
      %c0_39 = arith.constant 0 : index
      %c0_40 = arith.constant 0 : index
      %48 = vector.load %arg11[%c0_39, %c0_40] : memref<256x1xf32, #tpu.memory_space<vmem>>, vector<256x1xf32>
      tpu.vector_store %arg11[%c0_39, %c0_40], %47 {strides = array<i32>} : memref<256x1xf32, #tpu.memory_space<vmem>>, vector<256x1xf32>,
      %cst_41 = arith.constant 0.000000e+00 : f32
      %49 = vector.broadcast %cst_41 : f32 to vector<256x128xf32>
      %c0_42 = arith.constant 0 : index
      %c0_43 = arith.constant 0 : index
      %50 = vector.load %arg12[%c0_42, %c0_43] : memref<256x128xf32, #tpu.memory_space<vmem>>, vector<256x128xf32>
      tpu.vector_store %arg12[%c0_42, %c0_43], %49 {strides = array<i32>} : memref<256x128xf32, #tpu.memory_space<vmem>>, vector<256x128xf32>,
    } else {
    }
    %c0 = arith.constant 0 : index
    %c0_1 = arith.constant 0 : index
    %3 = vector.load %arg9[%c0, %c0_1] : memref<256x128xbf16, #tpu.memory_space<vmem>>, vector<256x128xbf16>
    %c0_2 = arith.constant 0 : index
    %c0_3 = arith.constant 0 : index
    %c0_4 = arith.constant 0 : index
    %4 = vector.load %arg4[%c0_2, %c0_3, %c0_4] : memref<1x256x128xbf16, #tpu.memory_space<vmem>>, vector<1x256x128xbf16>
    %5 = vector.shape_cast %4 : vector<1x256x128xbf16> to vector<256x128xbf16>
    %cst = arith.constant dense<0.000000e+00> : vector<256x256xf32>
    %6 = tpu.matmul %3, %5, %cst {dimension_numbers = #tpu.dot_dimension_numbers<[1], [1], [0], [0], [0, 0, 1, 0], [], []>} : vector<256x128xbf16>, vector<256x128xbf16>, vector<256x256xf32> -> vector<256x256xf32>
    %c0_5 = arith.constant 0 : index
    %c0_6 = arith.constant 0 : index
    %7 = vector.load %arg10[%c0_5, %c0_6] : memref<256x1xf32, #tpu.memory_space<vmem>>, vector<256x1xf32>
    %cst_7 = arith.constant dense<0xFF800000> : vector<256xf32>
    %8 = vector.multi_reduction <maximumf>, %6, %cst_7 [1] : vector<256x256xf32> to vector<256xf32>
    %9 = vector.shape_cast %8 : vector<256xf32> to vector<256x1xf32>
    %10 = arith.maximumf %7, %9 : vector<256x1xf32>
    %11 = arith.subf %7, %10 : vector<256x1xf32>
    %12 = math.exp %11 : vector<256x1xf32>
    %13 = vector.broadcast %10 : vector<256x1xf32> to vector<256x256xf32>
    %14 = arith.subf %6, %13 : vector<256x256xf32>
    %15 = math.exp %14 : vector<256x256xf32>
    %c0_8 = arith.constant 0 : index
    %c0_9 = arith.constant 0 : index
    %16 = vector.load %arg11[%c0_8, %c0_9] : memref<256x1xf32, #tpu.memory_space<vmem>>, vector<256x1xf32>
    %17 = arith.mulf %12, %16 : vector<256x1xf32>
    %cst_10 = arith.constant dense<0.000000e+00> : vector<256xf32>
    %18 = vector.multi_reduction <add>, %15, %cst_10 [1] : vector<256x256xf32> to vector<256xf32>
    %19 = vector.shape_cast %18 : vector<256xf32> to vector<256x1xf32>
    %20 = arith.addf %17, %19 : vector<256x1xf32>
    %c0_11 = arith.constant 0 : index
    %c0_12 = arith.constant 0 : index
    %21 = vector.load %arg11[%c0_11, %c0_12] : memref<256x1xf32, #tpu.memory_space<vmem>>, vector<256x1xf32>
    tpu.vector_store %arg11[%c0_11, %c0_12], %20 {strides = array<i32>} : memref<256x1xf32, #tpu.memory_space<vmem>>, vector<256x1xf32>,
    %c0_13 = arith.constant 0 : index
    %c0_14 = arith.constant 0 : index
    %22 = vector.load %arg12[%c0_13, %c0_14] : memref<256x128xf32, #tpu.memory_space<vmem>>, vector<256x128xf32>
    %23 = vector.broadcast %12 : vector<256x1xf32> to vector<256x128xf32>
    %24 = arith.mulf %23, %22 : vector<256x128xf32>
    %25 = arith.truncf %15 : vector<256x256xf32> to vector<256x256xbf16>
    %c0_15 = arith.constant 0 : index
    %c0_16 = arith.constant 0 : index
    %c0_17 = arith.constant 0 : index
    %26 = vector.load %arg5[%c0_15, %c0_16, %c0_17] : memref<1x256x128xbf16, #tpu.memory_space<vmem>>, vector<1x256x128xbf16>
    %27 = vector.shape_cast %26 : vector<1x256x128xbf16> to vector<256x128xbf16>
    %cst_18 = arith.constant dense<0.000000e+00> : vector<256x128xf32>
    %28 = tpu.matmul %25, %27, %cst_18 {dimension_numbers = #tpu.dot_dimension_numbers<[1], [0], [0], [1], [0, 0, 1, 1], [], []>} : vector<256x256xbf16>, vector<256x128xbf16>, vector<256x128xf32> -> vector<256x128xf32>
    %29 = arith.addf %24, %28 : vector<256x128xf32>
    %c0_19 = arith.constant 0 : index
    %c0_20 = arith.constant 0 : index
    %30 = vector.load %arg12[%c0_19, %c0_20] : memref<256x128xf32, #tpu.memory_space<vmem>>, vector<256x128xf32>
    tpu.vector_store %arg12[%c0_19, %c0_20], %29 {strides = array<i32>} : memref<256x128xf32, #tpu.memory_space<vmem>>, vector<256x128xf32>,
    %c0_21 = arith.constant 0 : index
    %c0_22 = arith.constant 0 : index
    %31 = vector.load %arg10[%c0_21, %c0_22] : memref<256x1xf32, #tpu.memory_space<vmem>>, vector<256x1xf32>
    tpu.vector_store %arg10[%c0_21, %c0_22], %10 {strides = array<i32>} : memref<256x1xf32, #tpu.memory_space<vmem>>, vector<256x1xf32>,
    %c0_i32_23 = arith.constant 0 : i32
    %32 = arith.cmpi eq, %arg2, %c0_i32_23 : i32
    %33 = arith.extui %32 : i1 to i32
    %c0_i32_24 = arith.constant 0 : i32
    %34 = arith.cmpi ne, %33, %c0_i32_24 : i32
    scf.if %34 {
      %c0_25 = arith.constant 0 : index
      %c0_26 = arith.constant 0 : index
      %35 = vector.load %arg11[%c0_25, %c0_26] : memref<256x1xf32, #tpu.memory_space<vmem>>, vector<256x1xf32>
      %36 = tpu.reciprocal %35 : vector<256x1xf32> -> vector<256x1xf32>
      %c0_27 = arith.constant 0 : index
      %c0_28 = arith.constant 0 : index
      %37 = vector.load %arg12[%c0_27, %c0_28] : memref<256x128xf32, #tpu.memory_space<vmem>>, vector<256x128xf32>
      %38 = vector.broadcast %36 : vector<256x1xf32> to vector<256x128xf32>
      %39 = arith.mulf %37, %38 : vector<256x128xf32>
      %c0_29 = arith.constant 0 : index
      %c0_30 = arith.constant 0 : index
      %c0_31 = arith.constant 0 : index
      %40 = vector.load %arg3[%c0_29, %c0_30, %c0_31] : memref<1x256x128xf32, #tpu.memory_space<vmem>>, vector<1x256x128xf32>
      %41 = vector.shape_cast %40 : vector<1x256x128xf32> to vector<256x128xf32>
      %42 = arith.addf %39, %41 : vector<256x128xf32>
      %c0_32 = arith.constant 0 : index
      %c0_33 = arith.constant 0 : index
      %c0_34 = arith.constant 0 : index
      %43 = vector.load %arg8[%c0_32, %c0_33, %c0_34] : memref<1x256x128xf32, #tpu.memory_space<vmem>>, vector<1x256x128xf32>
      %44 = vector.shape_cast %43 : vector<1x256x128xf32> to vector<256x128xf32>
      %45 = vector.shape_cast %42 : vector<256x128xf32> to vector<1x256x128xf32>
      tpu.vector_store %arg8[%c0_32, %c0_33, %c0_34], %45 {strides = array<i32>} : memref<1x256x128xf32, #tpu.memory_space<vmem>>, vector<1x256x128xf32>,
    } else {
    }
    return
  }
  func.func @transform_0(%arg0: i32, %arg1: i32, %arg2: i32) -> (i32, i32, i32) {
    %c0_i32 = arith.constant 0 : i32
    %c0_i32_0 = arith.constant 0 : i32
    return %arg0, %arg1, %c0_i32 : i32, i32, i32
  }
  func.func @transform_1(%arg0: i32, %arg1: i32, %arg2: i32) -> (i32, i32, i32) {
    %c0_i32 = arith.constant 0 : i32
    %c0_i32_0 = arith.constant 0 : i32
    return %arg0, %arg2, %c0_i32 : i32, i32, i32
  }
  func.func @transform_2(%arg0: i32, %arg1: i32, %arg2: i32) -> (i32, i32, i32) {
    %c0_i32 = arith.constant 0 : i32
    %c0_i32_0 = arith.constant 0 : i32
    return %arg0, %arg2, %c0_i32 : i32, i32, i32
  }
  func.func @transform_3(%arg0: i32, %arg1: i32, %arg2: i32) -> (i32, i32) {
    %c0_i32 = arith.constant 0 : i32
    %c0_i32_0 = arith.constant 0 : i32
    %c0_i32_1 = arith.constant 0 : i32
    return %c0_i32, %c0_i32_0 : i32, i32
  }
  func.func @transform_4(%arg0: i32, %arg1: i32, %arg2: i32) -> (i32, i32) {
    %c0_i32 = arith.constant 0 : i32
    %c0_i32_0 = arith.constant 0 : i32
    %c0_i32_1 = arith.constant 0 : i32
    return %c0_i32, %c0_i32_0 : i32, i32
  }
  func.func @transform_5(%arg0: i32, %arg1: i32, %arg2: i32) -> (i32, i32, i32) {
    %c0_i32 = arith.constant 0 : i32
    %c0_i32_0 = arith.constant 0 : i32
    return %arg0, %arg1, %c0_i32 : i32, i32, i32
  }
}

</mosaic_0001>

<bundles_post_ra>
// kernel: tpu_custom_call.1
= control target key start
LH: loop header
LB: loop body
LE: loop exit
PB: predicated region body
PF: predicated region fallthrough
CT: control target
= control target key end

     0   :  { %s6505_s0 = inlined_call_operand.hbm [shape: f32[2,256,128], index: 0, kind: input, shape index: {}]   ;;  %s6506_s1 = inlined_call_operand.hbm [shape: bf16[2,256,128], index: 1, kind: input, shape index: {}]   ;;  %s6507_s2 = inlined_call_operand.hbm [shape: bf16[2,256,128], index: 2, kind: input, shape index: {}]   ;;  %s6508_s3 = inlined_call_operand.hbm [shape: bf16[128,128], index: 3, kind: input, shape index: {}]   ;;  %s6509_s4 = inlined_call_operand.vmem [shape: f32[1,128], index: 4, kind: input, shape index: {}]   ;;  %s6510_s5 = inlined_call_operand.hbm [shape: f32[2,256,128], index: 5, kind: output, shape index: {}]  }
   0x1   :  { %6573 = sst [smem:[#allocation90_spill]] %s6506_s1 }
   0x2   :  { %6574 = sst [smem:[#allocation91_spill]] %s6507_s2 }
   0x3   :  { %6575 = sst [smem:[#allocation92_spill]] %s6508_s3 }
   0x4   :  { %10 = vsyncpa [#allocation7], 0 }
   0x5   :  { %12 = vsyncpa [#allocation7 + $0x1], 0 }
   0x6   :  { %13 = vsyncpa [#allocation10], 0 }
   0x7   :  { %15 = vsyncpa [#allocation10 + $0x1], 0 }
   0x8   :  { %16 = vsyncpa [#allocation13], 0 }
   0x9   :  { %17 = vsyncpa [#allocation8], 0 }
   0xa   :  { %19 = vsyncpa [#allocation8 + $0x1], 0  ;;  %s4677_s18 = smov 0   ;;  %s4679_s19 = smov 0  }
   0xb   :  { %s4681_s20 = smov 0   ;;  %s4683_s21 = smov 0  }
   0xc   :  { %s4685_s22 = smov 0   ;;  %s4687_s23 = smov 0  }
   0xd LB: > { %6576 = sst [smem:[#allocation19_spill]] %s4623_s20  ;;  %s44_s24 = sadd.s32 1, %s4631_s22  ;;  %s4635_s23 = sphi %s4687_s23, %s25_s23   ;;  %s4631_s22 = sphi %s4685_s22, %s6807_s22   ;;  %s4627_s21 = sphi %s4683_s21, %s6806_s21   ;;  %s4623_s20 = sphi %s4681_s20, %s6802_s20   ;;  %s4619_s19 = sphi %s4679_s19, %s6805_s19   ;;  %s4615_s18 = sphi %s4677_s18, %s6804_s18  }
   0xe   : > { %6577 = sst [smem:[#allocation20_spill]] %s4635_s23  ;;  %s53_s25 = sadd.s32 1, %s4623_s20 }
   0xf   : > { %p46_p0 = scmp.ge.s32.totalorder %s44_s24, 2  ;;  %p60_p1 = scmp.ne.s32.totalorder %s4623_s20, %s4619_s19 }
  0x10   : > { %p61_p2 = scmp.eq.s32.totalorder %s4635_s23, 0  ;;  %p3649_p4 = scmp.ge.s32.totalorder %s4635_s23, 2 }
  0x11   : > { %s6809_s24 = smov (%p46_p0, %s44_s24), 0  ;;  %p4104_p6 = scmp.lt.s32.totalorder %s4635_s23, 2 }
  0x12   : > { %6578 = sst [smem:[#allocation21_spill]] %s6809_s24  ;;  %p62_p3 = por %p61_p2, %p60_p1 }
  0x13   : > { %s48_s26 = ssub.s32 %s4631_s22, %s6809_s24  ;;  %s4722_s27 = sand.u32 1, %s4623_s20  }
  0x14   : > { %p51_p5 = scmp.eq.s32.totalorder %s48_s26, 0  ;;  %s257_s28 = sand.u32 1, %s4635_s23  }
  0x15   : > { %p4728_p7 = pnand %p4104_p6, %p62_p3  ;;  %s3653_s6 = sshll.u32 %s4722_s27, 7 }
  0x16   : > { %s4726_s29 = scalar_select %p51_p5, %s4623_s20, %s53_s25  }
  0x17   : > { %s3895_s7 = sshll.u32 %s4631_s22, 7  ;;  %s6581_s1 = sld [smem:[#allocation90_spill]] }
  0x18   : > { %6579 = sst [smem:[#allocation22_spill]] %s4726_s29  ;;  %s261_s11 = scalar_lea.vmem [#allocation9], %s3653_s6 }
  0x19   : > { %s271_s12 = sshll.u32 %s261_s11, 4  ;;  %s4737_s14 = scalar_lea.sflag [#allocation10], %s257_s28  ;;  %s272_s12 = int_to_ptr.vmem [resolvable:$true] %s271_s12 }
  0x1a   : > { %s6511_s15 = smov 64   ;;  %s6513_s16 = smov 4  }
  0x1b   : > { %s6582_s2 = sld [smem:[#allocation91_spill]]  ;;  %s285_s8 = scalar_lea.vmem [#allocation11], %s3653_s6 }
  0x1c   : > { %s295_s9 = sshll.u32 %s285_s8, 4  ;;  %s3646_s11 = sadd.s32 4294967294, %s4635_s23   ;;  %s4748_s9 = int_to_ptr.vmem [resolvable:$true] %s295_s9 }
  0x1d   : > { %s268_s10 = scalar_lea.hbm %s6581_s1, %s3895_s7  ;;  %p66_p8 = scmp.ne.s32.totalorder %s4619_s19, %s4615_s18 }
  0x1e   : > { %s269_s13 = sshll.u32 %s268_s10, 4  ;;  %s4753_s10 = sadd.s32 4294967295, %s4635_s23   ;;  %s270_s13 = int_to_ptr.hbm [resolvable:$true] %s269_s13 }
  0x1f   : > { %4095 = dma.hbm_to_vmem [thread:$0]  (!%p4728_p7), %s270_s13, 2048, %s272_s12, %s4737_s14, %s6511_s15, %s6511_s15, %s6513_s16  }
  0x20   : > { %p67_p9 = scmp.eq.s32.totalorder %s4753_s10, 0  ;;  %p190_p10 = scmp.eq.s32.totalorder %s4753_s10, 1 }
  0x21   : > { %s292_s26 = scalar_lea.hbm %s6582_s2, %s3895_s7  ;;  %p196_p11 = scmp.eq.s32.totalorder %s3646_s11, 1 }
  0x22   : > { %s293_s28 = sshll.u32 %s292_s26, 4  ;;  %p3647_p12 = scmp.ge.s32.totalorder %s4635_s23, 1  ;;  %s4750_s28 = int_to_ptr.hbm [resolvable:$true] %s293_s28 }
  0x23   : > { %p4763_p13 = por %p67_p9, %p66_p8  ;;  %p4770_p0 = por %p190_p10, %p60_p1 }
  0x24   : > { %p4774_p2 = por %p196_p11, %p66_p8  ;;  %p203_p3 = scmp.lt.s32.totalorder %s4635_s23, 3 }
  0x25   : > { %s6587_s3 = sld [smem:[#allocation92_spill]]  ;;  %s4639_s8 = smov [#allocation12]  }
  0x26   : > { %s6585_s12 = scalar_select %p4774_p2, 1, 0 }
  0x27   : > { %p4782_p5 = pnand %p3647_p12, %p203_p3  ;;  %s216_s11 = sshll.u32 %s4639_s8, 4  ;;  %s217_s11 = int_to_ptr.vmem [resolvable:$true] %s216_s11 }
  0x28   : > { %6586 = sst [smem:[#allocation23_spill]] %s6585_s12  ;;  %s3650_s15 = sshll.u32 %s4722_s27, 8 }
  0x29   : > { %p4085_p1 = pneg %p4782_p5  ;;  %s3894_s13 = sshll.u32 %s4631_s22, 8 }
  0x2a   : > { %s237_s17 = scalar_lea.vmem [#allocation6], %s3650_s15  ;;  %s6589_s24 = smov 4  }
  0x2b   : > { %s214_s25 = sshll.u32 %s6587_s3, 4  ;;  %p4086_p6 = pnand %p4085_p1, %p67_p9  ;;  %s215_s25 = int_to_ptr.hbm [resolvable:$true] %s214_s25 }
  0x2c   : > { %s247_s16 = sshll.u32 %s237_s17, 4  ;;  %s244_s3 = scalar_lea.hbm %s6505_s0, %s3894_s13  ;;  %s248_s16 = int_to_ptr.vmem [resolvable:$true] %s247_s16 }
  0x2d   : > { %s6590_s29 = smov 64   ;;  %s245_s8 = sshll.u32 %s244_s3, 4  ;;  %s246_s8 = int_to_ptr.hbm [resolvable:$true] %s245_s8 }
  0x2e   : > { %4088 = dma.hbm_to_vmem [thread:$0]  (!%p4086_p6), %s215_s25, 1024, %s217_s11, [#allocation13], %s6590_s29, %s6590_s29, %s6589_s24  }
  0x2f   : > { %s234_s20 = scalar_lea.sflag [#allocation7], %s4722_s27  ;;  %s4640_s23 = smov 128  }
  0x30   : > { %s4641_s12 = smov 8   ;;  %307 = sbr.rel (%p4782_p5) target bundleno = 1861 (0x745), region = 40 }
  0x31   : > { %4092 = dma.hbm_to_vmem [thread:$0]  (!%p4728_p7), %s246_s8, 4096, %s248_s16, %s234_s20, %s4640_s23, %s4640_s23, %s4641_s12  }
  0x32   : > { %4098 = dma.hbm_to_vmem [thread:$0]  (!%p4728_p7), %s4750_s28, 2048, %s4748_s9, %s4737_s14, %s6590_s29, %s6590_s29, %s6589_s24  }
  0x35   : > { %s4812_s1 = sand.u32 1, %s4619_s19  }
  0x36   : > { %s3660_s2 = sshll.u32 %s4812_s1, 8  ;;  %s310_s3 = scalar_lea.sflag [#allocation7], %s4812_s1 }
  0x37   : > { %s4818_s27 = scalar_lea.vmem [#allocation6], %s3660_s2 }
  0x38   : > { %4598 = dma.done.wait (%p4763_p13), %s310_s3, 4096  }
  0x39   : > { %4600 = vsyncadd (%p4763_p13), %s310_s3, 4294963200  ;;  %s319_s20 = sand.u32 1, %s4753_s10   ;;  %s3661_s23 = sshll.u32 %s4812_s1, 7 }
  0x3a   : > { %s320_s24 = scalar_lea.sflag [#allocation10], %s319_s20  ;;  %s4826_s29 = scalar_lea.vmem [#allocation9], %s3661_s23 }
  0x3b   : > { %4602 = dma.done.wait (%p4763_p13), %s320_s24, 4096  }
  0x3c   : > { %4604 = vsyncadd (%p4763_p13), %s320_s24, 4294963200  ;;  %s4832_s30 = scalar_lea.vmem [#allocation11], %s3661_s23 }
  0x3d   : > { %4606 = dma.done.wait (%p67_p9), [#allocation13], 1024  }
  0x3e   : > { %4608 = vsyncadd (%p67_p9), [#allocation13], 4294966272  ;;  %v3904_v0 = vld [vmem:[#allocation12 + $0x38] sm:$0xff]  ;;  %v3903_v1 = vld [vmem:[#allocation12 + $0x30] sm:$0xff]  ;;  %vm653_vm0 = vcmask 7168   ;;  %s6045_s16 = scalar_lea.vmem [#allocation14], %s3660_s2 }
  0x3f   : > { %500 = vmatpush.bf16.msra.mxu0 %v3904_v0  ;;  %4049 = vmatpush.bf16.msra.mxu1 %v3904_v0  ;;  %v3902_v2 = vld [vmem:[#allocation12 + $0x28] sm:$0xff]  ;;  %v3901_v3 = vld [vmem:[#allocation12 + $0x20] sm:$0xff]  ;;  %v3900_v4 = vld [vmem:[#allocation12 + $0x18] sm:$0xff]  ;;  %s3953_s9 = sshll.u32 %s4627_s21, 8  ;;  %s3493_s12 = sshll.u32 %s6045_s16, 4  ;;  %s3494_s12 = int_to_ptr.vmem [resolvable:$true] %s3493_s12 }
  0x40   : > { %4050 = vmatpush.bf16.msra.mxu2 %v3904_v0  ;;  %4051 = vmatpush.bf16.msra.mxu3 %v3904_v0  ;;  %v3899_v5 = vld [vmem:[#allocation12 + $0x10] sm:$0xff]  ;;  %v3898_v6 = vld [vmem:[#allocation12 + $0x8] sm:$0xff]  ;;  %v3897_v7 = vld [vmem:[#allocation12] sm:$0xff]  ;;  %s3492_s6 = scalar_lea.hbm %s6510_s5, %s3953_s9  ;;  %s3479_s21 = scalar_lea.sflag [#allocation8], %s4812_s1 }
  0x41   : > { %v384_v8 = vld [vmem:[%s4818_s27] sm:$0xff]  ;;  %v385_v9 = vld [vmem:[%s4818_s27 + $0x8] sm:$0xff]  ;;  %v386_v11 = vld [vmem:[%s4818_s27 + $0x10] sm:$0xff]  ;;  %s3495_s25 = sshll.u32 %s3492_s6, 4  ;;  %s4565_s8 = scalar_lea.hbm %s6510_s5, 512  ;;  %s3496_s25 = int_to_ptr.hbm [resolvable:$true] %s3495_s25 }
  0x42   : > { %v416_v10 = vpack.c.bf16 %v385_v9, %v384_v8  ;;  %v387_v12 = vld [vmem:[%s4818_s27 + $0x18] sm:$0xff]  ;;  %v388_v14 = vld [vmem:[%s4818_s27 + $0x20] sm:$0xff]  ;;  %v389_v15 = vld [vmem:[%s4818_s27 + $0x28] sm:$0xff]  ;;  %s4559_s26 = sshra.s32 %s3496_s25, 4  ;;  %s4560_s26 = int_to_ptr.hbm [resolvable:$true] %s4559_s26 }
  0x43   : > { %501 = vmatpush.bf16.msra.mxu0 %v3903_v1  ;;  %4052 = vmatpush.bf16.msra.mxu1 %v3903_v1  ;;  %v417_v13 = vpack.c.bf16 %v387_v12, %v386_v11  ;;  %v418_v16 = vpack.c.bf16 %v389_v15, %v388_v14  ;;  %v394_v17 = vld [vmem:[%s4818_s27 + $0x50] sm:$0xff]  ;;  %v395_v18 = vld [vmem:[%s4818_s27 + $0x58] sm:$0xff]  ;;  %v396_v30 = vld [vmem:[%s4818_s27 + $0x60] sm:$0xff]  ;;  %s4561_s11 = scalar_lea.hbm %s4560_s26, 256  ;;  %p4566_p10 = scmp.lt.s32.totalorder %s4560_s26, %s6510_s5 }
  0x44   : > { %4053 = vmatpush.bf16.msra.mxu2 %v3903_v1  ;;  %4054 = vmatpush.bf16.msra.mxu3 %v3903_v1  ;;  %v3928_v19 = vld [vmem:[%s4826_s29 + $0x38] sm:$0xff]  ;;  %v421_v20 = vpack.c.bf16 %v395_v18, %v394_v17  ;;  %v402_v22 = vld [vmem:[%s4818_s27 + $0x90] sm:$0xff]  ;;  %v397_v31 = vld [vmem:[%s4818_s27 + $0x68] sm:$0xff]  ;;  %p4562_p7 = scmp.ne.s32.totalorder %s4560_s26, %s4561_s11  ;;  %p4567_p11 = scmp.lt.s32.totalorder %s4565_s8, %s4561_s11 }
  0x45   : > { %v3936_v21 = vld [vmem:[%s4826_s29 + $0x78] sm:$0xff]  ;;  %v3927_v25 = vld [vmem:[%s4826_s29 + $0x30] sm:$0xff]  ;;  %v3926_v32 = vld [vmem:[%s4826_s29 + $0x28] sm:$0xff]  ;;  %v422_v33 = vpack.c.bf16 %v397_v31, %v396_v30 }
  0x46   : > { %v403_v23 = vld [vmem:[%s4818_s27 + $0x98] sm:$0xff]  ;;  %v3935_v26 = vld [vmem:[%s4826_s29 + $0x70] sm:$0xff]  ;;  %v3934_v34 = vld [vmem:[%s4826_s29 + $0x68] sm:$0xff]  ;;  %p4563_p8 = pnand %p4562_p7, %p4770_p0  ;;  %p4568_p12 = por %p4567_p11, %p4566_p10 }
  0x47   : > { %502 = vmatpush.bf16.msra.mxu0 %v3902_v2  ;;  %4055 = vmatpush.bf16.msra.mxu1 %v3902_v2  ;;  %v425_v24 = vpack.c.bf16 %v403_v23, %v402_v22  ;;  %v390_v27 = vld [vmem:[%s4818_s27 + $0x30] sm:$0xff]  ;;  %v391_v28 = vld [vmem:[%s4818_s27 + $0x38] sm:$0xff]  ;;  %v404_v35 = vld [vmem:[%s4818_s27 + $0xa0] sm:$0xff] }
  0x48   : > { %4056 = vmatpush.bf16.msra.mxu2 %v3902_v2  ;;  %4057 = vmatpush.bf16.msra.mxu3 %v3902_v2  ;;  %v419_v29 = vpack.c.bf16 %v391_v28, %v390_v27  ;;  %v405_v36 = vld [vmem:[%s4818_s27 + $0xa8] sm:$0xff]  ;;  %v3925_v38 = vld [vmem:[%s4826_s29 + $0x20] sm:$0xff]  ;;  %v398_v43 = vld [vmem:[%s4818_s27 + $0x70] sm:$0xff]  ;;  %p4564_p9 = pneg %p4563_p8 }
  0x49   : > { %v426_v37 = vpack.c.bf16 %v405_v36, %v404_v35  ;;  %v3933_v39 = vld [vmem:[%s4826_s29 + $0x60] sm:$0xff]  ;;  %v393_v41 = vld [vmem:[%s4818_s27 + $0x48] sm:$0xff]  ;;  %v399_v44 = vld [vmem:[%s4818_s27 + $0x78] sm:$0xff] }
  0x4a   : > { %v392_v40 = vld [vmem:[%s4818_s27 + $0x40] sm:$0xff]  ;;  %v3924_v45 = vld [vmem:[%s4826_s29 + $0x18] sm:$0xff]  ;;  %v423_v46 = vpack.c.bf16 %v399_v44, %v398_v43  ;;  %v401_v49 = vld [vmem:[%s4818_s27 + $0x88] sm:$0xff]  ;;  %p4569_p13 = pnand %p4568_p12, %p4564_p9 }
  0x4b   : > { %503 = vmatpush.bf16.msra.mxu0 %v3901_v3  ;;  %4058 = vmatpush.bf16.msra.mxu1 %v3901_v3  ;;  %v420_v42 = vpack.c.bf16 %v393_v41, %v392_v40  ;;  %v3932_v47 = vld [vmem:[%s4826_s29 + $0x58] sm:$0xff]  ;;  %v400_v48 = vld [vmem:[%s4818_s27 + $0x80] sm:$0xff]  ;;  %v3923_v51 = vld [vmem:[%s4826_s29 + $0x10] sm:$0xff] }
  0x4c   : > { %4059 = vmatpush.bf16.msra.mxu2 %v3901_v3  ;;  %4060 = vmatpush.bf16.msra.mxu3 %v3901_v3  ;;  %v424_v50 = vpack.c.bf16 %v401_v49, %v400_v48  ;;  %v3931_v52 = vld [vmem:[%s4826_s29 + $0x50] sm:$0xff]  ;;  %v3922_v53 = vld [vmem:[%s4826_s29 + $0x8] sm:$0xff]  ;;  %v3921_v55 = vld [vmem:[%s4826_s29] sm:$0xff] }
  0x4d   : > { %v3930_v54 = vld [vmem:[%s4826_s29 + $0x48] sm:$0xff]  ;;  %v3929_v56 = vld [vmem:[%s4826_s29 + $0x40] sm:$0xff]  ;;  %v407_v43 = vld [vmem:[%s4818_s27 + $0xb8] sm:$0xff] }
  0x4e   : > { %v4879_v58 = vld [vmem:[%s6509_s4] ss:$0 sm:$0xff] }
  0x4f   : > { %504 = vmatpush.bf16.msra.mxu0 %v3900_v4  ;;  %4061 = vmatpush.bf16.msra.mxu1 %v3900_v4 }
  0x50   : > { %4062 = vmatpush.bf16.msra.mxu2 %v3900_v4  ;;  %4063 = vmatpush.bf16.msra.mxu3 %v3900_v4 }
  0x53   : > { %505 = vmatpush.bf16.msra.mxu0 %v3899_v5  ;;  %4064 = vmatpush.bf16.msra.mxu1 %v3899_v5 }
  0x54   : > { %4065 = vmatpush.bf16.msra.mxu2 %v3899_v5  ;;  %4066 = vmatpush.bf16.msra.mxu3 %v3899_v5 }
  0x57   : > { %506 = vmatpush.bf16.msra.mxu0 %v3898_v6  ;;  %4067 = vmatpush.bf16.msra.mxu1 %v3898_v6 }
  0x58   : > { %4068 = vmatpush.bf16.msra.mxu2 %v3898_v6  ;;  %4069 = vmatpush.bf16.msra.mxu3 %v3898_v6 }
  0x5b   : > { %507 = vmatpush.bf16.msra.mxu0 %v3897_v7  ;;  %4070 = vmatpush.bf16.msra.mxu1 %v3897_v7 }
  0x5c   : > { %4071 = vmatpush.bf16.msra.mxu2 %v3897_v7  ;;  %4072 = vmatpush.bf16.msra.mxu3 %v3897_v7 }
  0x5e   : > { %508 = vmatmul.bf16.vlgmr.msra.gmra.mxu0 %v416_v10  ;;  %533 = vmatmul.bf16.vlgmr.msra.gmra.mxu1 %v421_v20 }
  0x5f   : > { %1006 = vmatpush.bf16.xpose.msrb.mxu1 %v3928_v19  ;;  %553 = vmatmul.bf16.vlgmr.msra.gmra.mxu2 %v425_v24 }
  0x60   : > { %1095 = vmatpush.bf16.xpose.msrb.mxu2 %v3936_v21 }
  0x67   : > { %1007 = vmatpush.bf16.xpose.msrb.mxu1 %v3927_v25 }
  0x68   : > { %1096 = vmatpush.bf16.xpose.msrb.mxu2 %v3935_v26 }
  0x6e   : > { %513 = vmatmul.bf16.gmra.mxu0 %v417_v13  ;;  %538 = vmatmul.bf16.gmra.mxu1 %v422_v33 }
  0x6f   : > { %1008 = vmatpush.bf16.xpose.msrb.mxu1 %v3926_v32  ;;  %558 = vmatmul.bf16.gmra.mxu2 %v426_v37 }
  0x70   : > { %1097 = vmatpush.bf16.xpose.msrb.mxu2 %v3934_v34 }
  0x77   : > { %1009 = vmatpush.bf16.xpose.msrb.mxu1 %v3925_v38 }
  0x78   : > { %1098 = vmatpush.bf16.xpose.msrb.mxu2 %v3933_v39 }
  0x7e   : > { %518 = vmatmul.bf16.gmra.mxu0 %v418_v16  ;;  %543 = vmatmul.bf16.gmra.mxu1 %v423_v46 }
  0x7f   : > { %1010 = vmatpush.bf16.xpose.msrb.mxu1 %v3924_v45 }
  0x80   : > { %1099 = vmatpush.bf16.xpose.msrb.mxu2 %v3932_v47 }
  0x87   : > { %1011 = vmatpush.bf16.xpose.msrb.mxu1 %v3923_v51 }
  0x88   : > { %1100 = vmatpush.bf16.xpose.msrb.mxu2 %v3931_v52 }
  0x8e   : > { %523 = vmatmul.bf16.gmra.mxu0 %v419_v29  ;;  %548 = vmatmul.bf16.gmra.mxu1 %v424_v50 }
  0x8f   : > { %1012 = vmatpush.bf16.xpose.msrb.mxu1 %v3922_v53 }
  0x90   : > { %1101 = vmatpush.bf16.xpose.msrb.mxu2 %v3930_v54 }
  0x97   : > { %1013 = vmatpush.bf16.xpose.msrb.mxu1 %v3921_v55 }
  0x98   : > { %1102 = vmatpush.bf16.xpose.msrb.mxu2 %v3929_v56 }
  0x9e   : > { %528 = vmatmul.bf16.gmra.mxu0 %v420_v42  ;;  %v406_v42 = vld [vmem:[%s4818_s27 + $0xb0] sm:$0xff] }
  0x9f   : > { %v427_v45 = vpack.c.bf16 %v407_v43, %v406_v42 }
  0xa1   : > { %563 = vmatmul.bf16.vlgmr.msra.gmra.mxu3 %v427_v45 }
  0xdb   : > { %v509_v57 = vpop.f32.mrf.mxu0  ;;  %v534_v8 = vpop.f32.mrf.mxu1 }
  0xdc   : > { %v510_v60 = vadd.f32 %v4879_v58, %v509_v57  ;;  %v535_v12 = vadd.f32 %v4879_v58, %v534_v8 }
  0xe2   : > { %v554_v34 = vpop.f32.mrf.mxu2 }
  0xe3   : > { %v511_v59 = vpop.f32.mrf.mxu0  ;;  %v536_v14 = vpop.f32.mrf.mxu1  ;;  %v555_v40 = vadd.f32 %v4879_v58, %v554_v34 }
  0xe4   : > { %v512_v61 = vadd.f32 %v4879_v58, %v511_v59  ;;  %v537_v15 = vadd.f32 %v4879_v58, %v536_v14 }
  0xe6   : > { %v3957_v62 = vpack.c.bf16 %v512_v61, %v510_v60  ;;  %v3982_v16 = vpack.c.bf16 %v537_v15, %v535_v12 }
  0xe8   : > { %3958 = vst [vmem:[#allocation2 + $0x30] sm:$0xff] %v3957_v62  }
  0xe9   : > { %4038 = vst [vmem:[#allocation2 + $0x68] sm:$0xff] %v3982_v16  }
  0xea   : > { %v556_v41 = vpop.f32.mrf.mxu2 }
  0xeb   : > { %v514_v63 = vpop.f32.mrf.mxu0  ;;  %v539_v19 = vpop.f32.mrf.mxu1  ;;  %v557_v44 = vadd.f32 %v4879_v58, %v556_v41 }
  0xec   : > { %v515_v2 = vadd.f32 %v4879_v58, %v514_v63  ;;  %v540_v23 = vadd.f32 %v4879_v58, %v539_v19 }
  0xed   : > { %v4002_v47 = vpack.c.bf16 %v557_v44, %v555_v40 }
  0xef   : > { %v3905_v0 = vld [vmem:[#allocation2 + $0x30] sm:$0xff]  ;;  %4042 = vst [vmem:[#allocation2 + $0x20] sm:$0xff] %v4002_v47  }
  0xf0   : > { %1014 = vmatmul.bf16.vlgmr.msrb.gmra.mxu1 %v3905_v0  ;;  %1103 = vmatmul.bf16.vlgmr.msrb.gmra.mxu2 %v3905_v0  ;;  %v3910_v53 = vld [vmem:[#allocation2 + $0x68] sm:$0xff] }
  0xf2   : > { %v559_v48 = vpop.f32.mrf.mxu2 }
  0xf3   : > { %v516_v1 = vpop.f32.mrf.mxu0  ;;  %v541_v25 = vpop.f32.mrf.mxu1  ;;  %v560_v54 = vadd.f32 %v4879_v58, %v559_v48 }
  0xf4   : > { %v517_v3 = vadd.f32 %v4879_v58, %v516_v1  ;;  %v542_v26 = vadd.f32 %v4879_v58, %v541_v25 }
  0xf6   : > { %v3962_v4 = vpack.c.bf16 %v517_v3, %v515_v2  ;;  %v3987_v27 = vpack.c.bf16 %v542_v26, %v540_v23  ;;  %v408_v2 = vld [vmem:[%s4818_s27 + $0xc0] sm:$0xff]  ;;  %v409_v3 = vld [vmem:[%s4818_s27 + $0xc8] sm:$0xff] }
  0xf7   : > { %v3914_v8 = vld [vmem:[#allocation2 + $0x20] sm:$0xff] }
  0xf8   : > { %4034 = vst [vmem:[#allocation2] sm:$0xff] %v3962_v4   ;;  %v428_v4 = vpack.c.bf16 %v409_v3, %v408_v2 }
  0xf9   : > { %4039 = vst [vmem:[#allocation2 + $0x8] sm:$0xff] %v3987_v27  }
  0xfa   : > { %v561_v55 = vpop.f32.mrf.mxu2  ;;  %568 = vmatmul.bf16.gmra.mxu3 %v428_v4 }
  0xfb   : > { %v519_v5 = vpop.f32.mrf.mxu0  ;;  %v544_v30 = vpop.f32.mrf.mxu1  ;;  %v562_v56 = vadd.f32 %v4879_v58, %v561_v55 }
  0xfc   : > { %v520_v9 = vadd.f32 %v4879_v58, %v519_v5  ;;  %v545_v35 = vadd.f32 %v4879_v58, %v544_v30  ;;  %v410_v30 = vld [vmem:[%s4818_s27 + $0xd0] sm:$0xff] }
  0xfd   : > { %v4007_v57 = vpack.c.bf16 %v562_v56, %v560_v54 }
  0xff   : > { %v3906_v6 = vld [vmem:[#allocation2] sm:$0xff]  ;;  %4043 = vst [vmem:[#allocation2 + $0x10] sm:$0xff] %v4007_v57  }
 0x100   : > { %1019 = vmatmul.bf16.gmra.mxu1 %v3906_v6  ;;  %1108 = vmatmul.bf16.gmra.mxu2 %v3906_v6  ;;  %v3911_v59 = vld [vmem:[#allocation2 + $0x8] sm:$0xff] }
 0x103   : > { %v521_v7 = vpop.f32.mrf.mxu0  ;;  %v546_v36 = vpop.f32.mrf.mxu1 }
 0x104   : > { %v522_v10 = vadd.f32 %v4879_v58, %v521_v7  ;;  %v547_v37 = vadd.f32 %v4879_v58, %v546_v36 }
 0x106   : > { %v3967_v11 = vpack.c.bf16 %v522_v10, %v520_v9  ;;  %v3992_v38 = vpack.c.bf16 %v547_v37, %v545_v35  ;;  %v3915_v15 = vld [vmem:[#allocation2 + $0x10] sm:$0xff] }
 0x108   : > { %4035 = vst [vmem:[#allocation2 + $0x58] sm:$0xff] %v3967_v11  }
 0x109   : > { %4040 = vst [vmem:[#allocation2 + $0x48] sm:$0xff] %v3992_v38   ;;  %v4642_v38 = vmov -inf  }
 0x10a   : > { %654 = vst.msk [vmem:[#allocation3] sm:$0xff] %vm653_vm0, %v4642_v38 }
 0x10b   : > { %v524_v13 = vpop.f32.mrf.mxu0  ;;  %v549_v46 = vpop.f32.mrf.mxu1  ;;  %655 = vst.msk [vmem:[#allocation3 + $0x8] sm:$0xff] %vm653_vm0, %v4642_v38 }
 0x10c   : > { %v525_v20 = vadd.f32 %v4879_v58, %v524_v13  ;;  %v550_v49 = vadd.f32 %v4879_v58, %v549_v46  ;;  %656 = vst.msk [vmem:[#allocation3 + $0x10] sm:$0xff] %vm653_vm0, %v4642_v38 }
 0x10d   : > { %657 = vst.msk [vmem:[#allocation3 + $0x18] sm:$0xff] %vm653_vm0, %v4642_v38 }
 0x10e   : > { %658 = vst.msk [vmem:[#allocation3 + $0x20] sm:$0xff] %vm653_vm0, %v4642_v38 }
 0x10f   : > { %v3907_v17 = vld [vmem:[#allocation2 + $0x58] sm:$0xff]  ;;  %659 = vst.msk [vmem:[#allocation3 + $0x28] sm:$0xff] %vm653_vm0, %v4642_v38 }
 0x110   : > { %1024 = vmatmul.bf16.gmra.mxu1 %v3907_v17  ;;  %1113 = vmatmul.bf16.gmra.mxu2 %v3907_v17  ;;  %v3912_v60 = vld [vmem:[#allocation2 + $0x48] sm:$0xff]  ;;  %660 = vst.msk [vmem:[#allocation3 + $0x30] sm:$0xff] %vm653_vm0, %v4642_v38 }
 0x111   : > { %661 = vst.msk [vmem:[#allocation3 + $0x38] sm:$0xff] %vm653_vm0, %v4642_v38  ;;  %v1184_v3 = vld [vmem:[#allocation3] sm:$0xff] }
 0x112   : > { %662 = vst.msk [vmem:[#allocation3 + $0x40] sm:$0xff] %vm653_vm0, %v4642_v38 }
 0x113   : > { %v526_v18 = vpop.f32.mrf.mxu0  ;;  %v551_v50 = vpop.f32.mrf.mxu1  ;;  %663 = vst.msk [vmem:[#allocation3 + $0x48] sm:$0xff] %vm653_vm0, %v4642_v38 }
 0x114   : > { %v527_v21 = vadd.f32 %v4879_v58, %v526_v18  ;;  %v552_v51 = vadd.f32 %v4879_v58, %v551_v50  ;;  %664 = vst.msk [vmem:[#allocation3 + $0x50] sm:$0xff] %vm653_vm0, %v4642_v38  ;;  %v413_v50 = vld [vmem:[%s4818_s27 + $0xe8] sm:$0xff] }
 0x115   : > { %665 = vst.msk [vmem:[#allocation3 + $0x58] sm:$0xff] %vm653_vm0, %v4642_v38 }
 0x116   : > { %v3972_v22 = vpack.c.bf16 %v527_v21, %v525_v20  ;;  %v3997_v52 = vpack.c.bf16 %v552_v51, %v550_v49  ;;  %666 = vst.msk [vmem:[#allocation3 + $0x60] sm:$0xff] %vm653_vm0, %v4642_v38  ;;  %v412_v49 = vld [vmem:[%s4818_s27 + $0xe0] sm:$0xff] }
 0x117   : > { %667 = vst.msk [vmem:[#allocation3 + $0x68] sm:$0xff] %vm653_vm0, %v4642_v38 }
 0x118   : > { %4036 = vst [vmem:[#allocation2 + $0x18] sm:$0xff] %v3972_v22  }
 0x119   : > { %4041 = vst [vmem:[#allocation2 + $0x40] sm:$0xff] %v3997_v52   ;;  %v430_v52 = vpack.c.bf16 %v413_v50, %v412_v49 }
 0x11a   : > { %668 = vst.msk [vmem:[#allocation3 + $0x70] sm:$0xff] %vm653_vm0, %v4642_v38 }
 0x11b   : > { %v529_v24 = vpop.f32.mrf.mxu0  ;;  %669 = vst.msk [vmem:[#allocation3 + $0x78] sm:$0xff] %vm653_vm0, %v4642_v38 }
 0x11c   : > { %v530_v31 = vadd.f32 %v4879_v58, %v529_v24  ;;  %670 = vst.msk [vmem:[#allocation3 + $0x80] sm:$0xff] %vm653_vm0, %v4642_v38 }
 0x11d   : > { %671 = vst.msk [vmem:[#allocation3 + $0x88] sm:$0xff] %vm653_vm0, %v4642_v38 }
 0x11e   : > { %672 = vst.msk [vmem:[#allocation3 + $0x90] sm:$0xff] %vm653_vm0, %v4642_v38 }
 0x11f   : > { %v3908_v28 = vld [vmem:[#allocation2 + $0x18] sm:$0xff]  ;;  %673 = vst.msk [vmem:[#allocation3 + $0x98] sm:$0xff] %vm653_vm0, %v4642_v38 }
 0x120   : > { %1029 = vmatmul.bf16.gmra.mxu1 %v3908_v28  ;;  %1118 = vmatmul.bf16.gmra.mxu2 %v3908_v28  ;;  %v3913_v62 = vld [vmem:[#allocation2 + $0x40] sm:$0xff]  ;;  %674 = vst.msk [vmem:[#allocation3 + $0xa0] sm:$0xff] %vm653_vm0, %v4642_v38 }
 0x121   : > { %675 = vst.msk [vmem:[#allocation3 + $0xa8] sm:$0xff] %vm653_vm0, %v4642_v38 }
 0x122   : > { %676 = vst.msk [vmem:[#allocation3 + $0xb0] sm:$0xff] %vm653_vm0, %v4642_v38 }
 0x123   : > { %v531_v29 = vpop.f32.mrf.mxu0  ;;  %677 = vst.msk [vmem:[#allocation3 + $0xb8] sm:$0xff] %vm653_vm0, %v4642_v38 }
 0x124   : > { %v532_v32 = vadd.f32 %v4879_v58, %v531_v29  ;;  %v564_v37 = vpop.f32.mrf.mxu3  ;;  %678 = vst.msk [vmem:[#allocation3 + $0xc0] sm:$0xff] %vm653_vm0, %v4642_v38 }
 0x125   : > { %v565_v42 = vadd.f32 %v4879_v58, %v564_v37  ;;  %679 = vst.msk [vmem:[#allocation3 + $0xc8] sm:$0xff] %vm653_vm0, %v4642_v38 }
 0x126   : > { %v3977_v33 = vpack.c.bf16 %v532_v32, %v530_v31  ;;  %v411_v31 = vld [vmem:[%s4818_s27 + $0xd8] sm:$0xff]  ;;  %680 = vst.msk [vmem:[#allocation3 + $0xd0] sm:$0xff] %vm653_vm0, %v4642_v38 }
 0x127   : > { %681 = vst.msk [vmem:[#allocation3 + $0xd8] sm:$0xff] %vm653_vm0, %v4642_v38 }
 0x128   : > { %4037 = vst [vmem:[#allocation2 + $0x50] sm:$0xff] %v3977_v33   ;;  %v429_v33 = vpack.c.bf16 %v411_v31, %v410_v30  ;;  %v5125_v31 = vld [vmem:[#allocation3 + $0x10] sm:$0xff] }
 0x129   : > { %682 = vst.msk [vmem:[#allocation3 + $0xe0] sm:$0xff] %vm653_vm0, %v4642_v38 }
 0x12a   : > { %573 = vmatmul.bf16.gmra.mxu3 %v429_v33  ;;  %683 = vst.msk [vmem:[#allocation3 + $0xe8] sm:$0xff] %vm653_vm0, %v4642_v38 }
 0x12b   : > { %684 = vst.msk [vmem:[#allocation3 + $0xf0] sm:$0xff] %vm653_vm0, %v4642_v38 }
 0x12c   : > { %v566_v43 = vpop.f32.mrf.mxu3  ;;  %685 = vst.msk [vmem:[#allocation3 + $0xf8] sm:$0xff] %vm653_vm0, %v4642_v38  ;;  %v5146_v38 = vld [vmem:[#allocation3 + $0x18] sm:$0xff] }
 0x12d   : > { %v567_v44 = vadd.f32 %v4879_v58, %v566_v43 }
 0x12f   : > { %v3909_v39 = vld [vmem:[#allocation2 + $0x50] sm:$0xff]  ;;  %v4012_v45 = vpack.c.bf16 %v567_v44, %v565_v42 }
 0x130   : > { %1034 = vmatmul.bf16.gmra.mxu1 %v3909_v39  ;;  %1123 = vmatmul.bf16.gmra.mxu2 %v3909_v39  ;;  %v414_v44 = vld [vmem:[%s4818_s27 + $0xf0] sm:$0xff] }
 0x131   : > { %4044 = vst [vmem:[#allocation2 + $0x38] sm:$0xff] %v4012_v45   ;;  %v415_v45 = vld [vmem:[%s4818_s27 + $0xf8] sm:$0xff] }
 0x132   : > { %v431_v49 = vpack.c.bf16 %v415_v45, %v414_v44 }
 0x138   : > { %v3916_v55 = vld [vmem:[#allocation2 + $0x38] sm:$0xff] }
 0x13a   : > { %578 = vmatmul.bf16.gmra.mxu3 %v430_v52 }
 0x140   : > { %1039 = vmatmul.bf16.gmra.mxu1 %v3910_v53  ;;  %1128 = vmatmul.bf16.gmra.mxu2 %v3910_v53 }
 0x14a   : > { %583 = vmatmul.bf16.gmra.mxu3 %v431_v49 }
 0x150   : > { %1044 = vmatmul.bf16.gmra.mxu1 %v3911_v59  ;;  %1133 = vmatmul.bf16.gmra.mxu2 %v3911_v59  ;;  %v4643_v59 = vmov 0  }
 0x151   : > { %4165 = vset.pattern.permute.xlu2 %v4643_v59  ;;  %4166 = vset.pattern.permute.xlu0 %v4643_v59 }
 0x152   : > { %4167 = vset.pattern.permute.xlu1 %v4643_v59 }
 0x160   : > { %1049 = vmatmul.bf16.gmra.mxu1 %v3912_v60  ;;  %1138 = vmatmul.bf16.gmra.mxu2 %v3912_v60 }
 0x16d   : > { %v4905_v61 = vpop.f32.mrf.mxu1 }
 0x170   : > { %1054 = vmatmul.bf16.gmra.mxu1 %v3913_v62  ;;  %1143 = vmatmul.bf16.gmra.mxu2 %v3913_v62 }
 0x173   : > { %v4907_v63 = vpop.f32.mrf.mxu2 }
 0x174   : > { %v1216_v0 = vmax.f32 %v4905_v61, %v4907_v63 }
 0x175   : > { %v4911_v1 = vpop.f32.mrf.mxu1 }
 0x176   : > { %1217 = vmax.xlane.f32.xlu0 %v1216_v0  ;;  %v4644_v0 = vmov 0.0  }
 0x177   : > { %686 = vst.msk [vmem:[#allocation4] sm:$0xff] %vm653_vm0, %v4644_v0 }
 0x178   : > { %687 = vst.msk [vmem:[#allocation4 + $0x8] sm:$0xff] %vm653_vm0, %v4644_v0 }
 0x179   : > { %688 = vst.msk [vmem:[#allocation4 + $0x10] sm:$0xff] %vm653_vm0, %v4644_v0 }
 0x17a   : > { %689 = vst.msk [vmem:[#allocation4 + $0x18] sm:$0xff] %vm653_vm0, %v4644_v0 }
 0x17b   : > { %v4915_v5 = vpop.f32.mrf.mxu2  ;;  %690 = vst.msk [vmem:[#allocation4 + $0x20] sm:$0xff] %vm653_vm0, %v4644_v0 }
 0x17c   : > { %v1219_v6 = vmax.f32 %v4911_v1, %v4915_v5  ;;  %691 = vst.msk [vmem:[#allocation4 + $0x28] sm:$0xff] %vm653_vm0, %v4644_v0 }
 0x17d   : > { %v4919_v7 = vpop.f32.mrf.mxu1  ;;  %692 = vst.msk [vmem:[#allocation4 + $0x30] sm:$0xff] %vm653_vm0, %v4644_v0  ;;  %v569_v37 = vpop.f32.mrf.mxu3 }
 0x17e   : > { %1220 = vmax.xlane.f32.xlu0 %v1219_v6  ;;  %693 = vst.msk [vmem:[#allocation4 + $0x38] sm:$0xff] %vm653_vm0, %v4644_v0 }
 0x17f   : > { %694 = vst.msk [vmem:[#allocation4 + $0x40] sm:$0xff] %vm653_vm0, %v4644_v0 }
 0x180   : > { %1059 = vmatmul.bf16.gmra.mxu1 %v3914_v8  ;;  %1148 = vmatmul.bf16.gmra.mxu2 %v3914_v8  ;;  %695 = vst.msk [vmem:[#allocation4 + $0x48] sm:$0xff] %vm653_vm0, %v4644_v0 }
 0x181   : > { %696 = vst.msk [vmem:[#allocation4 + $0x50] sm:$0xff] %vm653_vm0, %v4644_v0 }
 0x182   : > { %697 = vst.msk [vmem:[#allocation4 + $0x58] sm:$0xff] %vm653_vm0, %v4644_v0 }
 0x183   : > { %v4921_v9 = vpop.f32.mrf.mxu2  ;;  %698 = vst.msk [vmem:[#allocation4 + $0x60] sm:$0xff] %vm653_vm0, %v4644_v0 }
 0x184   : > { %v1222_v10 = vmax.f32 %v4919_v7, %v4921_v9  ;;  %699 = vst.msk [vmem:[#allocation4 + $0x68] sm:$0xff] %vm653_vm0, %v4644_v0 }
 0x185   : > { %v4925_v11 = vpop.f32.mrf.mxu1  ;;  %700 = vst.msk [vmem:[#allocation4 + $0x70] sm:$0xff] %vm653_vm0, %v4644_v0  ;;  %v571_v52 = vpop.f32.mrf.mxu3 }
 0x186   : > { %1223 = vmax.xlane.f32.xlu1 %v1222_v10  ;;  %701 = vst.msk [vmem:[#allocation4 + $0x78] sm:$0xff] %vm653_vm0, %v4644_v0 }
 0x187   : > { %702 = vst.msk [vmem:[#allocation4 + $0x80] sm:$0xff] %vm653_vm0, %v4644_v0 }
 0x188   : > { %703 = vst.msk [vmem:[#allocation4 + $0x88] sm:$0xff] %vm653_vm0, %v4644_v0 }
 0x189   : > { %704 = vst.msk [vmem:[#allocation4 + $0x90] sm:$0xff] %vm653_vm0, %v4644_v0 }
 0x18a   : > { %705 = vst.msk [vmem:[#allocation4 + $0x98] sm:$0xff] %vm653_vm0, %v4644_v0 }
 0x18b   : > { %v4927_v12 = vpop.f32.mrf.mxu2  ;;  %706 = vst.msk [vmem:[#allocation4 + $0xa0] sm:$0xff] %vm653_vm0, %v4644_v0 }
 0x18c   : > { %v1225_v13 = vmax.f32 %v4925_v11, %v4927_v12  ;;  %707 = vst.msk [vmem:[#allocation4 + $0xa8] sm:$0xff] %vm653_vm0, %v4644_v0 }
 0x18d   : > { %v4931_v14 = vpop.f32.mrf.mxu1  ;;  %708 = vst.msk [vmem:[#allocation4 + $0xb0] sm:$0xff] %vm653_vm0, %v4644_v0 }
 0x18e   : > { %1226 = vmax.xlane.f32.xlu1 %v1225_v13  ;;  %709 = vst.msk [vmem:[#allocation4 + $0xb8] sm:$0xff] %vm653_vm0, %v4644_v0 }
 0x18f   : > { %710 = vst.msk [vmem:[#allocation4 + $0xc0] sm:$0xff] %vm653_vm0, %v4644_v0 }
 0x190   : > { %1064 = vmatmul.bf16.gmra.mxu1 %v3915_v15  ;;  %1153 = vmatmul.bf16.gmra.mxu2 %v3915_v15  ;;  %v5096_v15 = vld [vmem:[#allocation3 + $0x8] sm:$0xff]  ;;  %711 = vst.msk [vmem:[#allocation4 + $0xc8] sm:$0xff] %vm653_vm0, %v4644_v0 }
 0x191   : > { %712 = vst.msk [vmem:[#allocation4 + $0xd0] sm:$0xff] %vm653_vm0, %v4644_v0 }
 0x192   : > { %713 = vst.msk [vmem:[#allocation4 + $0xd8] sm:$0xff] %vm653_vm0, %v4644_v0 }
 0x193   : > { %v4933_v16 = vpop.f32.mrf.mxu2  ;;  %714 = vst.msk [vmem:[#allocation4 + $0xe0] sm:$0xff] %vm653_vm0, %v4644_v0 }
 0x194   : > { %v1228_v17 = vmax.f32 %v4931_v14, %v4933_v16  ;;  %715 = vst.msk [vmem:[#allocation4 + $0xe8] sm:$0xff] %vm653_vm0, %v4644_v0 }
 0x195   : > { %v4937_v18 = vpop.f32.mrf.mxu1  ;;  %716 = vst.msk [vmem:[#allocation4 + $0xf0] sm:$0xff] %vm653_vm0, %v4644_v0 }
 0x196   : > { %1229 = vmax.xlane.f32.xlu2 %v1228_v17  ;;  %717 = vst.msk [vmem:[#allocation4 + $0xf8] sm:$0xff] %vm653_vm0, %v4644_v0 }
 0x19b   : > { %v4939_v19 = vpop.f32.mrf.mxu2 }
 0x19c   : > { %v1231_v20 = vmax.f32 %v4937_v18, %v4939_v19 }
 0x19d   : > { %v4943_v21 = vpop.f32.mrf.mxu1 }
 0x19e   : > { %1232 = vmax.xlane.f32.xlu2 %v1231_v20 }
 0x1a0   : > { %1158 = vmatmul.bf16.gmra.mxu2 %v3916_v55  ;;  %1069 = vmatmul.bf16.gmra.mxu1 %v3916_v55  ;;  %v1188_v55 = vld [vmem:[#allocation3 + $0x20] sm:$0xff] }
 0x1a3   : > { %v4945_v22 = vpop.f32.mrf.mxu2 }
 0x1a4   : > { %v1234_v23 = vmax.f32 %v4943_v21, %v4945_v22 }
 0x1a5   : > { %v4949_v24 = vpop.f32.mrf.mxu1 }
 0x1a6   : > { %1235 = vmax.xlane.f32.xlu0 %v1234_v23 }
 0x1ab   : > { %v4951_v25 = vpop.f32.mrf.mxu2 }
 0x1ac   : > { %v1237_v26 = vmax.f32 %v4949_v24, %v4951_v25 }
 0x1ad   : > { %v4955_v27 = vpop.f32.mrf.mxu1 }
 0x1ae   : > { %1238 = vmax.xlane.f32.xlu1 %v1237_v26 }
 0x1b3   : > { %v4957_v28 = vpop.f32.mrf.mxu2 }
 0x1b4   : > { %v1240_v29 = vmax.f32 %v4955_v27, %v4957_v28 }
 0x1b5   : > { %v4963_v32 = vpop.f32.mrf.mxu1 }
 0x1b6   : > { %1241 = vmax.xlane.f32.xlu2 %v1240_v29 }
 0x1bb   : > { %v4965_v34 = vpop.f32.mrf.mxu2 }
 0x1bc   : > { %v1243_v35 = vmax.f32 %v4963_v32, %v4965_v34 }
 0x1bd   : > { %v4969_v36 = vpop.f32.mrf.mxu1 }
 0x1be   : > { %1244 = vmax.xlane.f32.xlu0 %v1243_v35 }
 0x1c3   : > { %v4973_v39 = vpop.f32.mrf.mxu2 }
 0x1c4   : > { %v1246_v40 = vmax.f32 %v4969_v36, %v4973_v39 }
 0x1c5   : > { %v4981_v41 = vpop.f32.mrf.mxu1 }
 0x1c6   : > { %1247 = vmax.xlane.f32.xlu1 %v1246_v40 }
 0x1cb   : > { %v4997_v46 = vpop.f32.mrf.mxu2 }
 0x1cc   : > { %v1249_v47 = vmax.f32 %v4981_v41, %v4997_v46 }
 0x1cd   : > { %v5003_v48 = vpop.f32.mrf.mxu1 }
 0x1ce   : > { %6591 = vst [vmem:[#allocation24_spill] sm:$0xff] %v5003_v48  ;;  %1250 = vmax.xlane.f32.xlu2 %v1249_v47  ;;  %v570_v47 = vadd.f32 %v4879_v58, %v569_v37 }
 0x1d3   : > { %v5019_v51 = vpop.f32.mrf.mxu2 }
 0x1d4   : > { %6592 = vst [vmem:[#allocation25_spill] sm:$0xff] %v5019_v51  ;;  %v1252_v53 = vmax.f32 %v5003_v48, %v5019_v51 }
 0x1d5   : > { %v5027_v54 = vpop.f32.mrf.mxu1 }
 0x1d6   : > { %1253 = vmax.xlane.f32.xlu0 %v1252_v53  ;;  %v572_v53 = vadd.f32 %v4879_v58, %v571_v52 }
 0x1db   : > { %v5041_v56 = vpop.f32.mrf.mxu2 }
 0x1dc   : > { %6593 = vst [vmem:[#allocation26_spill] sm:$0xff] %v5041_v56  ;;  %v1255_v57 = vmax.f32 %v5027_v54, %v5041_v56 }
 0x1dd   : > { %v5053_v60 = vpop.f32.mrf.mxu1 }
 0x1de   : > { %1256 = vmax.xlane.f32.xlu1 %v1255_v57  ;;  %6594 = vst [vmem:[#allocation27_spill] sm:$0xff] %v5053_v60  ;;  %v4017_v57 = vpack.c.bf16 %v572_v53, %v570_v47 }
 0x1e0   : > { %4045 = vst [vmem:[#allocation2 + $0x60] sm:$0xff] %v4017_v57  }
 0x1e3   : > { %v5063_v62 = vpop.f32.mrf.mxu2 }
 0x1e4   : > { %6595 = vst [vmem:[#allocation28_spill] sm:$0xff] %v5063_v62  ;;  %v1258_v2 = vmax.f32 %v5053_v60, %v5063_v62 }
 0x1e5   : > { %v5079_v4 = vpop.f32.mrf.mxu1 }
 0x1e6   : > { %1259 = vmax.xlane.f32.xlu2 %v1258_v2  ;;  %6596 = vst [vmem:[#allocation29_spill] sm:$0xff] %v5079_v4 }
 0x1e9   : > { %v1218_v6 = vpop.xlane.xlu0 %1217 }
 0x1ea   : > { %v1312_v8 = vmax.f32 %v1184_v3, %v1218_v6  ;;  %v5179_v6 = vld [vmem:[#allocation3 + $0x28] sm:$0xff] }
 0x1eb   : > { %v5085_v10 = vpop.f32.mrf.mxu2 }
 0x1ec   : > { %6597 = vst [vmem:[#allocation30_spill] sm:$0xff] %v5085_v10  ;;  %v1261_v13 = vmax.f32 %v5079_v4, %v5085_v10  ;;  %v1344_v40 = vsub.f32 %v1184_v3, %v1312_v8 }
 0x1ed   : > { %2643 = vst.msk [vmem:[#allocation3] sm:$0xff] %vm653_vm0, %v1312_v8  ;;  %v5109_v23 = vpop.f32.mrf.mxu1 }
 0x1ee   : > { %1262 = vmax.xlane.f32.xlu0 %v1261_v13  ;;  %6598 = vst [vmem:[#allocation31_spill] sm:$0xff] %v5109_v23  ;;  %v1376_v50 = vmul.f32 1.442695, %v1344_v40 }
 0x1f0   : > { %4169 = vpow2.f32 %v1376_v50  ;;  %v5209_v50 = vld [vmem:[#allocation3 + $0x40] sm:$0xff] }
 0x1f1   : > { %v1221_v17 = vpop.xlane.xlu0 %1220 }
 0x1f2   : > { %v5105_v20 = vmax.f32 %v5096_v15, %v1221_v17  ;;  %v5187_v17 = vld [vmem:[#allocation3 + $0x30] sm:$0xff] }
 0x1f3   : > { %v5111_v26 = vpop.f32.mrf.mxu2 }
 0x1f4   : > { %6599 = vst [vmem:[#allocation32_spill] sm:$0xff] %v5111_v26  ;;  %v1345_v29 = vsub.f32 %v5096_v15, %v5105_v20  ;;  %v1264_v30 = vmax.f32 %v5109_v23, %v5111_v26 }
 0x1f5   : > { %2644 = vst.msk [vmem:[#allocation3 + $0x8] sm:$0xff] %vm653_vm0, %v5105_v20  ;;  %v5196_v40 = vpop.f32.mrf.mxu1 }
 0x1f6   : > { %1265 = vmax.xlane.f32.xlu1 %v1264_v30  ;;  %v5176_v3 = vpop.eup %4169  ;;  %6602 = vst [vmem:[#allocation35_spill] sm:$0xff] %v5196_v40 }
 0x1f7   : > { %6600 = vst [vmem:[#allocation33_spill] sm:$0xff] %v5176_v3 }
 0x1f9   : > { %v1224_v33 = vpop.xlane.xlu1 %1223 }
 0x1fa   : > { %v5134_v35 = vmax.f32 %v5125_v31, %v1224_v33 }
 0x1fb   : > { %v5194_v37 = vpop.f32.mrf.mxu2 }
 0x1fc   : > { %2645 = vst.msk [vmem:[#allocation3 + $0x10] sm:$0xff] %vm653_vm0, %v5134_v35  ;;  %v1267_v47 = vmax.f32 %v5196_v40, %v5194_v37  ;;  %v3944_v40 = vld [vmem:[%s4832_s30 + $0x38] sm:$0xff] }
 0x1fd   : > { %6601 = vst [vmem:[#allocation34_spill] sm:$0xff] %v5194_v37  ;;  %v5211_v52 = vpop.f32.mrf.mxu1  ;;  %2401 = vmatpush.bf16.msrb.mxu3 %v3944_v40 }
 0x1fe   : > { %1442 = vperm.xlu2 %4165, %v1312_v8   ;;  %v3917_v8 = vld [vmem:[#allocation2 + $0x60] sm:$0xff]  ;;  %6604 = vst [vmem:[#allocation37_spill] sm:$0xff] %v5211_v52 }
 0x1ff   : > { %1163 = vmatmul.bf16.gmra.mxu2 %v3917_v8  ;;  %1074 = vmatmul.bf16.gmra.mxu1 %v3917_v8  ;;  %v5220_v8 = vld [vmem:[#allocation3 + $0x48] sm:$0xff] }
 0x201   : > { %v1227_v42 = vpop.xlane.xlu1 %1226 }
 0x202   : > { %v5155_v43 = vmax.f32 %v5146_v38, %v1227_v42  ;;  %1447 = vperm.xlu0 %4166, %v5105_v20   ;;  %v5198_v42 = vld [vmem:[#allocation3 + $0x38] sm:$0xff] }
 0x203   : > { %v5207_v49 = vpop.f32.mrf.mxu2 }
 0x204   : > { %2646 = vst.msk [vmem:[#allocation3 + $0x18] sm:$0xff] %vm653_vm0, %v5155_v43 }
 0x205   : > { %6603 = vst [vmem:[#allocation36_spill] sm:$0xff] %v5207_v49 }
 0x209   : > { %v1230_v59 = vpop.xlane.xlu2 %1229 }
 0x20a   : > { %v5172_v2 = vmax.f32 %v1188_v55, %v1230_v59  ;;  %v1270_v59 = vmax.f32 %v5211_v52, %v5207_v49  ;;  %v5232_v49 = vld [vmem:[#allocation3 + $0x50] sm:$0xff] }
 0x20c   : > { %2647 = vst.msk [vmem:[#allocation3 + $0x20] sm:$0xff] %vm653_vm0, %v5172_v2 }
 0x20f   : > { %2051 = vperm.xlu1 %4167, %v5176_v3  }
 0x211   : > { %v1233_v13 = vpop.xlane.xlu2 %1232 }
 0x212   : > { %v5182_v0 = vmax.f32 %v5179_v6, %v1233_v13  ;;  %v1346_v13 = vsub.f32 %v5125_v31, %v5134_v35 }
 0x214   : > { %2648 = vst.msk [vmem:[#allocation3 + $0x28] sm:$0xff] %vm653_vm0, %v5182_v0 }
 0x217   : > { %1452 = vperm.xlu1 %4167, %v5134_v35   ;;  %v574_v35 = vpop.f32.mrf.mxu3 }
 0x219   : > { %v1236_v30 = vpop.xlane.xlu0 %1235 }
 0x21a   : > { %v5190_v33 = vmax.f32 %v5187_v17, %v1236_v30 }
 0x21c   : > { %2649 = vst.msk [vmem:[#allocation3 + $0x30] sm:$0xff] %vm653_vm0, %v5190_v33 }
 0x21f   : > { %v576_v37 = vpop.f32.mrf.mxu3 }
 0x220   : > { %v577_v10 = vadd.f32 %v4879_v58, %v576_v37 }
 0x221   : > { %v1239_v44 = vpop.xlane.xlu1 %1238 }
 0x222   : > { %v5201_v45 = vmax.f32 %v5198_v42, %v1239_v44 }
 0x224   : > { %2650 = vst.msk [vmem:[#allocation3 + $0x38] sm:$0xff] %vm653_vm0, %v5201_v45 }
 0x227   : > { %1268 = vmax.xlane.f32.xlu2 %v1267_v47  ;;  %v1378_v47 = vmul.f32 1.442695, %v1345_v29  ;;  %v5244_v29 = vpop.f32.mrf.mxu1 }
 0x228   : > { %6607 = vst [vmem:[#allocation40_spill] sm:$0xff] %v5244_v29 }
 0x229   : > { %v1242_v53 = vpop.xlane.xlu2 %1241  ;;  %4171 = vpow2.f32 %v1378_v47 }
 0x22a   : > { %v5214_v57 = vmax.f32 %v5209_v50, %v1242_v53  ;;  %v1380_v53 = vmul.f32 1.442695, %v1346_v13 }
 0x22c   : > { %2651 = vst.msk [vmem:[#allocation3 + $0x40] sm:$0xff] %vm653_vm0, %v5214_v57  ;;  %1271 = vmax.xlane.f32.xlu0 %v1270_v59  ;;  %4173 = vpow2.f32 %v1380_v53  ;;  %v1348_v59 = vsub.f32 %v1188_v55, %v5172_v2  ;;  %v5249_v55 = vld [vmem:[#allocation3 + $0x58] sm:$0xff]  ;;  %v575_v53 = vadd.f32 %v4879_v58, %v574_v35 }
 0x22e   : > { %v1384_v15 = vmul.f32 1.442695, %v1348_v59 }
 0x22f   : > { %v5242_v20 = vpop.eup %4171 }
 0x230   : > { %6606 = vst [vmem:[#allocation39_spill] sm:$0xff] %v5242_v20  ;;  %4175 = vpow2.f32 %v1384_v15  ;;  %v4022_v15 = vpack.c.bf16 %v577_v10, %v575_v53  ;;  %v3942_v10 = vld [vmem:[%s4832_s30 + $0x28] sm:$0xff]  ;;  %v1347_v53 = vsub.f32 %v5146_v38, %v5155_v43 }
 0x231   : > { %v1245_v30 = vpop.xlane.xlu0 %1244 }
 0x232   : > { %v5225_v44 = vmax.f32 %v5220_v8, %v1245_v30  ;;  %v5238_v30 = vpop.f32.mrf.mxu2  ;;  %v5246_v13 = vpop.eup %4173  ;;  %4046 = vst [vmem:[#allocation2 + $0x70] sm:$0xff] %v4022_v15   ;;  %v3941_v15 = vld [vmem:[%s4832_s30 + $0x20] sm:$0xff] }
 0x233   : > { %6605 = vst [vmem:[#allocation38_spill] sm:$0xff] %v5238_v30 }
 0x234   : > { %2652 = vst.msk [vmem:[#allocation3 + $0x48] sm:$0xff] %vm653_vm0, %v5225_v44 }
 0x235   : > { %6608 = vst [vmem:[#allocation41_spill] sm:$0xff] %v5246_v13 }
 0x236   : > { %v5265_v35 = vpop.eup %4175 }
 0x237   : > { %6609 = vst [vmem:[#allocation42_spill] sm:$0xff] %v5265_v35 }
 0x239   : > { %v1248_v52 = vpop.xlane.xlu1 %1247 }
 0x23a   : > { %v5236_v31 = vmax.f32 %v5232_v49, %v1248_v52  ;;  %v1273_v52 = vmax.f32 %v5244_v29, %v5238_v30  ;;  %v3943_v30 = vld [vmem:[%s4832_s30 + $0x30] sm:$0xff]  ;;  %v3949_v29 = vld [vmem:[%s4832_s30 + $0x60] sm:$0xff] }
 0x23b   : > { %2402 = vmatpush.bf16.msrb.mxu3 %v3943_v30  ;;  %v1382_v30 = vmul.f32 1.442695, %v1347_v53 }
 0x23c   : > { %2653 = vst.msk [vmem:[#allocation3 + $0x50] sm:$0xff] %vm653_vm0, %v5236_v31 }
 0x23d   : > { %4177 = vpow2.f32 %v1382_v30  ;;  %v3938_v30 = vld [vmem:[%s4832_s30 + $0x8] sm:$0xff] }
 0x23f   : > { %2056 = vperm.xlu2 %4165, %v5242_v20   ;;  %v3952_v20 = vld [vmem:[%s4832_s30 + $0x78] sm:$0xff]  ;;  %2403 = vmatpush.bf16.msrb.mxu3 %v3942_v10 }
 0x240   : > { %2061 = vperm.xlu0 %4166, %v5246_v13   ;;  %2490 = vmatpush.bf16.msrb.mxu0 %v3952_v20  ;;  %v3950_v20 = vld [vmem:[%s4832_s30 + $0x68] sm:$0xff]  ;;  %v3948_v10 = vld [vmem:[%s4832_s30 + $0x58] sm:$0xff] }
 0x241   : > { %v1251_v47 = vpop.xlane.xlu2 %1250  ;;  %1274 = vmax.xlane.f32.xlu1 %v1273_v52  ;;  %v3951_v52 = vld [vmem:[%s4832_s30 + $0x70] sm:$0xff] }
 0x242   : > { %v5256_v59 = vmax.f32 %v5249_v55, %v1251_v47  ;;  %v5268_v47 = vld [vmem:[#allocation3 + $0x60] sm:$0xff] }
 0x243   : > { %2404 = vmatpush.bf16.msrb.mxu3 %v3941_v15  ;;  %v579_v15 = vpop.f32.mrf.mxu3 }
 0x244   : > { %2654 = vst.msk [vmem:[#allocation3 + $0x58] sm:$0xff] %vm653_vm0, %v5256_v59  ;;  %2491 = vmatpush.bf16.msrb.mxu0 %v3951_v52  ;;  %v5283_v52 = vld [vmem:[#allocation3 + $0x68] sm:$0xff] }
 0x247   : > { %1457 = vperm.xlu2 %4165, %v5155_v43   ;;  %v3940_v43 = vld [vmem:[%s4832_s30 + $0x18] sm:$0xff] }
 0x248   : > { %2071 = vperm.xlu0 %4166, %v5265_v35   ;;  %2492 = vmatpush.bf16.msrb.mxu0 %v3950_v20  ;;  %v3947_v20 = vld [vmem:[%s4832_s30 + $0x50] sm:$0xff]  ;;  %v3945_v35 = vld [vmem:[%s4832_s30 + $0x40] sm:$0xff] }
 0x249   : > { %v1254_v37 = vpop.xlane.xlu0 %1253  ;;  %2405 = vmatpush.bf16.msrb.mxu3 %v3940_v43  ;;  %v3946_v43 = vld [vmem:[%s4832_s30 + $0x48] sm:$0xff] }
 0x24a   : > { %v5272_v40 = vmax.f32 %v5268_v47, %v1254_v37  ;;  %v3918_v37 = vld [vmem:[#allocation2 + $0x70] sm:$0xff] }
 0x24b   : > { %1168 = vmatmul.bf16.gmra.mxu2 %v3918_v37  ;;  %1079 = vmatmul.bf16.gmra.mxu1 %v3918_v37 }
 0x24c   : > { %2655 = vst.msk [vmem:[#allocation3 + $0x60] sm:$0xff] %vm653_vm0, %v5272_v40  ;;  %2493 = vmatpush.bf16.msrb.mxu0 %v3949_v29  ;;  %v5294_v29 = vld [vmem:[#allocation3 + $0x70] sm:$0xff] }
 0x24f   : > { %1462 = vperm.xlu2 %4165, %v5172_v2   ;;  %v3939_v2 = vld [vmem:[%s4832_s30 + $0x10] sm:$0xff] }
 0x250   : > { %2494 = vmatpush.bf16.msrb.mxu0 %v3948_v10  ;;  %2406 = vmatpush.bf16.msrb.mxu3 %v3939_v2  ;;  %v3937_v10 = vld [vmem:[%s4832_s30] sm:$0xff]  ;;  %v5308_v2 = vld [vmem:[#allocation3 + $0x78] sm:$0xff] }
 0x251   : > { %v1257_v13 = vpop.xlane.xlu1 %1256  ;;  %6611 = vst [vmem:[#allocation44_spill] sm:$0xff] %v5308_v2 }
 0x252   : > { %v5286_v38 = vmax.f32 %v5283_v52, %v1257_v13  ;;  %v5296_v13 = vpop.eup %4177 }
 0x253   : > { %6610 = vst [vmem:[#allocation43_spill] sm:$0xff] %v5296_v13 }
 0x254   : > { %2656 = vst.msk [vmem:[#allocation3 + $0x68] sm:$0xff] %vm653_vm0, %v5286_v38  ;;  %2495 = vmatpush.bf16.msrb.mxu0 %v3947_v20  ;;  %2407 = vmatpush.bf16.msrb.mxu3 %v3938_v30  ;;  %v580_v20 = vadd.f32 %v4879_v58, %v579_v15  ;;  %v581_v30 = vpop.f32.mrf.mxu3 }
 0x255   : > { %v582_v3 = vadd.f32 %v4879_v58, %v581_v30 }
 0x258   : > { %2496 = vmatpush.bf16.msrb.mxu0 %v3946_v43  ;;  %2408 = vmatpush.bf16.msrb.mxu3 %v3937_v10  ;;  %v5317_v43 = vpop.f32.mrf.mxu2 }
 0x259   : > { %v1260_v53 = vpop.xlane.xlu2 %1259 }
 0x25a   : > { %v5299_v37 = vmax.f32 %v5294_v29, %v1260_v53  ;;  %2066 = vperm.xlu1 %4167, %v5296_v13  }
 0x25c   : > { %2657 = vst.msk [vmem:[#allocation3 + $0x70] sm:$0xff] %vm653_vm0, %v5299_v37  ;;  %2497 = vmatpush.bf16.msrb.mxu0 %v3945_v35  ;;  %v5322_v35 = vpop.f32.mrf.mxu1 }
 0x25d   : > { %v1276_v23 = vmax.f32 %v5322_v35, %v5317_v43 }
 0x261   : > { %v1443_v4 = vpop.permute.xlu2 %1442  ;;  %v1263_v62 = vpop.xlane.xlu0 %1262 }
 0x262   : > { %v1600_v53 = vsub.f32 %v4905_v61, %v1443_v4  ;;  %v1601_v13 = vsub.f32 %v4907_v63, %v1443_v4  ;;  %v5314_v60 = vmax.f32 %v5308_v2, %v1263_v62  ;;  %1467 = vperm.xlu1 %4167, %v5182_v0   ;;  %v4027_v61 = vpack.c.bf16 %v582_v3, %v580_v20  ;;  %v5324_v63 = vld [vmem:[#allocation3 + $0x80] sm:$0xff] }
 0x264   : > { %v1664_v10 = vmul.f32 1.442695, %v1600_v53  ;;  %v1666_v26 = vmul.f32 1.442695, %v1601_v13  ;;  %2658 = vst.msk [vmem:[#allocation3 + $0x78] sm:$0xff] %vm653_vm0, %v5314_v60  ;;  %v5332_v53 = vpop.f32.mrf.mxu2 }
 0x265   : > { %4047 = vst [vmem:[#allocation2 + $0x78] sm:$0xff] %v4027_v61  }
 0x266   : > { %4179 = vpow2.f32 %v1664_v10  ;;  %6612 = vst [vmem:[#allocation45_spill] sm:$0xff] %v5332_v53 }
 0x267   : > { %4181 = vpow2.f32 %v1666_v26  ;;  %v5336_v26 = vpop.f32.mrf.mxu1 }
 0x268   : > { %6613 = vst [vmem:[#allocation46_spill] sm:$0xff] %v5336_v26  ;;  %v1279_v20 = vmax.f32 %v5336_v26, %v5332_v53  ;;  %v1351_v53 = vsub.f32 %v5198_v42, %v5201_v45 }
 0x269   : > { %v1266_v62 = vpop.xlane.xlu1 %1265 }
 0x26a   : > { %v5327_v4 = vmax.f32 %v5324_v63, %v1266_v62  ;;  %1477 = vperm.xlu1 %4167, %v5201_v45  }
 0x26c   : > { %v4180_v15 = vpop.eup %4179  ;;  %2659 = vst.msk [vmem:[#allocation3 + $0x80] sm:$0xff] %vm653_vm0, %v5327_v4  ;;  %v3919_v30 = vld [vmem:[#allocation2 + $0x78] sm:$0xff] }
 0x26d   : > { %v4182_v13 = vpop.eup %4181  ;;  %1173 = vmatmul.bf16.gmra.mxu2 %v3919_v30  ;;  %1084 = vmatmul.bf16.gmra.mxu1 %v3919_v30 }
 0x26e   : > { %v5334_v3 = vadd.f32 %v4182_v13, %v4180_v15 }
 0x272   : > { %1280 = vmax.xlane.f32.xlu0 %v1279_v20 }
 0x274   : > { %v1448_v10 = vpop.permute.xlu0 %1447 }
 0x275   : > { %v1602_v61 = vsub.f32 %v4911_v1, %v1448_v10  ;;  %v1603_v62 = vsub.f32 %v4915_v5, %v1448_v10  ;;  %v1390_v5 = vmul.f32 1.442695, %v1351_v53 }
 0x277   : > { %v1668_v51 = vmul.f32 1.442695, %v1602_v61  ;;  %v1670_v48 = vmul.f32 1.442695, %v1603_v62 }
 0x278   : > { %1277 = vmax.xlane.f32.xlu2 %v1276_v23  ;;  %v584_v23 = vpop.f32.mrf.mxu3 }
 0x279   : > { %4183 = vpow2.f32 %v1668_v51 }
 0x27a   : > { %4185 = vpow2.f32 %v1670_v48  ;;  %v1349_v48 = vsub.f32 %v5179_v6, %v5182_v0  ;;  %v5360_v6 = vpop.f32.mrf.mxu1 }
 0x27b   : > { %4187 = vpow2.f32 %v1390_v5  ;;  %6614 = vst [vmem:[#allocation47_spill] sm:$0xff] %v5360_v6 }
 0x27f   : > { %v4184_v2 = vpop.eup %4183 }
 0x280   : > { %v4186_v26 = vpop.eup %4185  ;;  %v2241_v30 = vpack.c.bf16 %v4184_v2, %v4180_v15  ;;  %v586_v53 = vpop.f32.mrf.mxu3 }
 0x281   : > { %v5346_v20 = vpop.permute.xlu1 %2051  ;;  %v2242_v56 = vpack.c.bf16 %v4186_v26, %v4182_v13  ;;  %v5348_v1 = vadd.f32 %v4186_v26, %v4184_v2  ;;  %v5355_v13 = vpop.eup %4187  ;;  %v1386_v2 = vmul.f32 1.442695, %v1349_v48 }
 0x282   : > { %2409 = vmatmul.bf16.vlgmr.msrb.gmra.mxu3 %v2241_v30 }
 0x283   : > { %2498 = vmatmul.bf16.vlgmr.msrb.gmra.mxu0 %v2242_v56  ;;  %v585_v56 = vadd.f32 %v4879_v58, %v584_v23  ;;  %v5372_v23 = vld [vmem:[#allocation3 + $0x88] sm:$0xff] }
 0x286   : > { %1482 = vperm.xlu0 %4166, %v5214_v57  }
 0x289   : > { %v1453_v51 = vpop.permute.xlu1 %1452 }
 0x28a   : > { %v1604_v42 = vsub.f32 %v4919_v7, %v1453_v51  ;;  %v1605_v45 = vsub.f32 %v4921_v9, %v1453_v51  ;;  %v5362_v7 = vpop.f32.mrf.mxu2  ;;  %v587_v9 = vadd.f32 %v4879_v58, %v586_v53  ;;  %v5390_v53 = vpop.f32.mrf.mxu1 }
 0x28b   : > { %6615 = vst [vmem:[#allocation48_spill] sm:$0xff] %v5362_v7  ;;  %v1282_v0 = vmax.f32 %v5360_v6, %v5362_v7 }
 0x28c   : > { %v1672_v15 = vmul.f32 1.442695, %v1604_v42  ;;  %v1674_v10 = vmul.f32 1.442695, %v1605_v45  ;;  %v4032_v26 = vpack.c.bf16 %v587_v9, %v585_v56  ;;  %v5379_v42 = vld [vmem:[#allocation3 + $0x90] sm:$0xff]  ;;  %v1350_v45 = vsub.f32 %v5187_v17, %v5190_v33 }
 0x28e   : > { %4189 = vpow2.f32 %v1672_v15  ;;  %2086 = vperm.xlu0 %4166, %v5355_v13   ;;  %4048 = vst [vmem:[#allocation2 + $0x28] sm:$0xff] %v4032_v26  }
 0x28f   : > { %4191 = vpow2.f32 %v1674_v10 }
 0x290   : > { %1472 = vperm.xlu2 %4165, %v5190_v33   ;;  %4193 = vpow2.f32 %v1386_v2  ;;  %v1388_v2 = vmul.f32 1.442695, %v1350_v45 }
 0x292   : > { %4195 = vpow2.f32 %v1388_v2  ;;  %v5392_v9 = vpop.f32.mrf.mxu2 }
 0x293   : > { %6617 = vst [vmem:[#allocation50_spill] sm:$0xff] %v5392_v9 }
 0x294   : > { %v4190_v61 = vpop.eup %4189  ;;  %1283 = vmax.xlane.f32.xlu1 %v1282_v0 }
 0x295   : > { %v4192_v62 = vpop.eup %4191  ;;  %v3920_v58 = vld [vmem:[#allocation2 + $0x28] sm:$0xff] }
 0x296   : > { %v5367_v30 = vadd.f32 %v4192_v62, %v4190_v61  ;;  %v5369_v5 = vpop.eup %4193  ;;  %1178 = vmatmul.bf16.gmra.mxu2 %v3920_v58  ;;  %1089 = vmatmul.bf16.gmra.mxu1 %v3920_v58 }
 0x298   : > { %2076 = vperm.xlu2 %4165, %v5369_v5   ;;  %v5396_v26 = vpop.eup %4195 }
 0x299   : > { %6618 = vst [vmem:[#allocation51_spill] sm:$0xff] %v5396_v26 }
 0x29a   : > { %v1269_v48 = vpop.xlane.xlu2 %1268  ;;  %v5399_v45 = vpop.f32.mrf.mxu2 }
 0x29b   : > { %v5375_v51 = vmax.f32 %v5372_v23, %v1269_v48  ;;  %6619 = vst [vmem:[#allocation52_spill] sm:$0xff] %v5399_v45 }
 0x29d   : > { %2660 = vst.msk [vmem:[#allocation3 + $0x88] sm:$0xff] %vm653_vm0, %v5375_v51 }
 0x29f   : > { %v1272_v15 = vpop.xlane.xlu0 %1271 }
 0x2a0   : > { %v5384_v10 = vmax.f32 %v5379_v42, %v1272_v15  ;;  %v5401_v15 = vpop.f32.mrf.mxu1 }
 0x2a1   : > { %6620 = vst [vmem:[#allocation53_spill] sm:$0xff] %v5401_v15 }
 0x2a2   : > { %2661 = vst.msk [vmem:[#allocation3 + $0x90] sm:$0xff] %vm653_vm0, %v5384_v10  ;;  %v5388_v56 = vpop.permute.xlu2 %2056 }
 0x2a3   : > { %6616 = vst [vmem:[#allocation49_spill] sm:$0xff] %v5388_v56  ;;  %v5403_v56 = vld [vmem:[#allocation3 + $0x98] sm:$0xff] }
 0x2aa   : > { %v1458_v0 = vpop.permute.xlu2 %1457 }
 0x2ab   : > { %v1606_v17 = vsub.f32 %v4925_v11, %v1458_v0  ;;  %v1607_v33 = vsub.f32 %v4927_v12, %v1458_v0  ;;  %v1288_v0 = vmax.f32 %v5401_v15, %v5399_v45 }
 0x2ad   : > { %v1676_v48 = vmul.f32 1.442695, %v1606_v17  ;;  %v1678_v58 = vmul.f32 1.442695, %v1607_v33  ;;  %2081 = vperm.xlu1 %4167, %v5396_v26  }
 0x2af   : > { %4197 = vpow2.f32 %v1676_v48 }
 0x2b0   : > { %4199 = vpow2.f32 %v1678_v58 }
 0x2b2   : > { %v1463_v2 = vpop.permute.xlu2 %1462 }
 0x2b3   : > { %v1608_v7 = vsub.f32 %v4931_v14, %v1463_v2  ;;  %v1609_v11 = vsub.f32 %v4933_v16, %v1463_v2 }
 0x2b4   : > { %v1275_v12 = vpop.xlane.xlu1 %1274 }
 0x2b5   : > { %v4198_v17 = vpop.eup %4197  ;;  %v1680_v33 = vmul.f32 1.442695, %v1608_v7  ;;  %v1682_v26 = vmul.f32 1.442695, %v1609_v11  ;;  %v5410_v48 = vmax.f32 %v5403_v56, %v1275_v12  ;;  %1492 = vperm.xlu1 %4167, %v5236_v31   ;;  %v1285_v11 = vmax.f32 %v5390_v53, %v5392_v9 }
 0x2b6   : > { %v4200_v58 = vpop.eup %4199  ;;  %v2243_v6 = vpack.c.bf16 %v4198_v17, %v4190_v61  ;;  %v1354_v61 = vsub.f32 %v5232_v49, %v5236_v31 }
 0x2b7   : > { %4201 = vpow2.f32 %v1680_v33  ;;  %2662 = vst.msk [vmem:[#allocation3 + $0x98] sm:$0xff] %vm653_vm0, %v5410_v48  ;;  %v2244_v14 = vpack.c.bf16 %v4200_v58, %v4192_v62  ;;  %v5415_v16 = vadd.f32 %v4200_v58, %v4198_v17 }
 0x2b8   : > { %4203 = vpow2.f32 %v1682_v26  ;;  %2414 = vmatmul.bf16.gmra.mxu3 %v2243_v6  ;;  %1289 = vmax.xlane.f32.xlu0 %v1288_v0  ;;  %v1396_v33 = vmul.f32 1.442695, %v1354_v61  ;;  %v1352_v6 = vsub.f32 %v5209_v50, %v5214_v57  ;;  %v5430_v26 = vpop.permute.xlu0 %2061  ;;  %v5438_v50 = vpop.f32.mrf.mxu2 }
 0x2b9   : > { %2503 = vmatmul.bf16.gmra.mxu0 %v2244_v14  ;;  %6624 = vst [vmem:[#allocation57_spill] sm:$0xff] %v5438_v50 }
 0x2ba   : > { %4205 = vpow2.f32 %v1396_v33  ;;  %v1392_v0 = vmul.f32 1.442695, %v1352_v6 }
 0x2bc   : > { %4207 = vpow2.f32 %v1392_v0 }
 0x2bd   : > { %v4202_v7 = vpop.eup %4201 }
 0x2be   : > { %v4204_v2 = vpop.eup %4203 }
 0x2bf   : > { %v5419_v12 = vadd.f32 %v4204_v2, %v4202_v7 }
 0x2c0   : > { %v5428_v62 = vpop.eup %4205  ;;  %v5440_v61 = vpop.permute.xlu0 %2071 }
 0x2c1   : > { %1286 = vmax.xlane.f32.xlu2 %v1285_v11  ;;  %6622 = vst [vmem:[#allocation55_spill] sm:$0xff] %v5428_v62  ;;  %v5436_v11 = vpop.f32.mrf.mxu1 }
 0x2c2   : > { %6623 = vst [vmem:[#allocation56_spill] sm:$0xff] %v5436_v11  ;;  %v5446_v6 = vpop.eup %4207 }
 0x2c3   : > { %6625 = vst [vmem:[#allocation58_spill] sm:$0xff] %v5446_v6 }
 0x2cc   : > { %v5423_v45 = vpop.permute.xlu1 %2066  ;;  %1497 = vperm.xlu0 %4166, %v5256_v59  }
 0x2cd   : > { %6621 = vst [vmem:[#allocation54_spill] sm:$0xff] %v5423_v45 }
 0x2d4   : > { %v1468_v17 = vpop.permute.xlu1 %1467  ;;  %2101 = vperm.xlu0 %4166, %v5428_v62  }
 0x2d5   : > { %v1610_v58 = vsub.f32 %v4937_v18, %v1468_v17  ;;  %v1611_v49 = vsub.f32 %v4939_v19, %v1468_v17  ;;  %v1291_v19 = vmax.f32 %v5436_v11, %v5438_v50 }
 0x2d7   : > { %v1684_v31 = vmul.f32 1.442695, %v1610_v58  ;;  %v1686_v14 = vmul.f32 1.442695, %v1611_v49 }
 0x2d9   : > { %4209 = vpow2.f32 %v1684_v31  ;;  %1487 = vperm.xlu2 %4165, %v5225_v44  }
 0x2da   : > { %4211 = vpow2.f32 %v1686_v14 }
 0x2dc   : > { %v1478_v57 = vpop.permute.xlu1 %1477 }
 0x2dd   : > { %v1614_v33 = vsub.f32 %v4949_v24, %v1478_v57  ;;  %v1615_v18 = vsub.f32 %v4951_v25, %v1478_v57  ;;  %v5451_v24 = vld [vmem:[#allocation3 + $0xa8] sm:$0xff] }
 0x2df   : > { %v4210_v0 = vpop.eup %4209  ;;  %v1692_v17 = vmul.f32 1.442695, %v1614_v33  ;;  %v1694_v58 = vmul.f32 1.442695, %v1615_v18  ;;  %1292 = vmax.xlane.f32.xlu1 %v1291_v19 }
 0x2e0   : > { %v4212_v49 = vpop.eup %4211  ;;  %v2245_v31 = vpack.c.bf16 %v4210_v0, %v4202_v7  ;;  %v1353_v7 = vsub.f32 %v5220_v8, %v5225_v44 }
 0x2e1   : > { %4213 = vpow2.f32 %v1692_v17  ;;  %2091 = vperm.xlu2 %4165, %v5446_v6   ;;  %v2246_v14 = vpack.c.bf16 %v4212_v49, %v4204_v2  ;;  %v5449_v45 = vadd.f32 %v4212_v49, %v4210_v0  ;;  %v5460_v2 = vld [vmem:[#allocation3 + $0xa0] sm:$0xff]  ;;  %v5467_v49 = vpop.f32.mrf.mxu2 }
 0x2e2   : > { %4215 = vpow2.f32 %v1694_v58  ;;  %2419 = vmatmul.bf16.gmra.mxu3 %v2245_v31  ;;  %v1394_v58 = vmul.f32 1.442695, %v1353_v7  ;;  %6626 = vst [vmem:[#allocation59_spill] sm:$0xff] %v5467_v49  ;;  %v5469_v31 = vpop.f32.mrf.mxu1 }
 0x2e3   : > { %2508 = vmatmul.bf16.gmra.mxu0 %v2246_v14  ;;  %6627 = vst [vmem:[#allocation60_spill] sm:$0xff] %v5469_v31 }
 0x2e4   : > { %4217 = vpow2.f32 %v1394_v58 }
 0x2e5   : > { %v1281_v25 = vpop.xlane.xlu0 %1280 }
 0x2e6   : > { %v5454_v57 = vmax.f32 %v5451_v24, %v1281_v25 }
 0x2e7   : > { %v4214_v33 = vpop.eup %4213 }
 0x2e8   : > { %v4216_v18 = vpop.eup %4215  ;;  %2664 = vst.msk [vmem:[#allocation3 + $0xa8] sm:$0xff] %vm653_vm0, %v5454_v57 }
 0x2e9   : > { %v5462_v19 = vadd.f32 %v4216_v18, %v4214_v33 }
 0x2ea   : > { %v5475_v11 = vpop.eup %4217  ;;  %v5479_v7 = vpop.f32.mrf.mxu1 }
 0x2eb   : > { %v1278_v0 = vpop.xlane.xlu2 %1277  ;;  %6628 = vst [vmem:[#allocation61_spill] sm:$0xff] %v5475_v11 }
 0x2ec   : > { %v5465_v17 = vmax.f32 %v5460_v2, %v1278_v0  ;;  %v5477_v0 = vpop.f32.mrf.mxu2  ;;  %6630 = vst [vmem:[#allocation63_spill] sm:$0xff] %v5479_v7 }
 0x2ed   : > { %6629 = vst [vmem:[#allocation62_spill] sm:$0xff] %v5477_v0  ;;  %v1297_v58 = vmax.f32 %v5479_v7, %v5477_v0 }
 0x2ee   : > { %2663 = vst.msk [vmem:[#allocation3 + $0xa0] sm:$0xff] %vm653_vm0, %v5465_v17 }
 0x2f3   : > { %v1473_v14 = vpop.permute.xlu2 %1472 }
 0x2f4   : > { %v1612_v8 = vsub.f32 %v4943_v21, %v1473_v14  ;;  %v1613_v44 = vsub.f32 %v4945_v22, %v1473_v14 }
 0x2f6   : > { %v1688_v25 = vmul.f32 1.442695, %v1612_v8  ;;  %v1690_v50 = vmul.f32 1.442695, %v1613_v44 }
 0x2f8   : > { %4219 = vpow2.f32 %v1688_v25  ;;  %2096 = vperm.xlu1 %4167, %v5475_v11   ;;  %v5487_v25 = vld [vmem:[#allocation3 + $0xb0] sm:$0xff] }
 0x2f9   : > { %4221 = vpow2.f32 %v1690_v50  ;;  %v2209_v50 = vmul.f32 0.0, %v5346_v20 }
 0x2fe   : > { %v4220_v6 = vpop.eup %4219  ;;  %1298 = vmax.xlane.f32.xlu0 %v1297_v58 }
 0x2ff   : > { %v4222_v21 = vpop.eup %4221  ;;  %v2247_v15 = vpack.c.bf16 %v4214_v33, %v4220_v6  ;;  %v1294_v33 = vmax.f32 %v5469_v31, %v5467_v49 }
 0x300   : > { %1507 = vperm.xlu1 %4167, %v5286_v38   ;;  %v2248_v22 = vpack.c.bf16 %v4216_v18, %v4222_v21  ;;  %v5485_v14 = vadd.f32 %v4222_v21, %v4220_v6  ;;  %v2499_v8 = vpop.f32.mrf.mxu0 }
 0x301   : > { %2424 = vmatmul.bf16.gmra.mxu3 %v2247_v15  ;;  %v1357_v15 = vsub.f32 %v5283_v52, %v5286_v38  ;;  %v5512_v52 = vpop.f32.mrf.mxu1  ;;  %v5514_v38 = vpop.f32.mrf.mxu2 }
 0x302   : > { %2513 = vmatmul.bf16.gmra.mxu0 %v2248_v22  ;;  %6634 = vst [vmem:[#allocation67_spill] sm:$0xff] %v5512_v52 }
 0x303   : > { %v1402_v6 = vmul.f32 1.442695, %v1357_v15  ;;  %6635 = vst [vmem:[#allocation68_spill] sm:$0xff] %v5514_v38 }
 0x305   : > { %v2410_v44 = vpop.f32.mrf.mxu3  ;;  %4223 = vpow2.f32 %v1402_v6 }
 0x306   : > { %v2500_v11 = vadd.f32 %v2499_v8, %v2410_v44 }
 0x307   : > { %v1284_v62 = vpop.xlane.xlu1 %1283 }
 0x308   : > { %v5491_v0 = vmax.f32 %v5487_v25, %v1284_v62  ;;  %v5495_v58 = vadd.f32 %v2500_v11, %v2209_v50  ;;  %v1483_v62 = vpop.permute.xlu0 %1482  ;;  %v1355_v11 = vsub.f32 %v5249_v55, %v5256_v59  ;;  %v1300_v55 = vmax.f32 %v5512_v52, %v5514_v38 }
 0x309   : > { %v1616_v38 = vsub.f32 %v4955_v27, %v1483_v62 }
 0x30a   : > { %6631 = vst [vmem:[#allocation64_spill] sm:$0xff] %v5495_v58  ;;  %1295 = vmax.xlane.f32.xlu2 %v1294_v33  ;;  %v1398_v18 = vmul.f32 1.442695, %v1355_v11  ;;  %v5522_v33 = vld [vmem:[#allocation3 + $0xc0] sm:$0xff] }
 0x30b   : > { %2665 = vst.msk [vmem:[#allocation3 + $0xb0] sm:$0xff] %vm653_vm0, %v5491_v0  ;;  %v5502_v20 = vpop.eup %4223 }
 0x30c   : > { %6632 = vst [vmem:[#allocation65_spill] sm:$0xff] %v5502_v20  ;;  %4225 = vpow2.f32 %v1398_v18  ;;  %v5525_v18 = vpop.permute.xlu2 %2076 }
 0x30d   : > { %6637 = vst [vmem:[#allocation70_spill] sm:$0xff] %v5525_v18  ;;  %v5550_v18 = vpop.f32.mrf.mxu2 }
 0x30e   : > { %6641 = vst [vmem:[#allocation74_spill] sm:$0xff] %v5550_v18 }
 0x310   : > { %v5510_v22 = vpop.permute.xlu0 %2086 }
 0x311   : > { %6633 = vst [vmem:[#allocation66_spill] sm:$0xff] %v5510_v22 }
 0x312   : > { %1512 = vperm.xlu0 %4166, %v5299_v37   ;;  %v5520_v59 = vpop.eup %4225 }
 0x313   : > { %6636 = vst [vmem:[#allocation69_spill] sm:$0xff] %v5520_v59 }
 0x319   : > { %v5564_v9 = vpop.f32.mrf.mxu2 }
 0x31a   : > { %2116 = vperm.xlu0 %4166, %v5502_v20   ;;  %6643 = vst [vmem:[#allocation76_spill] sm:$0xff] %v5564_v9 }
 0x31f   : > { %v5507_v21 = vpop.permute.xlu1 %2081 }
 0x322   : > { %1502 = vperm.xlu2 %4165, %v5272_v40  }
 0x327   : > { %v1493_v8 = vpop.permute.xlu1 %1492 }
 0x328   : > { %v1620_v44 = vsub.f32 %v4969_v36, %v1493_v8  ;;  %v1621_v50 = vsub.f32 %v4973_v39, %v1493_v8  ;;  %v5534_v8 = vld [vmem:[#allocation3 + $0xb8] sm:$0xff] }
 0x32a   : > { %v1704_v15 = vmul.f32 1.442695, %v1620_v44  ;;  %v1706_v6 = vmul.f32 1.442695, %v1621_v50  ;;  %2106 = vperm.xlu2 %4165, %v5520_v59   ;;  %1301 = vmax.xlane.f32.xlu1 %v1300_v55  ;;  %v5538_v50 = vpop.f32.mrf.mxu0  ;;  %v5540_v55 = vpop.f32.mrf.mxu3  ;;  %v2211_v59 = vmul.f32 0.0, %v5430_v26 }
 0x32b   : > { %v1290_v11 = vpop.xlane.xlu0 %1289  ;;  %6638 = vst [vmem:[#allocation71_spill] sm:$0xff] %v5538_v50 }
 0x32c   : > { %4227 = vpow2.f32 %v1704_v15  ;;  %v5528_v36 = vmax.f32 %v5522_v33, %v1290_v11  ;;  %6639 = vst [vmem:[#allocation72_spill] sm:$0xff] %v5540_v55  ;;  %v1356_v15 = vsub.f32 %v5268_v47, %v5272_v40  ;;  %v5548_v11 = vpop.f32.mrf.mxu1  ;;  %v1617_v47 = vsub.f32 %v4957_v28, %v1483_v62 }
 0x32d   : > { %4229 = vpow2.f32 %v1706_v6  ;;  %6640 = vst [vmem:[#allocation73_spill] sm:$0xff] %v5548_v11  ;;  %v1696_v40 = vmul.f32 1.442695, %v1616_v38 }
 0x32e   : > { %2667 = vst.msk [vmem:[#allocation3 + $0xc0] sm:$0xff] %vm653_vm0, %v5528_v36  ;;  %v1400_v50 = vmul.f32 1.442695, %v1356_v15  ;;  %v1698_v7 = vmul.f32 1.442695, %v1617_v47 }
 0x330   : > { %4231 = vpow2.f32 %v1400_v50 }
 0x331   : > { %4233 = vpow2.f32 %v1696_v40 }
 0x332   : > { %v5532_v39 = vpop.eup %4227  ;;  %4235 = vpow2.f32 %v1698_v7 }
 0x333   : > { %v5536_v44 = vpop.eup %4229 }
 0x334   : > { %v1287_v22 = vpop.xlane.xlu2 %1286  ;;  %v5546_v6 = vadd.f32 %v5536_v44, %v5532_v39  ;;  %v5562_v27 = vpop.f32.mrf.mxu1 }
 0x335   : > { %v5553_v58 = vmax.f32 %v5534_v8, %v1287_v22  ;;  %6642 = vst [vmem:[#allocation75_spill] sm:$0xff] %v5562_v27 }
 0x336   : > { %v2504_v55 = vpop.f32.mrf.mxu0 }
 0x337   : > { %2666 = vst.msk [vmem:[#allocation3 + $0xb8] sm:$0xff] %vm653_vm0, %v5553_v58 }
 0x33b   : > { %v2415_v52 = vpop.f32.mrf.mxu3 }
 0x33c   : > { %v2505_v49 = vadd.f32 %v2504_v55, %v2415_v52  ;;  %v1488_v31 = vpop.permute.xlu2 %1487  ;;  %v5572_v52 = vpop.eup %4231 }
 0x33d   : > { %v1618_v22 = vsub.f32 %v4963_v32, %v1488_v31  ;;  %v1619_v20 = vsub.f32 %v4965_v34, %v1488_v31  ;;  %v1306_v32 = vmax.f32 %v5562_v27, %v5564_v9  ;;  %6645 = vst [vmem:[#allocation78_spill] sm:$0xff] %v5572_v52 }
 0x33e   : > { %v1498_v15 = vpop.permute.xlu0 %1497  ;;  %v5566_v28 = vadd.f32 %v2505_v49, %v2211_v59  ;;  %v5575_v49 = vpop.eup %4233 }
 0x33f   : > { %v1700_v62 = vmul.f32 1.442695, %v1618_v22  ;;  %v1702_v38 = vmul.f32 1.442695, %v1619_v20  ;;  %v1622_v50 = vsub.f32 %v4981_v41, %v1498_v15  ;;  %v1623_v26 = vsub.f32 %v4997_v46, %v1498_v15  ;;  %v5577_v41 = vpop.eup %4235  ;;  %v5587_v15 = vld [vmem:[#allocation3 + $0xc8] sm:$0xff] }
 0x340   : > { %6644 = vst [vmem:[#allocation77_spill] sm:$0xff] %v5566_v28  ;;  %v6659_v28 = vld [vmem:[#allocation25_spill] sm:$0xff] }
 0x341   : > { %4237 = vpow2.f32 %v1700_v62  ;;  %v1708_v34 = vmul.f32 1.442695, %v1622_v50  ;;  %v1710_v31 = vmul.f32 1.442695, %v1623_v26  ;;  %v1303_v62 = vmax.f32 %v5548_v11, %v5550_v18 }
 0x342   : > { %4239 = vpow2.f32 %v1702_v38 }
 0x343   : > { %4241 = vpow2.f32 %v1708_v34  ;;  %2111 = vperm.xlu1 %4167, %v5572_v52  }
 0x344   : > { %4243 = vpow2.f32 %v1710_v31  ;;  %1307 = vmax.xlane.f32.xlu0 %v1306_v32  ;;  %v1360_v32 = vsub.f32 %v5324_v63, %v5327_v4  ;;  %v5600_v31 = vpop.f32.mrf.mxu0 }
 0x345   : > { %6646 = vst [vmem:[#allocation79_spill] sm:$0xff] %v5600_v31 }
 0x346   : > { %v1408_v34 = vmul.f32 1.442695, %v1360_v32 }
 0x347   : > { %v4238_v46 = vpop.eup %4237 }
 0x348   : > { %v4240_v7 = vpop.eup %4239  ;;  %v2249_v20 = vpack.c.bf16 %v4238_v46, %v5575_v49  ;;  %4245 = vpow2.f32 %v1408_v34 }
 0x349   : > { %v4242_v59 = vpop.eup %4241  ;;  %v2250_v55 = vpack.c.bf16 %v4240_v7, %v5577_v41  ;;  %v5581_v47 = vadd.f32 %v4240_v7, %v4238_v46  ;;  %v5602_v46 = vpop.f32.mrf.mxu3  ;;  %v1358_v7 = vsub.f32 %v5294_v29, %v5299_v37  ;;  %v5618_v29 = vld [vmem:[#allocation3 + $0xd8] sm:$0xff] }
 0x34a   : > { %v4244_v40 = vpop.eup %4243  ;;  %2429 = vmatmul.bf16.gmra.mxu3 %v2249_v20  ;;  %v2251_v26 = vpack.c.bf16 %v4242_v59, %v5532_v39  ;;  %6647 = vst [vmem:[#allocation80_spill] sm:$0xff] %v5602_v46  ;;  %v5620_v37 = vpop.f32.mrf.mxu1  ;;  %v6657_v46 = vld [vmem:[#allocation44_spill] sm:$0xff] }
 0x34b   : > { %2518 = vmatmul.bf16.gmra.mxu0 %v2250_v55  ;;  %1522 = vperm.xlu1 %4167, %v5327_v4   ;;  %v5584_v22 = vadd.f32 %v4244_v40, %v4242_v59  ;;  %v2213_v59 = vmul.f32 0.0, %v5440_v61  ;;  %6650 = vst [vmem:[#allocation83_spill] sm:$0xff] %v5620_v37  ;;  %v5622_v61 = vpop.f32.mrf.mxu2 }
 0x34c   : > { %1857 = vadd.xlane.f32.xlu0 %v5334_v3  ;;  %v2252_v3 = vpack.c.bf16 %v4244_v40, %v5536_v44  ;;  %v1404_v44 = vmul.f32 1.442695, %v1358_v7  ;;  %v5613_v40 = vpop.permute.xlu0 %2101  ;;  %6651 = vst [vmem:[#allocation84_spill] sm:$0xff] %v5622_v61  ;;  %v1309_v34 = vmax.f32 %v5620_v37, %v5622_v61  ;;  %v6658_v61 = vld [vmem:[#allocation24_spill] sm:$0xff] }
 0x34e   : > { %v5608_v4 = vpop.eup %4245  ;;  %4247 = vpow2.f32 %v1404_v44 }
 0x352   : > { %v1293_v38 = vpop.xlane.xlu1 %1292 }
 0x353   : > { %v5592_v50 = vmax.f32 %v5587_v15, %v1293_v38  ;;  %1304 = vmax.xlane.f32.xlu2 %v1303_v62 }
 0x355   : > { %2668 = vst.msk [vmem:[#allocation3 + $0xc8] sm:$0xff] %vm653_vm0, %v5592_v50 }
 0x35a   : > { %2434 = vmatmul.bf16.gmra.mxu3 %v2251_v26  ;;  %v5625_v26 = vpop.eup %4247 }
 0x35b   : > { %2523 = vmatmul.bf16.gmra.mxu0 %v2252_v3  ;;  %6652 = vst [vmem:[#allocation85_spill] sm:$0xff] %v5625_v26 }
 0x360   : > { %1527 = vperm.xlu0 %4166, %v5375_v51   ;;  %v2509_v20 = vpop.f32.mrf.mxu0 }
 0x365   : > { %v2420_v39 = vpop.f32.mrf.mxu3 }
 0x366   : > { %v2510_v63 = vadd.f32 %v2509_v20, %v2420_v39  ;;  %v6653_v20 = vld [vmem:[#allocation26_spill] sm:$0xff] }
 0x368   : > { %2131 = vperm.xlu0 %4166, %v5608_v4   ;;  %v5611_v55 = vadd.f32 %v2510_v63, %v2213_v59  ;;  %v5637_v59 = vpop.permute.xlu2 %2091 }
 0x369   : > { %6654 = vst [vmem:[#allocation26_spill] sm:$0xff] %v5637_v59  ;;  %v1359_v59 = vsub.f32 %v6657_v46, %v5314_v60 }
 0x36a   : > { %6648 = vst [vmem:[#allocation81_spill] sm:$0xff] %v5611_v55  ;;  %v5615_v62 = vpop.permute.xlu1 %2096 }
 0x36b   : > { %6649 = vst [vmem:[#allocation82_spill] sm:$0xff] %v5615_v62  ;;  %1517 = vperm.xlu2 %4165, %v5314_v60   ;;  %v5641_v62 = vpop.f32.mrf.mxu0 }
 0x36c   : > { %6655 = vst [vmem:[#allocation86_spill] sm:$0xff] %v5641_v62 }
 0x36d   : > { %v5643_v55 = vpop.f32.mrf.mxu3 }
 0x36e   : > { %6656 = vst [vmem:[#allocation87_spill] sm:$0xff] %v5643_v55 }
 0x370   : > { %1542 = vperm.xlu0 %4166, %v5465_v17  }
 0x371   : > { %v1299_v38 = vpop.xlane.xlu0 %1298 }
 0x372   : > { %v1508_v32 = vpop.permute.xlu1 %1507  ;;  %v5628_v3 = vmax.f32 %v5618_v29, %v1299_v38  ;;  %v5639_v38 = vld [vmem:[#allocation3 + $0xd0] sm:$0xff] }
 0x373   : > { %v1626_v7 = vsub.f32 %v5027_v54, %v1508_v32  ;;  %v1627_v39 = vsub.f32 %v6653_v20, %v1508_v32  ;;  %2121 = vperm.xlu2 %4165, %v5625_v26  }
 0x374   : > { %2670 = vst.msk [vmem:[#allocation3 + $0xd8] sm:$0xff] %vm653_vm0, %v5628_v3 }
 0x375   : > { %v1716_v63 = vmul.f32 1.442695, %v1626_v7  ;;  %v1718_v44 = vmul.f32 1.442695, %v1627_v39  ;;  %1310 = vmax.xlane.f32.xlu1 %v1309_v34  ;;  %v1406_v34 = vmul.f32 1.442695, %v1359_v59 }
 0x377   : > { %4249 = vpow2.f32 %v1716_v63 }
 0x378   : > { %4251 = vpow2.f32 %v1718_v44  ;;  %v2215_v44 = vmul.f32 0.0, %v5507_v21 }
 0x379   : > { %4253 = vpow2.f32 %v1406_v34  ;;  %v5685_v34 = vld [vmem:[#allocation3 + $0xf0] sm:$0xff] }
 0x37d   : > { %v4250_v54 = vpop.eup %4249  ;;  %v1296_v32 = vpop.xlane.xlu2 %1295 }
 0x37e   : > { %v4252_v20 = vpop.eup %4251  ;;  %v5646_v31 = vmax.f32 %v5639_v38, %v1296_v32 }
 0x37f   : > { %v5650_v7 = vadd.f32 %v4252_v20, %v4250_v54  ;;  %v2514_v39 = vpop.f32.mrf.mxu0  ;;  %v5659_v9 = vpop.eup %4253 }
 0x380   : > { %2669 = vst.msk [vmem:[#allocation3 + $0xd0] sm:$0xff] %vm653_vm0, %v5646_v31 }
 0x381   : > { %6661 = vst [vmem:[#allocation24_spill] sm:$0xff] %v5659_v9 }
 0x384   : > { %v2425_v63 = vpop.f32.mrf.mxu3 }
 0x385   : > { %v2515_v62 = vadd.f32 %v2514_v39, %v2425_v63  ;;  %v1503_v55 = vpop.permute.xlu2 %1502 }
 0x386   : > { %v1624_v37 = vsub.f32 %v6658_v61, %v1503_v55  ;;  %v1625_v32 = vsub.f32 %v6659_v28, %v1503_v55  ;;  %v5665_v28 = vld [vmem:[#allocation3 + $0xe0] sm:$0xff]  ;;  %v1513_v61 = vpop.permute.xlu0 %1512 }
 0x387   : > { %v5657_v26 = vadd.f32 %v2515_v62, %v2215_v44 }
 0x388   : > { %v1712_v60 = vmul.f32 1.442695, %v1624_v37  ;;  %v1714_v46 = vmul.f32 1.442695, %v1625_v32  ;;  %v1363_v37 = vsub.f32 %v5403_v56, %v5410_v48 }
 0x389   : > { %6660 = vst [vmem:[#allocation44_spill] sm:$0xff] %v5657_v26  ;;  %v5702_v26 = vpop.f32.mrf.mxu0 }
 0x38a   : > { %4255 = vpow2.f32 %v1712_v60 }
 0x38b   : > { %4257 = vpow2.f32 %v1714_v46 }
 0x38d   : > { %v5697_v46 = vpop.permute.xlu2 %2106 }
 0x38e   : > { %2126 = vperm.xlu1 %4167, %v5659_v9   ;;  %6664 = vst [vmem:[#allocation89_spill] sm:$0xff] %v5697_v46  ;;  %v5707_v9 = vpop.f32.mrf.mxu3 }
 0x390   : > { %v4256_v59 = vpop.eup %4255 }
 0x391   : > { %v4258_v27 = vpop.eup %4257  ;;  %v2253_v21 = vpack.c.bf16 %v4250_v54, %v4256_v59 }
 0x392   : > { %v2254_v39 = vpack.c.bf16 %v4252_v20, %v4258_v27  ;;  %v5662_v63 = vadd.f32 %v4258_v27, %v4256_v59  ;;  %v1414_v27 = vmul.f32 1.442695, %v1363_v37  ;;  %v6665_v59 = vld [vmem:[#allocation31_spill] sm:$0xff]  ;;  %v6667_v37 = vld [vmem:[#allocation33_spill] sm:$0xff] }
 0x393   : > { %2439 = vmatmul.bf16.gmra.mxu3 %v2253_v21  ;;  %6668 = vst [vmem:[#allocation31_spill] sm:$0xff] %v5702_v26 }
 0x394   : > { %2528 = vmatmul.bf16.gmra.mxu0 %v2254_v39  ;;  %4259 = vpow2.f32 %v1414_v27  ;;  %v6666_v39 = vld [vmem:[#allocation32_spill] sm:$0xff] }
 0x395   : > { %6669 = vst [vmem:[#allocation32_spill] sm:$0xff] %v5707_v9 }
 0x39a   : > { %1869 = vadd.xlane.f32.xlu0 %v5419_v12  ;;  %v5675_v54 = vpop.eup %4259  ;;  %v1361_v12 = vsub.f32 %v5372_v23, %v5375_v51  ;;  %v1792_v51 = vld [vmem:[#allocation4] sm:$0xff] }
 0x39b   : > { %6662 = vst [vmem:[#allocation25_spill] sm:$0xff] %v5675_v54  ;;  %v1824_v27 = vmul.f32 %v6667_v37, %v1792_v51  ;;  %v1362_v51 = vsub.f32 %v5379_v42, %v5384_v10 }
 0x39c   : > { %1860 = vadd.xlane.f32.xlu2 %v5348_v1  ;;  %v5680_v1 = vpop.permute.xlu0 %2116  ;;  %v1410_v20 = vmul.f32 1.442695, %v1361_v12 }
 0x39d   : > { %v1302_v55 = vpop.xlane.xlu1 %1301 }
 0x39e   : > { %v5669_v62 = vmax.f32 %v5665_v28, %v1302_v55  ;;  %4261 = vpow2.f32 %v1410_v20 }
 0x3a0   : > { %2671 = vst.msk [vmem:[#allocation3 + $0xe0] sm:$0xff] %vm653_vm0, %v5669_v62 }
 0x3a4   : > { %v5694_v23 = vpop.eup %4261 }
 0x3a5   : > { %6663 = vst [vmem:[#allocation88_spill] sm:$0xff] %v5694_v23 }
 0x3ae   : > { %2146 = vperm.xlu0 %4166, %v5675_v54   ;;  %v6674_v54 = vld [vmem:[#allocation29_spill] sm:$0xff] }
 0x3b4   : > { %1532 = vperm.xlu2 %4165, %v5384_v10   ;;  %v6675_v10 = vld [vmem:[#allocation30_spill] sm:$0xff] }
 0x3b5   : > { %v5683_v56 = vpop.permute.xlu1 %2111 }
 0x3b6   : > { %1557 = vperm.xlu0 %4166, %v5553_v58  }
 0x3b7   : > { %v1308_v44 = vpop.xlane.xlu0 %1307 }
 0x3b8   : > { %v5689_v32 = vmax.f32 %v5685_v34, %v1308_v44  ;;  %1863 = vadd.xlane.f32.xlu1 %v5367_v30 }
 0x3ba   : > { %2673 = vst.msk [vmem:[#allocation3 + $0xf0] sm:$0xff] %vm653_vm0, %v5689_v32 }
 0x3bc   : > { %2136 = vperm.xlu2 %4165, %v5694_v23   ;;  %v5705_v23 = vld [vmem:[#allocation3 + $0xe8] sm:$0xff] }
 0x3bd   : > { %v1523_v60 = vpop.permute.xlu1 %1522 }
 0x3be   : > { %v1632_v21 = vsub.f32 %v6665_v59, %v1523_v60  ;;  %v1633_v55 = vsub.f32 %v6666_v39, %v1523_v60  ;;  %v6670_v39 = vld [vmem:[#allocation27_spill] sm:$0xff] }
 0x3bf   : > { %v1858_v12 = vpop.xlane.xlu0 %1857 }
 0x3c0   : > { %v1728_v20 = vmul.f32 1.442695, %v1632_v21  ;;  %v1730_v30 = vmul.f32 1.442695, %v1633_v55  ;;  %v1952_v44 = vadd.f32 %v1858_v12, %v1824_v27  ;;  %v1628_v55 = vsub.f32 %v6670_v39, %v1513_v61  ;;  %v6672_v27 = vld [vmem:[#allocation28_spill] sm:$0xff] }
 0x3c1   : > { %v1629_v12 = vsub.f32 %v6672_v27, %v1513_v61 }
 0x3c2   : > { %4263 = vpow2.f32 %v1728_v20  ;;  %1985 = vst.msk [vmem:[#allocation4] sm:$0xff] %vm653_vm0, %v1952_v44  ;;  %v1720_v44 = vmul.f32 1.442695, %v1628_v55 }
 0x3c3   : > { %4265 = vpow2.f32 %v1730_v30  ;;  %v1412_v30 = vmul.f32 1.442695, %v1362_v51  ;;  %v1722_v26 = vmul.f32 1.442695, %v1629_v12  ;;  %v6677_v51 = vld [vmem:[#allocation35_spill] sm:$0xff] }
 0x3c5   : > { %4267 = vpow2.f32 %v1412_v30 }
 0x3c6   : > { %v1305_v46 = vpop.xlane.xlu2 %1304  ;;  %4269 = vpow2.f32 %v1720_v44 }
 0x3c7   : > { %v5710_v59 = vmax.f32 %v5705_v23, %v1305_v46  ;;  %4271 = vpow2.f32 %v1722_v26 }
 0x3c8   : > { %v4264_v60 = vpop.eup %4263  ;;  %v5717_v37 = vpop.f32.mrf.mxu0 }
 0x3c9   : > { %v4266_v21 = vpop.eup %4265  ;;  %2672 = vst.msk [vmem:[#allocation3 + $0xe8] sm:$0xff] %vm653_vm0, %v5710_v59 }
 0x3ca   : > { %6671 = vst [vmem:[#allocation33_spill] sm:$0xff] %v5717_v37  ;;  %v5720_v20 = vadd.f32 %v4266_v21, %v4264_v60  ;;  %v6678_v37 = vld [vmem:[#allocation34_spill] sm:$0xff] }
 0x3cd   : > { %v5722_v46 = vpop.f32.mrf.mxu3 }
 0x3ce   : > { %6673 = vst [vmem:[#allocation27_spill] sm:$0xff] %v5722_v46  ;;  %v1518_v9 = vpop.permute.xlu2 %1517 }
 0x3cf   : > { %v1630_v42 = vsub.f32 %v6674_v54, %v1518_v9  ;;  %v1631_v52 = vsub.f32 %v6675_v10, %v1518_v9  ;;  %v5733_v9 = vpop.eup %4267 }
 0x3d0   : > { %v5727_v27 = vpop.f32.mrf.mxu0  ;;  %v5735_v30 = vpop.eup %4269 }
 0x3d1   : > { %v1724_v39 = vmul.f32 1.442695, %v1630_v42  ;;  %v1726_v18 = vmul.f32 1.442695, %v1631_v52  ;;  %1537 = vperm.xlu1 %4167, %v5410_v48   ;;  %6676 = vst [vmem:[#allocation28_spill] sm:$0xff] %v5727_v27  ;;  %v5737_v48 = vpop.eup %4271 }
 0x3d2   : > { %v1528_v61 = vpop.permute.xlu0 %1527 }
 0x3d3   : > { %4273 = vpow2.f32 %v1724_v39  ;;  %v1634_v55 = vsub.f32 %v6677_v51, %v1528_v61  ;;  %v1635_v12 = vsub.f32 %v6678_v37, %v1528_v61 }
 0x3d4   : > { %4275 = vpow2.f32 %v1726_v18 }
 0x3d5   : > { %v1732_v46 = vmul.f32 1.442695, %v1634_v55  ;;  %v1734_v54 = vmul.f32 1.442695, %v1635_v12  ;;  %v5731_v11 = vpop.f32.mrf.mxu3 }
 0x3d6   : > { %6679 = vst [vmem:[#allocation29_spill] sm:$0xff] %v5731_v11  ;;  %v6686_v11 = vld [vmem:[#allocation37_spill] sm:$0xff] }
 0x3d7   : > { %4277 = vpow2.f32 %v1732_v46  ;;  %v2219_v46 = vmul.f32 0.0, %v5613_v40 }
 0x3d8   : > { %4279 = vpow2.f32 %v1734_v54  ;;  %v2524_v10 = vpop.f32.mrf.mxu0  ;;  %v1366_v54 = vsub.f32 %v5487_v25, %v5491_v0 }
 0x3d9   : > { %v4274_v52 = vpop.eup %4273  ;;  %2141 = vperm.xlu1 %4167, %v5733_v9  }
 0x3da   : > { %v4276_v26 = vpop.eup %4275  ;;  %v2255_v44 = vpack.c.bf16 %v4274_v52, %v5735_v30 }
 0x3db   : > { %v2256_v18 = vpack.c.bf16 %v4276_v26, %v5737_v48  ;;  %v5742_v37 = vadd.f32 %v4276_v26, %v4274_v52  ;;  %v5753_v52 = vld [vmem:[#allocation3 + $0xf8] sm:$0xff] }
 0x3dc   : > { %2444 = vmatmul.bf16.gmra.mxu3 %v2255_v44  ;;  %v1420_v44 = vmul.f32 1.442695, %v1366_v54 }
 0x3dd   : > { %v4278_v42 = vpop.eup %4277  ;;  %2533 = vmatmul.bf16.gmra.mxu0 %v2256_v18  ;;  %v2435_v39 = vpop.f32.mrf.mxu3 }
 0x3de   : > { %v4280_v61 = vpop.eup %4279  ;;  %v2525_v51 = vadd.f32 %v2524_v10, %v2435_v39  ;;  %v2257_v40 = vpack.c.bf16 %v4278_v42, %v4264_v60  ;;  %4281 = vpow2.f32 %v1420_v44  ;;  %v5765_v39 = vpop.permute.xlu0 %2131  ;;  %v6684_v44 = vld [vmem:[#allocation39_spill] sm:$0xff] }
 0x3df   : > { %v5745_v55 = vadd.f32 %v4280_v61, %v4278_v42  ;;  %v2258_v10 = vpack.c.bf16 %v4280_v61, %v4266_v21  ;;  %v5775_v42 = vpop.permute.xlu2 %2121  ;;  %v1796_v61 = vld [vmem:[#allocation4 + $0x20] sm:$0xff] }
 0x3e0   : > { %1878 = vadd.xlane.f32.xlu0 %v5462_v19  ;;  %v5748_v12 = vadd.f32 %v2525_v51, %v2219_v46  ;;  %6681 = vst [vmem:[#allocation35_spill] sm:$0xff] %v5775_v42  ;;  %v5778_v51 = vpop.f32.mrf.mxu0 }
 0x3e1   : > { %6683 = vst [vmem:[#allocation34_spill] sm:$0xff] %v5778_v51 }
 0x3e2   : > { %6680 = vst [vmem:[#allocation30_spill] sm:$0xff] %v5748_v12 }
 0x3e4   : > { %v5760_v19 = vpop.eup %4281 }
 0x3e5   : > { %1866 = vadd.xlane.f32.xlu2 %v5415_v16  ;;  %v1364_v16 = vsub.f32 %v5460_v2, %v5465_v17  ;;  %v1793_v2 = vld [vmem:[#allocation4 + $0x8] sm:$0xff]  ;;  %v6682_v17 = vld [vmem:[#allocation42_spill] sm:$0xff] }
 0x3e6   : > { %v5772_v21 = vpop.permute.xlu0 %1542  ;;  %v1828_v46 = vmul.f32 %v6682_v17, %v1796_v61 }
 0x3e7   : > { %v1416_v25 = vmul.f32 1.442695, %v1364_v16 }
 0x3e8   : > { %v1311_v26 = vpop.xlane.xlu1 %1310 }
 0x3e9   : > { %v5756_v18 = vmax.f32 %v5753_v52, %v1311_v26  ;;  %4283 = vpow2.f32 %v1416_v25  ;;  %v1365_v25 = vsub.f32 %v5451_v24, %v5454_v57 }
 0x3eb   : > { %2674 = vst.msk [vmem:[#allocation3 + $0xf8] sm:$0xff] %vm653_vm0, %v5756_v18  ;;  %v1418_v42 = vmul.f32 1.442695, %v1365_v25 }
 0x3ec   : > { %2449 = vmatmul.bf16.gmra.mxu3 %v2257_v40  ;;  %v1825_v40 = vmul.f32 %v6684_v44, %v1793_v2  ;;  %v2221_v44 = vmul.f32 0.0, %v5683_v56 }
 0x3ed   : > { %2538 = vmatmul.bf16.gmra.mxu0 %v2258_v10  ;;  %v5781_v10 = vpop.f32.mrf.mxu3  ;;  %4285 = vpow2.f32 %v1418_v42 }
 0x3ee   : > { %6685 = vst [vmem:[#allocation42_spill] sm:$0xff] %v5781_v10 }
 0x3ef   : > { %v5770_v60 = vpop.eup %4283 }
 0x3f4   : > { %2161 = vperm.xlu0 %4166, %v5760_v19  }
 0x3fc   : > { %1572 = vperm.xlu0 %4166, %v5646_v31  }
 0x3fd   : > { %1547 = vperm.xlu2 %4165, %v5454_v57  }
 0x400   : > { %v5798_v25 = vpop.permute.xlu1 %2126 }
 0x403   : > { %1872 = vadd.xlane.f32.xlu1 %v5449_v45 }
 0x405   : > { %2151 = vperm.xlu2 %4165, %v5770_v60  }
 0x40d   : > { %v1870_v54 = vpop.xlane.xlu0 %1869 }
 0x40e   : > { %v1956_v26 = vadd.f32 %v1870_v54, %v1828_v46  ;;  %v6687_v54 = vld [vmem:[#allocation36_spill] sm:$0xff] }
 0x40f   : > { %v1861_v45 = vpop.xlane.xlu2 %1860 }
 0x410   : > { %1989 = vst.msk [vmem:[#allocation4 + $0x20] sm:$0xff] %vm653_vm0, %v1956_v26  ;;  %v1953_v16 = vadd.f32 %v1861_v45, %v1825_v40  ;;  %v2222_v40 = vmul.f32 0.0, %v5680_v1  ;;  %v5794_v45 = vpop.eup %4285  ;;  %v1369_v1 = vsub.f32 %v5587_v15, %v5592_v50 }
 0x411   : > { %v2529_v12 = vpop.f32.mrf.mxu0 }
 0x412   : > { %1986 = vst.msk [vmem:[#allocation4 + $0x8] sm:$0xff] %vm653_vm0, %v1953_v16 }
 0x416   : > { %v2440_v61 = vpop.f32.mrf.mxu3 }
 0x417   : > { %v1533_v17 = vpop.permute.xlu2 %1532  ;;  %v2530_v27 = vadd.f32 %v2529_v12, %v2440_v61 }
 0x418   : > { %v1636_v46 = vsub.f32 %v6686_v11, %v1533_v17  ;;  %v1637_v2 = vsub.f32 %v6687_v54, %v1533_v17  ;;  %v1426_v17 = vmul.f32 1.442695, %v1369_v1 }
 0x419   : > { %v5791_v26 = vadd.f32 %v2530_v27, %v2221_v44  ;;  %v2531_v24 = vpop.f32.mrf.mxu0  ;;  %v6688_v27 = vld [vmem:[#allocation41_spill] sm:$0xff]  ;;  %v6689_v44 = vld [vmem:[#allocation40_spill] sm:$0xff] }
 0x41a   : > { %v1736_v51 = vmul.f32 1.442695, %v1636_v46  ;;  %v1738_v10 = vmul.f32 1.442695, %v1637_v2 }
 0x41c   : > { %4287 = vpow2.f32 %v1736_v51  ;;  %1552 = vperm.xlu1 %4167, %v5491_v0   ;;  %v1794_v0 = vld [vmem:[#allocation4 + $0x10] sm:$0xff] }
 0x41d   : > { %4289 = vpow2.f32 %v1738_v10  ;;  %v1826_v51 = vmul.f32 %v6688_v27, %v1794_v0 }
 0x41e   : > { %v2442_v57 = vpop.f32.mrf.mxu3  ;;  %4291 = vpow2.f32 %v1426_v17 }
 0x41f   : > { %v2532_v12 = vadd.f32 %v2531_v24, %v2442_v57  ;;  %v6690_v57 = vld [vmem:[#allocation38_spill] sm:$0xff] }
 0x420   : > { %v5814_v54 = vpop.permute.xlu0 %2146 }
 0x421   : > { %v5796_v16 = vadd.f32 %v2532_v12, %v2222_v40 }
 0x422   : > { %v4288_v11 = vpop.eup %4287 }
 0x423   : > { %v4290_v56 = vpop.eup %4289 }
 0x424   : > { %2156 = vperm.xlu1 %4167, %v5794_v45   ;;  %v5801_v42 = vadd.f32 %v4290_v56, %v4288_v11  ;;  %v5809_v46 = vpop.eup %4291 }
 0x426   : > { %1887 = vadd.xlane.f32.xlu0 %v5546_v6  ;;  %v1367_v6 = vsub.f32 %v5534_v8, %v5553_v58  ;;  %v1880_v58 = vadd.f32 %v5577_v41, %v5575_v49  ;;  %v1795_v41 = vld [vmem:[#allocation4 + $0x18] sm:$0xff] }
 0x428   : > { %v1422_v15 = vmul.f32 1.442695, %v1367_v6  ;;  %v5820_v0 = vpop.permute.xlu0 %1557 }
 0x42a   : > { %4293 = vpow2.f32 %v1422_v15 }
 0x42b   : > { %v1864_v10 = vpop.xlane.xlu1 %1863 }
 0x42c   : > { %v1954_v61 = vadd.f32 %v1864_v10, %v1826_v51  ;;  %v1799_v10 = vld [vmem:[#allocation4 + $0x38] sm:$0xff] }
 0x42d   : > { %v1831_v15 = vmul.f32 %v5355_v13, %v1799_v10 }
 0x42e   : > { %1987 = vst.msk [vmem:[#allocation4 + $0x10] sm:$0xff] %vm653_vm0, %v1954_v61  ;;  %1875 = vadd.xlane.f32.xlu2 %v5485_v14  ;;  %v5827_v61 = vpop.permute.xlu2 %2136 }
 0x430   : > { %v5824_v8 = vpop.eup %4293 }
 0x43a   : > { %2176 = vperm.xlu0 %4166, %v5809_v46  }
 0x442   : > { %1587 = vperm.xlu0 %4166, %v5710_v59  }
 0x443   : > { %v1538_v2 = vpop.permute.xlu1 %1537 }
 0x444   : > { %v1638_v24 = vsub.f32 %v6689_v44, %v1538_v2  ;;  %v1639_v40 = vsub.f32 %v6690_v57, %v1538_v2  ;;  %v6691_v44 = vld [vmem:[#allocation43_spill] sm:$0xff] }
 0x446   : > { %v1740_v14 = vmul.f32 1.442695, %v1638_v24  ;;  %v1742_v12 = vmul.f32 1.442695, %v1639_v40  ;;  %1562 = vperm.xlu2 %4165, %v5528_v36   ;;  %v1827_v24 = vmul.f32 %v6691_v44, %v1795_v41 }
 0x448   : > { %4295 = vpow2.f32 %v1740_v14  ;;  %v1641_v14 = vsub.f32 %v5317_v43, %v5772_v21 }
 0x449   : > { %4297 = vpow2.f32 %v1742_v12 }
 0x44e   : > { %v4296_v27 = vpop.eup %4295  ;;  %2166 = vperm.xlu2 %4165, %v5824_v8   ;;  %1881 = vadd.xlane.f32.xlu1 %v1880_v58  ;;  %v1368_v58 = vsub.f32 %v5522_v33, %v5528_v36  ;;  %v2224_v33 = vmul.f32 0.0, %v5798_v25  ;;  %v5862_v25 = vpop.permute.xlu1 %2141 }
 0x44f   : > { %v4298_v51 = vpop.eup %4297  ;;  %v2259_v1 = vpack.c.bf16 %v4296_v27, %v4288_v11  ;;  %v1640_v11 = vsub.f32 %v5322_v35, %v5772_v21 }
 0x450   : > { %v2260_v17 = vpack.c.bf16 %v4298_v51, %v4290_v56  ;;  %v5829_v6 = vadd.f32 %v4298_v51, %v4296_v27  ;;  %v1746_v27 = vmul.f32 1.442695, %v1641_v14 }
 0x451   : > { %2454 = vmatmul.bf16.gmra.mxu3 %v2259_v1  ;;  %v1744_v13 = vmul.f32 1.442695, %v1640_v11  ;;  %v6692_v1 = vld [vmem:[#allocation46_spill] sm:$0xff] }
 0x452   : > { %2543 = vmatmul.bf16.gmra.mxu0 %v2260_v17  ;;  %v6693_v17 = vld [vmem:[#allocation45_spill] sm:$0xff] }
 0x453   : > { %v1879_v2 = vpop.xlane.xlu0 %1878  ;;  %4299 = vpow2.f32 %v1744_v13 }
 0x454   : > { %v1959_v49 = vadd.f32 %v1879_v2, %v1831_v15  ;;  %4301 = vpow2.f32 %v1746_v27 }
 0x456   : > { %1992 = vst.msk [vmem:[#allocation4 + $0x38] sm:$0xff] %vm653_vm0, %v1959_v49  ;;  %v1424_v49 = vmul.f32 1.442695, %v1368_v58 }
 0x458   : > { %v1867_v57 = vpop.xlane.xlu2 %1866 }
 0x459   : > { %v1955_v40 = vadd.f32 %v1867_v57, %v1827_v24  ;;  %v5849_v21 = vpop.eup %4299 }
 0x45a   : > { %v5837_v56 = vpop.f32.mrf.mxu0  ;;  %v5851_v44 = vpop.eup %4301 }
 0x45b   : > { %1988 = vst.msk [vmem:[#allocation4 + $0x18] sm:$0xff] %vm653_vm0, %v1955_v40 }
 0x45f   : > { %v5841_v12 = vpop.f32.mrf.mxu3 }
 0x460   : > { %v1548_v51 = vpop.permute.xlu2 %1547 }
 0x461   : > { %v1642_v10 = vsub.f32 %v6692_v1, %v1548_v51  ;;  %v1643_v15 = vsub.f32 %v6693_v17, %v1548_v51  ;;  %v2225_v51 = vmul.f32 0.0, %v5765_v39 }
 0x462   : > { %v2536_v41 = vpop.f32.mrf.mxu0 }
 0x463   : > { %v1748_v35 = vmul.f32 1.442695, %v1642_v10  ;;  %v1750_v2 = vmul.f32 1.442695, %v1643_v15  ;;  %v1797_v10 = vld [vmem:[#allocation4 + $0x28] sm:$0xff] }
 0x465   : > { %4303 = vpow2.f32 %v1748_v35  ;;  %v1829_v35 = vmul.f32 %v5369_v5, %v1797_v10  ;;  %v6695_v5 = vld [vmem:[#allocation50_spill] sm:$0xff]  ;;  %v6698_v10 = vld [vmem:[#allocation55_spill] sm:$0xff] }
 0x466   : > { %4305 = vpow2.f32 %v1750_v2  ;;  %v5876_v39 = vpop.permute.xlu0 %2161 }
 0x467   : > { %v2447_v43 = vpop.f32.mrf.mxu3  ;;  %1567 = vperm.xlu1 %4167, %v5592_v50   ;;  %4307 = vpow2.f32 %v1424_v49  ;;  %6694 = vst [vmem:[#allocation39_spill] sm:$0xff] %v5876_v39 }
 0x468   : > { %v2537_v36 = vadd.f32 %v2536_v41, %v2447_v43  ;;  %v1646_v43 = vsub.f32 %v5390_v53, %v5820_v0  ;;  %v1802_v53 = vld [vmem:[#allocation4 + $0x50] sm:$0xff] }
 0x46a   : > { %v5853_v24 = vadd.f32 %v2537_v36, %v2224_v33  ;;  %v2539_v58 = vpop.f32.mrf.mxu0  ;;  %v1647_v33 = vsub.f32 %v6695_v5, %v5820_v0 }
 0x46b   : > { %v4304_v57 = vpop.eup %4303 }
 0x46c   : > { %v4306_v40 = vpop.eup %4305  ;;  %1896 = vadd.xlane.f32.xlu0 %v5650_v7  ;;  %v2261_v11 = vpack.c.bf16 %v4304_v57, %v5849_v21  ;;  %v1372_v7 = vsub.f32 %v5665_v28, %v5669_v62  ;;  %v1370_v28 = vsub.f32 %v5639_v38, %v5646_v31 }
 0x46d   : > { %v2262_v14 = vpack.c.bf16 %v4306_v40, %v5851_v44  ;;  %v5858_v13 = vadd.f32 %v4306_v40, %v4304_v57  ;;  %v5860_v50 = vpop.eup %4307  ;;  %v1758_v57 = vmul.f32 1.442695, %v1647_v33 }
 0x46e   : > { %2459 = vmatmul.bf16.gmra.mxu3 %v2261_v11  ;;  %v1432_v15 = vmul.f32 1.442695, %v1372_v7  ;;  %v1428_v36 = vmul.f32 1.442695, %v1370_v28  ;;  %v6696_v11 = vld [vmem:[#allocation47_spill] sm:$0xff] }
 0x46f   : > { %2548 = vmatmul.bf16.gmra.mxu0 %v2262_v14  ;;  %v2450_v27 = vpop.f32.mrf.mxu3  ;;  %2171 = vperm.xlu1 %4167, %v5860_v50  }
 0x470   : > { %v2540_v1 = vadd.f32 %v2539_v58, %v2450_v27  ;;  %4309 = vpow2.f32 %v1432_v15  ;;  %v6697_v58 = vld [vmem:[#allocation48_spill] sm:$0xff]  ;;  %v1834_v15 = vmul.f32 %v6698_v10, %v1802_v53  ;;  %v1371_v53 = vsub.f32 %v5618_v29, %v5628_v3 }
 0x471   : > { %4311 = vpow2.f32 %v1428_v36 }
 0x472   : > { %v5868_v17 = vadd.f32 %v2540_v1, %v2225_v51  ;;  %v5887_v51 = vpop.permute.xlu0 %1572 }
 0x476   : > { %v1873_v2 = vpop.xlane.xlu1 %1872  ;;  %v5873_v41 = vpop.eup %4309 }
 0x477   : > { %v1957_v49 = vadd.f32 %v1873_v2, %v1829_v35  ;;  %1884 = vadd.xlane.f32.xlu2 %v5581_v47  ;;  %v1756_v47 = vmul.f32 1.442695, %v1646_v43  ;;  %v5889_v0 = vpop.eup %4311  ;;  %v5897_v2 = vpop.permute.xlu2 %2151 }
 0x479   : > { %1990 = vst.msk [vmem:[#allocation4 + $0x28] sm:$0xff] %vm653_vm0, %v1957_v49  ;;  %4313 = vpow2.f32 %v1756_v47  ;;  %v1798_v47 = vld [vmem:[#allocation4 + $0x30] sm:$0xff] }
 0x47a   : > { %4315 = vpow2.f32 %v1758_v57  ;;  %v6699_v57 = vld [vmem:[#allocation51_spill] sm:$0xff] }
 0x47f   : > { %v5891_v1 = vpop.eup %4313 }
 0x480   : > { %2191 = vperm.xlu0 %4166, %v5873_v41   ;;  %v5894_v7 = vpop.eup %4315 }
 0x48e   : > { %v1553_v40 = vpop.permute.xlu1 %1552 }
 0x48f   : > { %v1644_v14 = vsub.f32 %v6696_v11, %v1553_v40  ;;  %v1645_v27 = vsub.f32 %v6697_v58, %v1553_v40  ;;  %1577 = vperm.xlu2 %4165, %v5628_v3   ;;  %v1830_v40 = vmul.f32 %v6699_v57, %v1798_v47  ;;  %v6700_v58 = vld [vmem:[#allocation53_spill] sm:$0xff]  ;;  %v1800_v47 = vld [vmem:[#allocation4 + $0x40] sm:$0xff] }
 0x491   : > { %v1752_v31 = vmul.f32 1.442695, %v1644_v14  ;;  %v1754_v38 = vmul.f32 1.442695, %v1645_v27 }
 0x493   : > { %4317 = vpow2.f32 %v1752_v31  ;;  %v6701_v31 = vld [vmem:[#allocation52_spill] sm:$0xff] }
 0x494   : > { %4319 = vpow2.f32 %v1754_v38 }
 0x496   : > { %v5919_v29 = vpop.permute.xlu1 %2156 }
 0x497   : > { %2181 = vperm.xlu2 %4165, %v5889_v0  }
 0x499   : > { %v4318_v35 = vpop.eup %4317  ;;  %v1888_v49 = vpop.xlane.xlu0 %1887  ;;  %1890 = vadd.xlane.f32.xlu1 %v5584_v22 }
 0x49a   : > { %v4320_v28 = vpop.eup %4319  ;;  %v1962_v43 = vadd.f32 %v1888_v49, %v1834_v15  ;;  %v2263_v5 = vpack.c.bf16 %v5891_v1, %v4318_v35  ;;  %v1375_v49 = vsub.f32 %v5753_v52, %v5756_v18 }
 0x49b   : > { %v2264_v33 = vpack.c.bf16 %v5894_v7, %v4320_v28  ;;  %v5902_v36 = vadd.f32 %v4320_v28, %v4318_v35  ;;  %v1430_v35 = vmul.f32 1.442695, %v1371_v53 }
 0x49c   : > { %1995 = vst.msk [vmem:[#allocation4 + $0x50] sm:$0xff] %vm653_vm0, %v1962_v43  ;;  %2464 = vmatmul.bf16.gmra.mxu3 %v2263_v5  ;;  %v1438_v28 = vmul.f32 1.442695, %v1375_v49  ;;  %v6704_v49 = vld [vmem:[#allocation56_spill] sm:$0xff] }
 0x49d   : > { %2553 = vmatmul.bf16.gmra.mxu0 %v2264_v33 }
 0x4a1   : > { %v1876_v11 = vpop.xlane.xlu2 %1875 }
 0x4a2   : > { %v1958_v14 = vadd.f32 %v1876_v11, %v1830_v40  ;;  %v5928_v11 = vpop.f32.mrf.mxu0 }
 0x4a4   : > { %1991 = vst.msk [vmem:[#allocation4 + $0x30] sm:$0xff] %vm653_vm0, %v1958_v14  ;;  %v5930_v14 = vpop.f32.mrf.mxu3 }
 0x4a9   : > { %v1563_v22 = vpop.permute.xlu2 %1562 }
 0x4aa   : > { %v1648_v27 = vsub.f32 %v6700_v58, %v1563_v22  ;;  %v1649_v38 = vsub.f32 %v6701_v31, %v1563_v22  ;;  %1905 = vadd.xlane.f32.xlu0 %v5720_v20  ;;  %v1373_v58 = vsub.f32 %v5705_v23, %v5710_v59  ;;  %v1805_v23 = vld [vmem:[#allocation4 + $0x68] sm:$0xff] }
 0x4ac   : > { %v1760_v10 = vmul.f32 1.442695, %v1648_v27  ;;  %v1762_v15 = vmul.f32 1.442695, %v1649_v38  ;;  %v5932_v22 = vpop.permute.xlu0 %2176  ;;  %v1434_v38 = vmul.f32 1.442695, %v1373_v58 }
 0x4ad   : > { %6703 = vst [vmem:[#allocation37_spill] sm:$0xff] %v5932_v22  ;;  %v6711_v22 = vld [vmem:[#allocation62_spill] sm:$0xff] }
 0x4ae   : > { %4321 = vpow2.f32 %v1760_v10 }
 0x4af   : > { %4323 = vpow2.f32 %v1762_v15 }
 0x4b0   : > { %4325 = vpow2.f32 %v1430_v35 }
 0x4b1   : > { %4327 = vpow2.f32 %v1438_v28 }
 0x4b2   : > { %1582 = vperm.xlu1 %4167, %v5669_v62   ;;  %v6702_v62 = vld [vmem:[#allocation58_spill] sm:$0xff]  ;;  %4329 = vpow2.f32 %v1434_v38 }
 0x4b3   : > { %v1832_v52 = vmul.f32 %v6702_v62, %v1800_v47  ;;  %v6705_v47 = vld [vmem:[#allocation57_spill] sm:$0xff] }
 0x4b4   : > { %v4322_v43 = vpop.eup %4321  ;;  %v5937_v10 = vpop.permute.xlu0 %1587 }
 0x4b5   : > { %v4324_v5 = vpop.eup %4323 }
 0x4b6   : > { %v5915_v33 = vadd.f32 %v4324_v5, %v4322_v43  ;;  %v5917_v20 = vpop.eup %4325 }
 0x4b7   : > { %v5922_v3 = vpop.eup %4327 }
 0x4ba   : > { %2186 = vperm.xlu1 %4167, %v5917_v20  }
 0x4be   : > { %2206 = vperm.xlu0 %4166, %v5922_v3  }
 0x4c0   : > { %1893 = vadd.xlane.f32.xlu2 %v5662_v63  ;;  %v2227_v63 = vmul.f32 0.0, %v5862_v25  ;;  %v2228_v25 = vmul.f32 0.0, %v5814_v54  ;;  %v1898_v54 = vadd.f32 %v5737_v48, %v5735_v30  ;;  %v6708_v30 = vld [vmem:[#allocation60_spill] sm:$0xff] }
 0x4c1   : > { %v1882_v57 = vpop.xlane.xlu1 %1881  ;;  %v1652_v48 = vsub.f32 %v6708_v30, %v5887_v51 }
 0x4c2   : > { %v1960_v40 = vadd.f32 %v1882_v57, %v1832_v52  ;;  %v2680_v52 = vld [vmem:[#allocation4 + $0x10] sm:$0xff] }
 0x4c3   : > { %4331 = vrcp.f32 %v2680_v52  ;;  %vm2743_vm2 = vweird.f32 %v2680_v52 }
 0x4c4   : > { %1993 = vst.msk [vmem:[#allocation4 + $0x40] sm:$0xff] %vm653_vm0, %v1960_v40 }
 0x4cf   : > { %v2544_v27 = vpop.f32.mrf.mxu0 }
 0x4d4   : > { %v2455_v31 = vpop.f32.mrf.mxu3 }
 0x4d5   : > { %v2545_v53 = vadd.f32 %v2544_v27, %v2455_v31  ;;  %v6706_v31 = vld [vmem:[#allocation65_spill] sm:$0xff] }
 0x4d7   : > { %v5939_v15 = vadd.f32 %v2545_v53, %v2227_v63  ;;  %v2546_v59 = vpop.f32.mrf.mxu0  ;;  %v1837_v63 = vmul.f32 %v6706_v31, %v1805_v23  ;;  %v5946_v53 = vpop.eup %4329 }
 0x4d8   : > { %1592 = vperm.xlu2 %4165, %v5689_v32  }
 0x4d9   : > { %v1568_v35 = vpop.permute.xlu1 %1567 }
 0x4da   : > { %v1650_v28 = vsub.f32 %v6704_v49, %v1568_v35  ;;  %v1651_v62 = vsub.f32 %v6705_v47, %v1568_v35  ;;  %v5951_v47 = vpop.permute.xlu2 %2166 }
 0x4dc   : > { %v1764_v57 = vmul.f32 1.442695, %v1650_v28  ;;  %v1766_v40 = vmul.f32 1.442695, %v1651_v62  ;;  %v2457_v58 = vpop.f32.mrf.mxu3  ;;  %v4332_v28 = vpop.eup %4331 }
 0x4dd   : > { %v2547_v27 = vadd.f32 %v2546_v59, %v2457_v58  ;;  %vm2744_vm1 = vweird.f32 %v4332_v28 }
 0x4de   : > { %4333 = vpow2.f32 %v1764_v57  ;;  %vm2745_vm3 = vmor %vm2743_vm2, %vm2744_vm1 }
 0x4df   : > { %4335 = vpow2.f32 %v1766_v40  ;;  %v1897_v38 = vpop.xlane.xlu0 %1896  ;;  %v5948_v49 = vadd.f32 %v2547_v27, %v2228_v25  ;;  %v1801_v40 = vld [vmem:[#allocation4 + $0x48] sm:$0xff]  ;;  %v2739_v25 = vmul.f32 %v4332_v28, %v2680_v52 }
 0x4e0   : > { %v1965_v35 = vadd.f32 %v1897_v38, %v1837_v63  ;;  %2196 = vperm.xlu2 %4165, %v5946_v53   ;;  %v6707_v27 = vld [vmem:[#allocation61_spill] sm:$0xff] }
 0x4e1   : > { %v1833_v31 = vmul.f32 %v6707_v27, %v1801_v40 }
 0x4e2   : > { %1998 = vst.msk [vmem:[#allocation4 + $0x68] sm:$0xff] %vm653_vm0, %v1965_v35  ;;  %v2740_v35 = vsub.f32 1.0, %v2739_v25 }
 0x4e4   : > { %v4334_v62 = vpop.eup %4333  ;;  %1899 = vadd.xlane.f32.xlu1 %v1898_v54  ;;  %v2741_v54 = vmul.f32 %v4332_v28, %v2740_v35 }
 0x4e5   : > { %v4336_v23 = vpop.eup %4335  ;;  %v2265_v59 = vpack.c.bf16 %v4334_v62, %v4322_v43  ;;  %v6709_v43 = vld [vmem:[#allocation59_spill] sm:$0xff] }
 0x4e6   : > { %v2266_v57 = vpack.c.bf16 %v4336_v23, %v4324_v5  ;;  %v5956_v58 = vadd.f32 %v4336_v23, %v4334_v62  ;;  %v1653_v5 = vsub.f32 %v6709_v43, %v5887_v51  ;;  %v1768_v62 = vmul.f32 1.442695, %v1652_v48 }
 0x4e7   : > { %2469 = vmatmul.bf16.gmra.mxu3 %v2265_v59  ;;  %v2742_v40 = vadd.f32 %v4332_v28, %v2741_v54  ;;  %v2747_v51 = vand.u32 2147483647, %v2680_v52 }
 0x4e8   : > { %2558 = vmatmul.bf16.gmra.mxu0 %v2266_v57  ;;  %1914 = vadd.xlane.f32.xlu0 %v5829_v6  ;;  %v1770_v23 = vmul.f32 1.442695, %v1653_v5  ;;  %v6710_v57 = vld [vmem:[#allocation63_spill] sm:$0xff]  ;;  %4337 = vpow2.f32 %v1768_v62  ;;  %v5980_v62 = vpop.permute.xlu1 %2171 }
 0x4e9   : > { %vm2748_vm4 = vcmp.eq.f32.partialorder %v2747_v51, 8.507059e+37  ;;  %6712 = vst [vmem:[#allocation36_spill] sm:$0xff] %v5980_v62  ;;  %v1808_v51 = vld [vmem:[#allocation4 + $0x80] sm:$0xff] }
 0x4ea   : > { %v1885_v63 = vpop.xlane.xlu2 %1884  ;;  %4339 = vpow2.f32 %v1770_v23  ;;  %v1803_v23 = vld [vmem:[#allocation4 + $0x58] sm:$0xff] }
 0x4eb   : > { %v1961_v38 = vadd.f32 %v1885_v63, %v1833_v31  ;;  %v2749_v31 = vand.u32 2147483648, %v2680_v52  ;;  %v1374_v63 = vsub.f32 %v5685_v34, %v5689_v32 }
 0x4ed   : > { %1994 = vst.msk [vmem:[#allocation4 + $0x48] sm:$0xff] %vm653_vm0, %v1961_v38  ;;  %v2746_v38 = vsel %vm2745_vm3, %v4332_v28, %v2742_v40  ;;  %v2750_v35 = vor.u32 1.1754944e-38, %v2749_v31  ;;  %v1436_v30 = vmul.f32 1.442695, %v1374_v63  ;;  %v2678_v28 = vld [vmem:[#allocation4] sm:$0xff] }
 0x4ee   : > { %vm2715_vm6 = vweird.f32 %v2678_v28 }
 0x4ef   : > { %v2751_v48 = vsel %vm2748_vm4, %v2750_v35, %v2746_v38  ;;  %v2721_v35 = vand.u32 2147483648, %v2678_v28 }
 0x4f2   : > { %v1578_v59 = vpop.permute.xlu2 %1577  ;;  %v5986_v31 = vpop.permute.xlu0 %2191 }
 0x4f3   : > { %v1654_v6 = vsub.f32 %v6710_v57, %v1578_v59  ;;  %v1655_v39 = vsub.f32 %v6711_v22, %v1578_v59  ;;  %v5969_v22 = vpop.eup %4337  ;;  %v6713_v59 = vld [vmem:[#allocation69_spill] sm:$0xff]  ;;  %6714 = vst [vmem:[#allocation41_spill] sm:$0xff] %v5986_v31 }
 0x4f4   : > { %v5971_v43 = vpop.eup %4339  ;;  %v1835_v57 = vmul.f32 %v6713_v59, %v1803_v23  ;;  %v6715_v23 = vld [vmem:[#allocation73_spill] sm:$0xff] }
 0x4f5   : > { %v1772_v25 = vmul.f32 1.442695, %v1654_v6  ;;  %v1774_v27 = vmul.f32 1.442695, %v1655_v39  ;;  %v1658_v59 = vsub.f32 %v6715_v23, %v5937_v10 }
 0x4f7   : > { %4341 = vpow2.f32 %v1772_v25 }
 0x4f8   : > { %4343 = vpow2.f32 %v1774_v27 }
 0x4f9   : > { %4345 = vpow2.f32 %v1436_v30  ;;  %v2683_v30 = vld [vmem:[#allocation4 + $0x28] sm:$0xff] }
 0x4fa   : > { %4347 = vrcp.f32 %v2678_v28  ;;  %vm2785_vm10 = vweird.f32 %v2683_v30 }
 0x4fb   : > { %4349 = vrcp.f32 %v2683_v30 }
 0x4fc   : > { %3202 = vperm.xlu0 %4166, %v2751_v48   ;;  %v2719_v48 = vand.u32 2147483647, %v2678_v28 }
 0x4fd   : > { %v4342_v39 = vpop.eup %4341  ;;  %1597 = vperm.xlu1 %4167, %v5756_v18  }
 0x4fe   : > { %v4344_v34 = vpop.eup %4343  ;;  %v2267_v32 = vpack.c.bf16 %v4342_v39, %v5969_v22  ;;  %vm2720_vm8 = vcmp.eq.f32.partialorder %v2719_v48, 8.507059e+37 }
 0x4ff   : > { %v2268_v52 = vpack.c.bf16 %v4344_v34, %v5971_v43  ;;  %v5976_v5 = vadd.f32 %v4344_v34, %v4342_v39  ;;  %v5978_v54 = vpop.eup %4345 }
 0x500   : > { %2474 = vmatmul.bf16.gmra.mxu3 %v2267_v32  ;;  %v4348_v18 = vpop.eup %4347 }
 0x501   : > { %2563 = vmatmul.bf16.gmra.mxu0 %v2268_v52  ;;  %v2711_v25 = vmul.f32 %v4348_v18, %v2678_v28  ;;  %vm2716_vm5 = vweird.f32 %v4348_v18  ;;  %v2722_v52 = vor.u32 1.1754944e-38, %v2721_v35  ;;  %v4350_v28 = vpop.eup %4349 }
 0x502   : > { %vm2717_vm7 = vmor %vm2715_vm6, %vm2716_vm5  ;;  %v2781_v35 = vmul.f32 %v4350_v28, %v2683_v30  ;;  %vm2786_vm9 = vweird.f32 %v4350_v28 }
 0x503   : > { %v2712_v27 = vsub.f32 1.0, %v2711_v25  ;;  %v1780_v25 = vmul.f32 1.442695, %v1658_v59  ;;  %vm2787_vm11 = vmor %vm2785_vm10, %vm2786_vm9 }
 0x505   : > { %2201 = vperm.xlu1 %4167, %v5978_v54   ;;  %v2713_v63 = vmul.f32 %v4348_v18, %v2712_v27  ;;  %4351 = vpow2.f32 %v1780_v25 }
 0x507   : > { %v2714_v38 = vadd.f32 %v4348_v18, %v2713_v63  ;;  %v6717_v63 = vld [vmem:[#allocation67_spill] sm:$0xff] }
 0x509   : > { %1902 = vadd.xlane.f32.xlu2 %v5742_v37  ;;  %v1840_v37 = vmul.f32 %v5608_v4, %v1808_v51  ;;  %v2718_v34 = vsel %vm2717_vm7, %v4348_v18, %v2714_v38  ;;  %v6718_v51 = vld [vmem:[#allocation68_spill] sm:$0xff] }
 0x50c   : > { %v1891_v6 = vpop.xlane.xlu1 %1890 }
 0x50d   : > { %v1963_v40 = vadd.f32 %v1891_v6, %v1835_v57  ;;  %v6716_v57 = vld [vmem:[#allocation74_spill] sm:$0xff] }
 0x50e   : > { %v1659_v6 = vsub.f32 %v6716_v57, %v5937_v10  ;;  %v2679_v10 = vld [vmem:[#allocation4 + $0x8] sm:$0xff] }
 0x50f   : > { %1996 = vst.msk [vmem:[#allocation4 + $0x58] sm:$0xff] %vm653_vm0, %v1963_v40  ;;  %v2723_v40 = vsel %vm2720_vm8, %v2722_v52, %v2718_v34  ;;  %v5997_v34 = vpop.permute.xlu2 %2181  ;;  %vm2729_vm14 = vweird.f32 %v2679_v10 }
 0x510   : > { %v1782_v4 = vmul.f32 1.442695, %v1659_v6  ;;  %6719 = vst [vmem:[#allocation40_spill] sm:$0xff] %v5997_v34 }
 0x512   : > { %4353 = vpow2.f32 %v1782_v4 }
 0x51d   : > { %v1906_v39 = vpop.xlane.xlu0 %1905 }
 0x51e   : > { %v1968_v32 = vadd.f32 %v1906_v39, %v1840_v37  ;;  %v2782_v39 = vsub.f32 1.0, %v2781_v35 }
 0x520   : > { %2001 = vst.msk [vmem:[#allocation4 + $0x80] sm:$0xff] %vm653_vm0, %v1968_v32  ;;  %v5999_v32 = vpop.eup %4351  ;;  %v2783_v23 = vmul.f32 %v4350_v28, %v2782_v39 }
 0x521   : > { %3192 = vperm.xlu2 %4165, %v2723_v40   ;;  %v6001_v52 = vpop.eup %4353 }
 0x524   : > { %v1583_v27 = vpop.permute.xlu1 %1582 }
 0x525   : > { %v1656_v18 = vsub.f32 %v6717_v63, %v1583_v27  ;;  %v1657_v38 = vsub.f32 %v6718_v51, %v1583_v27  ;;  %v6720_v27 = vld [vmem:[#allocation78_spill] sm:$0xff] }
 0x526   : > { %1923 = vadd.xlane.f32.xlu0 %v5902_v36  ;;  %v1804_v36 = vld [vmem:[#allocation4 + $0x60] sm:$0xff] }
 0x527   : > { %v1776_v48 = vmul.f32 1.442695, %v1656_v18  ;;  %v1778_v37 = vmul.f32 1.442695, %v1657_v38  ;;  %v1836_v63 = vmul.f32 %v6720_v27, %v1804_v36  ;;  %v2784_v18 = vadd.f32 %v4350_v28, %v2783_v23  ;;  %v6721_v36 = vld [vmem:[#allocation75_spill] sm:$0xff]  ;;  %v6722_v27 = vld [vmem:[#allocation76_spill] sm:$0xff] }
 0x528   : > { %v2791_v38 = vand.u32 2147483648, %v2683_v30 }
 0x529   : > { %4355 = vpow2.f32 %v1776_v48 }
 0x52a   : > { %4357 = vpow2.f32 %v1778_v37  ;;  %v2788_v37 = vsel %vm2787_vm11, %v4350_v28, %v2784_v18  ;;  %v2792_v39 = vor.u32 1.1754944e-38, %v2791_v38  ;;  %v2733_v28 = vand.u32 2147483647, %v2679_v10  ;;  %v2681_v18 = vld [vmem:[#allocation4 + $0x18] sm:$0xff] }
 0x52b   : > { %4359 = vrcp.f32 %v2679_v10  ;;  %vm2757_vm3 = vweird.f32 %v2681_v18 }
 0x52c   : > { %vm2734_vm1 = vcmp.eq.f32.partialorder %v2733_v28, 8.507059e+37 }
 0x52f   : > { %v4356_v59 = vpop.eup %4355  ;;  %1908 = vadd.xlane.f32.xlu1 %v5745_v55  ;;  %v2789_v55 = vand.u32 2147483647, %v2683_v30 }
 0x530   : > { %v4358_v57 = vpop.eup %4357  ;;  %v2269_v6 = vpack.c.bf16 %v5999_v32, %v4356_v59 }
 0x531   : > { %v4360_v40 = vpop.eup %4359  ;;  %v2270_v25 = vpack.c.bf16 %v6001_v52, %v4358_v57  ;;  %v6006_v4 = vadd.f32 %v4358_v57, %v4356_v59  ;;  %vm2790_vm12 = vcmp.eq.f32.partialorder %v2789_v55, 8.507059e+37 }
 0x532   : > { %2479 = vmatmul.bf16.gmra.mxu3 %v2269_v6  ;;  %v2725_v48 = vmul.f32 %v4360_v40, %v2679_v10  ;;  %v2793_v57 = vsel %vm2790_vm12, %v2792_v39, %v2788_v37  ;;  %vm2730_vm13 = vweird.f32 %v4360_v40  ;;  %v6021_v39 = vpop.permute.xlu1 %2186 }
 0x533   : > { %2568 = vmatmul.bf16.gmra.mxu0 %v2270_v25  ;;  %v1894_v51 = vpop.xlane.xlu2 %1893  ;;  %vm2731_vm15 = vmor %vm2729_vm14, %vm2730_vm13  ;;  %6723 = vst [vmem:[#allocation38_spill] sm:$0xff] %v6021_v39 }
 0x534   : > { %v1964_v35 = vadd.f32 %v1894_v51, %v1836_v63  ;;  %v2726_v59 = vsub.f32 1.0, %v2725_v48  ;;  %v2735_v51 = vand.u32 2147483648, %v2679_v10 }
 0x536   : > { %1997 = vst.msk [vmem:[#allocation4 + $0x60] sm:$0xff] %vm653_vm0, %v1964_v35  ;;  %v2727_v34 = vmul.f32 %v4360_v40, %v2726_v59  ;;  %v2736_v35 = vor.u32 1.1754944e-38, %v2735_v51  ;;  %v6023_v59 = vpop.permute.xlu0 %2206  ;;  %v6726_v51 = vld [vmem:[#allocation25_spill] sm:$0xff] }
 0x537   : > { %6724 = vst [vmem:[#allocation43_spill] sm:$0xff] %v6023_v59 }
 0x538   : > { %v2728_v30 = vadd.f32 %v4360_v40, %v2727_v34 }
 0x53a   : > { %3217 = vperm.xlu0 %4166, %v2793_v57   ;;  %v2732_v38 = vsel %vm2731_vm15, %v4360_v40, %v2728_v30  ;;  %v1806_v57 = vld [vmem:[#allocation4 + $0x70] sm:$0xff]  ;;  %v2686_v30 = vld [vmem:[#allocation4 + $0x40] sm:$0xff] }
 0x53b   : > { %v1593_v6 = vpop.permute.xlu2 %1592  ;;  %v2737_v37 = vsel %vm2734_vm1, %v2736_v35, %v2732_v38  ;;  %v2763_v35 = vand.u32 2147483648, %v2681_v18  ;;  %vm2827_vm7 = vweird.f32 %v2686_v30  ;;  %v2831_v62 = vand.u32 2147483647, %v2686_v30 }
 0x53c   : > { %v1660_v23 = vsub.f32 %v6721_v36, %v1593_v6  ;;  %v1661_v25 = vsub.f32 %v6722_v27, %v1593_v6  ;;  %v6725_v6 = vld [vmem:[#allocation85_spill] sm:$0xff] }
 0x53d   : > { %v1838_v36 = vmul.f32 %v6725_v6, %v1806_v57  ;;  %v2764_v57 = vor.u32 1.1754944e-38, %v2763_v35  ;;  %vm2832_vm9 = vcmp.eq.f32.partialorder %v2831_v62, 8.507059e+37 }
 0x53e   : > { %v1784_v31 = vmul.f32 1.442695, %v1660_v23  ;;  %v1786_v63 = vmul.f32 1.442695, %v1661_v25  ;;  %v1811_v25 = vld [vmem:[#allocation4 + $0x98] sm:$0xff] }
 0x53f   : > { %v1843_v28 = vmul.f32 %v6726_v51, %v1811_v25  ;;  %v6030_v25 = vpop.f32.mrf.mxu0 }
 0x540   : > { %4361 = vpow2.f32 %v1784_v31 }
 0x541   : > { %4363 = vpow2.f32 %v1786_v63 }
 0x542   : > { %4365 = vrcp.f32 %v2681_v18 }
 0x543   : > { %4367 = vrcp.f32 %v2686_v30 }
 0x546   : > { %v6012_v55 = vpop.eup %4361 }
 0x547   : > { %v6014_v48 = vpop.eup %4363 }
 0x548   : > { %3197 = vperm.xlu1 %4167, %v2737_v37   ;;  %v6018_v31 = vadd.f32 %v6014_v48, %v6012_v55  ;;  %v4366_v34 = vpop.eup %4365 }
 0x549   : > { %v2753_v10 = vmul.f32 %v4366_v34, %v2681_v18  ;;  %vm2758_vm2 = vweird.f32 %v4366_v34  ;;  %v4368_v6 = vpop.eup %4367 }
 0x54a   : > { %1911 = vadd.xlane.f32.xlu2 %v5801_v42  ;;  %vm2759_vm4 = vmor %vm2757_vm3, %vm2758_vm2  ;;  %vm2828_vm6 = vweird.f32 %v4368_v6 }
 0x54b   : > { %v2754_v40 = vsub.f32 1.0, %v2753_v10  ;;  %v2761_v10 = vand.u32 2147483647, %v2681_v18  ;;  %v6034_v18 = vpop.f32.mrf.mxu3  ;;  %vm2829_vm8 = vmor %vm2827_vm7, %vm2828_vm6 }
 0x54d   : > { %v2755_v23 = vmul.f32 %v4366_v34, %v2754_v40  ;;  %vm2762_vm5 = vcmp.eq.f32.partialorder %v2761_v10, 8.507059e+37 }
 0x54f   : > { %v2756_v42 = vadd.f32 %v4366_v34, %v2755_v23  ;;  %v2823_v23 = vmul.f32 %v4368_v6, %v2686_v30 }
 0x551   : > { %v2760_v40 = vsel %vm2759_vm4, %v4366_v34, %v2756_v42  ;;  %v6727_v34 = vld [vmem:[#allocation77_spill] sm:$0xff] }
 0x557   : > { %v1900_v27 = vpop.xlane.xlu1 %1899 }
 0x558   : > { %v1966_v63 = vadd.f32 %v1900_v27, %v1838_v36  ;;  %v2765_v36 = vsel %vm2762_vm5, %v2764_v57, %v2760_v40  ;;  %v2824_v27 = vsub.f32 1.0, %v2823_v23  ;;  %v6729_v40 = vld [vmem:[#allocation84_spill] sm:$0xff] }
 0x55a   : > { %1999 = vst.msk [vmem:[#allocation4 + $0x70] sm:$0xff] %vm653_vm0, %v1966_v63  ;;  %v6032_v63 = vld [vmem:[#allocation4 + $0x20] sm:$0xff]  ;;  %v2825_v51 = vmul.f32 %v4368_v6, %v2824_v27  ;;  %v2833_v27 = vand.u32 2147483648, %v2686_v30 }
 0x55b   : > { %v1915_v38 = vpop.xlane.xlu0 %1914  ;;  %4369 = vrcp.f32 %v6032_v63  ;;  %vm2771_vm11 = vweird.f32 %v6032_v63 }
 0x55c   : > { %v1971_v37 = vadd.f32 %v1915_v38, %v1843_v28  ;;  %v3384_v28 = vld [vmem:[%s4818_s27 + $0x10] sm:$0xff] }
 0x55e   : > { %2004 = vst.msk [vmem:[#allocation4 + $0x98] sm:$0xff] %vm653_vm0, %v1971_v37  ;;  %v6728_v37 = vld [vmem:[#allocation83_spill] sm:$0xff] }
 0x562   : > { %3207 = vperm.xlu2 %4165, %v2765_v36   ;;  %v2826_v36 = vadd.f32 %v4368_v6, %v2825_v51 }
 0x564   : > { %1932 = vadd.xlane.f32.xlu0 %v5956_v58  ;;  %v1916_v58 = vadd.f32 %v5851_v44, %v5849_v21  ;;  %v4370_v21 = vpop.eup %4369  ;;  %v6048_v44 = vpop.f32.mrf.mxu0  ;;  %v2830_v51 = vsel %vm2829_vm8, %v4368_v6, %v2826_v36 }
 0x565   : > { %v2767_v30 = vmul.f32 %v4370_v21, %v6032_v63  ;;  %vm2772_vm10 = vweird.f32 %v4370_v21 }
 0x566   : > { %vm2773_vm12 = vmor %vm2771_vm11, %vm2772_vm10 }
 0x56e   : > { %v3203_v38 = vpop.permute.xlu0 %3202 }
 0x56f   : > { %v3352_v42 = vmul.f32 %v3203_v38, %v6727_v34  ;;  %v1598_v35 = vpop.permute.xlu1 %1597  ;;  %v6050_v38 = vpop.permute.xlu2 %2196 }
 0x570   : > { %v1662_v10 = vsub.f32 %v6728_v37, %v1598_v35  ;;  %v1663_v57 = vsub.f32 %v6729_v40, %v1598_v35  ;;  %v6052_v34 = vpop.f32.mrf.mxu3  ;;  %v1807_v35 = vld [vmem:[#allocation4 + $0x78] sm:$0xff] }
 0x571   : > { %v3416_v23 = vadd.f32 %v3384_v28, %v3352_v42  ;;  %v2834_v28 = vor.u32 1.1754944e-38, %v2833_v27 }
 0x572   : > { %v1788_v59 = vmul.f32 1.442695, %v1662_v10  ;;  %v1790_v39 = vmul.f32 1.442695, %v1663_v57  ;;  %1917 = vadd.xlane.f32.xlu1 %v1916_v58  ;;  %v6730_v10 = vld [vmem:[#allocation24_spill] sm:$0xff] }
 0x573   : > { %3448 = vst [vmem:[%s6045_s16 + $0x10] sm:$0xff] %v3416_v23  ;;  %v2835_v42 = vsel %vm2832_vm9, %v2834_v28, %v2830_v51  ;;  %v1839_v40 = vmul.f32 %v6730_v10, %v1807_v35  ;;  %v2768_v23 = vsub.f32 1.0, %v2767_v30  ;;  %v2777_v35 = vand.u32 2147483648, %v6032_v63  ;;  %v6733_v10 = vld [vmem:[#allocation64_spill] sm:$0xff] }
 0x574   : > { %4371 = vpow2.f32 %v1788_v59  ;;  %v6057_v59 = vpop.f32.mrf.mxu0 }
 0x575   : > { %4373 = vpow2.f32 %v1790_v39  ;;  %6731 = vst [vmem:[#allocation46_spill] sm:$0xff] %v6057_v59  ;;  %v2769_v51 = vmul.f32 %v4370_v21, %v2768_v23  ;;  %v2778_v23 = vor.u32 1.1754944e-38, %v2777_v35  ;;  %v1814_v59 = vld [vmem:[#allocation4 + $0xb0] sm:$0xff] }
 0x577   : > { %v2770_v28 = vadd.f32 %v4370_v21, %v2769_v51 }
 0x578   : > { %3232 = vperm.xlu0 %4166, %v2835_v42   ;;  %v6062_v27 = vpop.f32.mrf.mxu3  ;;  %v3382_v42 = vld [vmem:[%s4818_s27] sm:$0xff] }
 0x579   : > { %6732 = vst [vmem:[#allocation45_spill] sm:$0xff] %v6062_v27  ;;  %v2689_v27 = vld [vmem:[#allocation4 + $0x58] sm:$0xff] }
 0x57a   : > { %v4372_v58 = vpop.eup %4371  ;;  %vm2869_vm4 = vweird.f32 %v2689_v27 }
 0x57b   : > { %v4374_v37 = vpop.eup %4373  ;;  %v2271_v57 = vpack.c.bf16 %v4372_v58, %v6012_v55  ;;  %v2684_v55 = vld [vmem:[#allocation4 + $0x30] sm:$0xff] }
 0x57c   : > { %v1903_v39 = vpop.xlane.xlu2 %1902  ;;  %v2272_v62 = vpack.c.bf16 %v4374_v37, %v6014_v48  ;;  %v6060_v6 = vadd.f32 %v4374_v37, %v4372_v58  ;;  %v2775_v58 = vand.u32 2147483647, %v6032_v63  ;;  %v6070_v37 = vpop.f32.mrf.mxu0  ;;  %4375 = vrcp.f32 %v2684_v55 }
 0x57d   : > { %v1967_v36 = vadd.f32 %v1903_v39, %v1839_v40  ;;  %2484 = vmatmul.bf16.gmra.mxu3 %v2271_v57  ;;  %v2774_v57 = vsel %vm2773_vm12, %v4370_v21, %v2770_v28  ;;  %v1846_v28 = vmul.f32 %v5760_v19, %v1814_v59  ;;  %4377 = vrcp.f32 %v2689_v27  ;;  %v6739_v59 = vld [vmem:[#allocation88_spill] sm:$0xff] }
 0x57e   : > { %2573 = vmatmul.bf16.gmra.mxu0 %v2272_v62  ;;  %vm2776_vm13 = vcmp.eq.f32.partialorder %v2775_v58, 8.507059e+37  ;;  %vm2799_vm15 = vweird.f32 %v2684_v55 }
 0x57f   : > { %2000 = vst.msk [vmem:[#allocation4 + $0x78] sm:$0xff] %vm653_vm0, %v1967_v36  ;;  %v2779_v62 = vsel %vm2776_vm13, %v2778_v23, %v2774_v57  ;;  %v2805_v57 = vand.u32 2147483648, %v2684_v55  ;;  %v2803_v23 = vand.u32 2147483647, %v2684_v55 }
 0x580   : > { %v6072_v39 = vpop.f32.mrf.mxu3 }
 0x581   : > { %v2806_v19 = vor.u32 1.1754944e-38, %v2805_v57  ;;  %vm2804_vm2 = vcmp.eq.f32.partialorder %v2803_v23, 8.507059e+37  ;;  %v6743_v57 = vld [vmem:[#allocation70_spill] sm:$0xff] }
 0x582   : > { %v4376_v36 = vpop.eup %4375 }
 0x583   : > { %vm2800_vm14 = vweird.f32 %v4376_v36 }
 0x584   : > { %v3193_v30 = vpop.permute.xlu2 %3192  ;;  %v6076_v51 = vpop.f32.mrf.mxu0  ;;  %vm2801_vm1 = vmor %vm2799_vm15, %vm2800_vm14 }
 0x585   : > { %v3350_v48 = vmul.f32 %v3193_v30, %v6733_v10  ;;  %6734 = vst [vmem:[#allocation50_spill] sm:$0xff] %v6076_v51  ;;  %v2795_v30 = vmul.f32 %v4376_v36, %v2684_v55 }
 0x587   : > { %v3414_v40 = vadd.f32 %v3382_v42, %v3350_v48  ;;  %v2796_v10 = vsub.f32 1.0, %v2795_v30  ;;  %v6083_v48 = vpop.permute.xlu1 %2201  ;;  %v4378_v30 = vpop.eup %4377 }
 0x588   : > { %v6078_v63 = vpop.f32.mrf.mxu3  ;;  %vm2870_vm3 = vweird.f32 %v4378_v30 }
 0x589   : > { %3446 = vst [vmem:[%s6045_s16] sm:$0xff] %v3414_v40  ;;  %v2797_v42 = vmul.f32 %v4376_v36, %v2796_v10  ;;  %vm2871_vm5 = vmor %vm2869_vm4, %vm2870_vm3 }
 0x58a   : > { %6735 = vst [vmem:[#allocation47_spill] sm:$0xff] %v6078_v63  ;;  %v3387_v63 = vld [vmem:[%s4818_s27 + $0x28] sm:$0xff] }
 0x58b   : > { %1920 = vadd.xlane.f32.xlu2 %v5858_v13  ;;  %3212 = vperm.xlu1 %4167, %v2779_v62   ;;  %v2798_v40 = vadd.f32 %v4376_v36, %v2797_v42  ;;  %v1809_v62 = vld [vmem:[#allocation4 + $0x88] sm:$0xff] }
 0x58c   : > { %v6080_v21 = vpop.f32.mrf.mxu0  ;;  %v1841_v51 = vmul.f32 %v6739_v59, %v1809_v62  ;;  %v2214_v62 = vmul.f32 0.0, %v6743_v57  ;;  %v6747_v57 = vld [vmem:[#allocation72_spill] sm:$0xff] }
 0x58d   : > { %6736 = vst [vmem:[#allocation48_spill] sm:$0xff] %v6080_v21  ;;  %v2802_v10 = vsel %vm2801_vm1, %v4376_v36, %v2798_v40  ;;  %v6741_v36 = vld [vmem:[#allocation87_spill] sm:$0xff]  ;;  %v6742_v40 = vld [vmem:[#allocation86_spill] sm:$0xff] }
 0x590   : > { %v6085_v58 = vpop.f32.mrf.mxu3 }
 0x591   : > { %6737 = vst [vmem:[#allocation55_spill] sm:$0xff] %v6085_v58 }
 0x594   : > { %v6088_v21 = vpop.f32.mrf.mxu0 }
 0x595   : > { %6738 = vst [vmem:[#allocation51_spill] sm:$0xff] %v6088_v21  ;;  %v2512_v21 = vadd.f32 %v6742_v40, %v6741_v36 }
 0x599   : > { %v1924_v35 = vpop.xlane.xlu0 %1923 }
 0x59a   : > { %v1974_v13 = vadd.f32 %v1924_v35, %v1846_v28  ;;  %v2807_v28 = vsel %vm2804_vm2, %v2806_v19, %v2802_v10  ;;  %v2865_v35 = vmul.f32 %v4378_v30, %v2689_v27 }
 0x59c   : > { %2007 = vst.msk [vmem:[#allocation4 + $0xb0] sm:$0xff] %vm653_vm0, %v1974_v13  ;;  %v6092_v13 = vpop.f32.mrf.mxu3  ;;  %v2866_v55 = vsub.f32 1.0, %v2865_v35  ;;  %v6098_v59 = vpop.f32.mrf.mxu0  ;;  %v2873_v35 = vand.u32 2147483647, %v2689_v27 }
 0x59d   : > { %6740 = vst [vmem:[#allocation53_spill] sm:$0xff] %v6092_v13 }
 0x59e   : > { %6744 = vst [vmem:[#allocation52_spill] sm:$0xff] %v6098_v59  ;;  %v2867_v23 = vmul.f32 %v4378_v30, %v2866_v55  ;;  %vm2874_vm6 = vcmp.eq.f32.partialorder %v2873_v35, 8.507059e+37  ;;  %v1810_v59 = vld [vmem:[#allocation4 + $0x90] sm:$0xff] }
 0x5a2   : > { %1941 = vadd.xlane.f32.xlu0 %v6006_v4  ;;  %v1909_v42 = vpop.xlane.xlu1 %1908  ;;  %v2584_v4 = vadd.f32 %v2512_v21, %v2214_v62  ;;  %v1925_v21 = vadd.f32 %v5894_v7, %v5891_v1  ;;  %v6748_v62 = vld [vmem:[#allocation71_spill] sm:$0xff] }
 0x5a3   : > { %v1969_v58 = vadd.f32 %v1909_v42, %v1841_v51  ;;  %3222 = vperm.xlu2 %4165, %v2807_v28   ;;  %v2868_v51 = vadd.f32 %v4378_v30, %v2867_v23  ;;  %v2685_v42 = vld [vmem:[#allocation4 + $0x38] sm:$0xff]  ;;  %v2875_v28 = vand.u32 2147483648, %v2689_v27  ;;  %v2502_v23 = vadd.f32 %v6748_v62, %v6747_v57 }
 0x5a4   : > { %v6101_v19 = vpop.f32.mrf.mxu3  ;;  %4379 = vrcp.f32 %v2685_v42  ;;  %vm2813_vm8 = vweird.f32 %v2685_v42 }
 0x5a5   : > { %2002 = vst.msk [vmem:[#allocation4 + $0x88] sm:$0xff] %vm653_vm0, %v1969_v58  ;;  %v2872_v55 = vsel %vm2871_vm5, %v4378_v30, %v2868_v51  ;;  %v2876_v40 = vor.u32 1.1754944e-38, %v2875_v28  ;;  %v3383_v30 = vld [vmem:[%s4818_s27 + $0x8] sm:$0xff]  ;;  %v1842_v28 = vmul.f32 %v5733_v9, %v1810_v59 }
 0x5a6   : > { %6745 = vst [vmem:[#allocation58_spill] sm:$0xff] %v6101_v19 }
 0x5aa   : > { %v4380_v27 = vpop.eup %4379 }
 0x5ab   : > { %v2809_v19 = vmul.f32 %v4380_v27, %v2685_v42  ;;  %vm2814_vm7 = vweird.f32 %v4380_v27 }
 0x5ac   : > { %v3218_v10 = vpop.permute.xlu0 %3217  ;;  %vm2815_vm9 = vmor %vm2813_vm8, %vm2814_vm7 }
 0x5ad   : > { %v3355_v13 = vmul.f32 %v3218_v10, %v2584_v4  ;;  %v6750_v4 = vld [vmem:[#allocation49_spill] sm:$0xff] }
 0x5ae   : > { %v2210_v10 = vmul.f32 0.0, %v6750_v4  ;;  %v6751_v4 = vld [vmem:[#allocation80_spill] sm:$0xff] }
 0x5af   : > { %v3419_v58 = vadd.f32 %v3387_v63, %v3355_v13  ;;  %v2877_v13 = vsel %vm2874_vm6, %v2876_v40, %v2872_v55  ;;  %v2238_v55 = vmul.f32 0.0, %v6050_v38 }
 0x5b0   : > { %v6104_v36 = vpop.f32.mrf.mxu0 }
 0x5b1   : > { %3451 = vst [vmem:[%s6045_s16 + $0x28] sm:$0xff] %v3419_v58  ;;  %v2580_v58 = vadd.f32 %v2502_v23, %v2210_v10  ;;  %v6752_v23 = vld [vmem:[#allocation79_spill] sm:$0xff] }
 0x5b2   : > { %6746 = vst [vmem:[#allocation56_spill] sm:$0xff] %v6104_v36  ;;  %v2507_v10 = vadd.f32 %v6752_v23, %v6751_v4  ;;  %v2692_v4 = vld [vmem:[#allocation4 + $0x70] sm:$0xff] }
 0x5b3   : > { %vm2911_vm1 = vweird.f32 %v2692_v4 }
 0x5b5   : > { %1926 = vadd.xlane.f32.xlu1 %v1925_v21  ;;  %v6110_v63 = vpop.f32.mrf.mxu3 }
 0x5b6   : > { %6749 = vst [vmem:[#allocation57_spill] sm:$0xff] %v6110_v63  ;;  %3247 = vperm.xlu0 %4166, %v2877_v13   ;;  %v2810_v13 = vsub.f32 1.0, %v2809_v19  ;;  %v2819_v19 = vand.u32 2147483648, %v2685_v42 }
 0x5b8   : > { %v2571_v7 = vpop.f32.mrf.mxu0  ;;  %v2811_v59 = vmul.f32 %v4380_v27, %v2810_v13  ;;  %v1817_v13 = vld [vmem:[#allocation4 + $0xc8] sm:$0xff] }
 0x5b9   : > { %v1849_v23 = vmul.f32 %v5809_v46, %v1817_v13 }
 0x5ba   : > { %v3198_v51 = vpop.permute.xlu1 %3197 }
 0x5bb   : > { %v3351_v1 = vmul.f32 %v3198_v51, %v2580_v58  ;;  %v6753_v58 = vld [vmem:[#allocation54_spill] sm:$0xff]  ;;  %v2687_v51 = vld [vmem:[#allocation4 + $0x48] sm:$0xff] }
 0x5bc   : > { %v2212_v9 = vmul.f32 0.0, %v6753_v58  ;;  %4381 = vrcp.f32 %v2687_v51  ;;  %vm2841_vm12 = vweird.f32 %v2687_v51 }
 0x5bd   : > { %v3415_v35 = vadd.f32 %v3383_v30, %v3351_v1  ;;  %v1912_v21 = vpop.xlane.xlu2 %1911  ;;  %v2482_v57 = vpop.f32.mrf.mxu3  ;;  %v3385_v1 = vld [vmem:[%s4818_s27 + $0x18] sm:$0xff]  ;;  %4383 = vrcp.f32 %v2692_v4 }
 0x5be   : > { %v1970_v40 = vadd.f32 %v1912_v21, %v1842_v28  ;;  %v2572_v62 = vadd.f32 %v2571_v7, %v2482_v57  ;;  %v2582_v30 = vadd.f32 %v2507_v10, %v2212_v9  ;;  %v2812_v28 = vadd.f32 %v4380_v27, %v2811_v59  ;;  %v2695_v9 = vld [vmem:[#allocation4 + $0x88] sm:$0xff] }
 0x5bf   : > { %3447 = vst [vmem:[%s6045_s16 + $0x8] sm:$0xff] %v3415_v35  ;;  %v2817_v35 = vand.u32 2147483647, %v2685_v42  ;;  %v2820_v57 = vor.u32 1.1754944e-38, %v2819_v19  ;;  %v2847_v59 = vand.u32 2147483648, %v2687_v51  ;;  %4385 = vrcp.f32 %v2695_v9 }
 0x5c0   : > { %2003 = vst.msk [vmem:[#allocation4 + $0x90] sm:$0xff] %vm653_vm0, %v1970_v40  ;;  %v6120_v36 = vadd.f32 %v2572_v62, %v2238_v55  ;;  %v2816_v21 = vsel %vm2815_vm9, %v4380_v27, %v2812_v28  ;;  %v1812_v28 = vld [vmem:[#allocation4 + $0xa0] sm:$0xff]  ;;  %vm2953_vm5 = vweird.f32 %v2695_v9 }
 0x5c1   : > { %vm2818_vm10 = vcmp.eq.f32.partialorder %v2817_v35, 8.507059e+37  ;;  %v2848_v46 = vor.u32 1.1754944e-38, %v2847_v59 }
 0x5c2   : > { %v4382_v55 = vpop.eup %4381  ;;  %v2821_v40 = vsel %vm2818_vm10, %v2820_v57, %v2816_v21  ;;  %v6754_v57 = vld [vmem:[#allocation27_spill] sm:$0xff] }
 0x5c3   : > { %v2837_v62 = vmul.f32 %v4382_v55, %v2687_v51  ;;  %vm2842_vm11 = vweird.f32 %v4382_v55 }
 0x5c4   : > { %vm2843_vm13 = vmor %vm2841_vm12, %vm2842_vm11 }
 0x5c5   : > { %v3208_v63 = vpop.permute.xlu2 %3207 }
 0x5c6   : > { %v3353_v38 = vmul.f32 %v3208_v63, %v2582_v30  ;;  %v2838_v63 = vsub.f32 1.0, %v2837_v62  ;;  %v2845_v30 = vand.u32 2147483647, %v2687_v51 }
 0x5c8   : > { %v3417_v7 = vadd.f32 %v3385_v1, %v3353_v38  ;;  %v2839_v42 = vmul.f32 %v4382_v55, %v2838_v63  ;;  %vm2846_vm14 = vcmp.eq.f32.partialorder %v2845_v30, 8.507059e+37  ;;  %v6756_v63 = vld [vmem:[#allocation26_spill] sm:$0xff] }
 0x5ca   : > { %3449 = vst [vmem:[%s6045_s16 + $0x18] sm:$0xff] %v3417_v7  ;;  %v2840_v27 = vadd.f32 %v4382_v55, %v2839_v42  ;;  %v1844_v7 = vmul.f32 %v5770_v60, %v1812_v28 }
 0x5cc   : > { %1929 = vadd.xlane.f32.xlu2 %v5915_v33  ;;  %v4384_v33 = vpop.eup %4383  ;;  %v2844_v1 = vsel %vm2843_vm13, %v4382_v55, %v2840_v27 }
 0x5cd   : > { %v2907_v38 = vmul.f32 %v4384_v33, %v2692_v4  ;;  %v2849_v19 = vsel %vm2846_vm14, %v2848_v46, %v2844_v1  ;;  %v4386_v21 = vpop.eup %4385  ;;  %vm2912_vm15 = vweird.f32 %v4384_v33  ;;  %v2917_v1 = vand.u32 2147483648, %v2692_v4 }
 0x5ce   : > { %3227 = vperm.xlu1 %4167, %v2821_v40   ;;  %v6755_v40 = vld [vmem:[#allocation33_spill] sm:$0xff]  ;;  %vm2913_vm2 = vmor %vm2911_vm1, %vm2912_vm15  ;;  %vm2954_vm4 = vweird.f32 %v4386_v21 }
 0x5cf   : > { %v2908_v35 = vsub.f32 1.0, %v2907_v38  ;;  %v2520_v62 = vadd.f32 %v6755_v40, %v6754_v57  ;;  %v2915_v38 = vand.u32 2147483647, %v2692_v4  ;;  %v1934_v4 = vadd.f32 %v5971_v43, %v5969_v22  ;;  %vm2955_vm6 = vmor %vm2953_vm5, %vm2954_vm4 }
 0x5d1   : > { %v2909_v55 = vmul.f32 %v4384_v33, %v2908_v35  ;;  %v6136_v35 = vld [vmem:[#allocation4 + $0x50] sm:$0xff]  ;;  %vm2916_vm3 = vcmp.eq.f32.partialorder %v2915_v38, 8.507059e+37 }
 0x5d2   : > { %vm2855_vm13 = vweird.f32 %v6136_v35 }
 0x5d3   : > { %v2910_v59 = vadd.f32 %v4384_v33, %v2909_v55 }
 0x5d5   : > { %v2914_v28 = vsel %vm2913_vm2, %v4384_v33, %v2910_v59  ;;  %v2957_v33 = vand.u32 2147483647, %v2695_v9 }
 0x5d7   : > { %v1933_v10 = vpop.xlane.xlu0 %1932  ;;  %vm2958_vm7 = vcmp.eq.f32.partialorder %v2957_v33, 8.507059e+37 }
 0x5d8   : > { %v1977_v58 = vadd.f32 %v1933_v10, %v1849_v23  ;;  %v2949_v23 = vmul.f32 %v4386_v21, %v2695_v9 }
 0x5da   : > { %2010 = vst.msk [vmem:[#allocation4 + $0xc8] sm:$0xff] %vm653_vm0, %v1977_v58  ;;  %v3390_v58 = vld [vmem:[%s4818_s27 + $0x40] sm:$0xff]  ;;  %v2950_v60 = vsub.f32 1.0, %v2949_v23 }
 0x5e0   : > { %1950 = vadd.xlane.f32.xlu0 %v6060_v6  ;;  %v2217_v6 = vmul.f32 0.0, %v6756_v63 }
 0x5e2   : > { %v2587_v10 = vadd.f32 %v2520_v62, %v2217_v6  ;;  %v2959_v62 = vand.u32 2147483648, %v2695_v9 }
 0x5e4   : > { %3237 = vperm.xlu2 %4165, %v2849_v19   ;;  %v2951_v19 = vmul.f32 %v4386_v21, %v2950_v60  ;;  %v2960_v6 = vor.u32 1.1754944e-38, %v2959_v62  ;;  %v2239_v62 = vmul.f32 0.0, %v6083_v48 }
 0x5e5   : > { %v1918_v51 = vpop.xlane.xlu1 %1917 }
 0x5e6   : > { %v1972_v13 = vadd.f32 %v1918_v51, %v1844_v7  ;;  %v2918_v7 = vor.u32 1.1754944e-38, %v2917_v1  ;;  %v2952_v40 = vadd.f32 %v4386_v21, %v2951_v19 }
 0x5e8   : > { %2005 = vst.msk [vmem:[#allocation4 + $0xa0] sm:$0xff] %vm653_vm0, %v1972_v13  ;;  %v2919_v57 = vsel %vm2916_vm3, %v2918_v7, %v2914_v28  ;;  %v2956_v63 = vsel %vm2955_vm6, %v4386_v21, %v2952_v40 }
 0x5ea   : > { %v3233_v42 = vpop.permute.xlu0 %3232 }
 0x5eb   : > { %v3358_v27 = vmul.f32 %v3233_v42, %v2587_v10  ;;  %v1813_v10 = vld [vmem:[#allocation4 + $0xa8] sm:$0xff] }
 0x5ec   : > { %v1845_v22 = vmul.f32 %v5794_v45, %v1813_v10 }
 0x5ed   : > { %v3422_v30 = vadd.f32 %v3390_v58, %v3358_v27  ;;  %v2961_v58 = vsel %vm2958_vm7, %v2960_v6, %v2956_v63  ;;  %v3386_v27 = vld [vmem:[%s4818_s27 + $0x20] sm:$0xff] }
 0x5ee   : > { %v2690_v6 = vld [vmem:[#allocation4 + $0x60] sm:$0xff] }
 0x5ef   : > { %3454 = vst [vmem:[%s6045_s16 + $0x40] sm:$0xff] %v3422_v30  ;;  %v2698_v46 = vld [vmem:[#allocation4 + $0xa0] sm:$0xff]  ;;  %v6757_v30 = vld [vmem:[#allocation81_spill] sm:$0xff]  ;;  %vm2883_vm2 = vweird.f32 %v2690_v6 }
 0x5f0   : > { %4387 = vrcp.f32 %v2698_v46  ;;  %v3001_v60 = vand.u32 2147483648, %v2698_v46  ;;  %vm2995_vm9 = vweird.f32 %v2698_v46  ;;  %v2999_v38 = vand.u32 2147483647, %v2698_v46 }
 0x5f1   : > { %4389 = vrcp.f32 %v6136_v35 }
 0x5f2   : > { %vm3000_vm11 = vcmp.eq.f32.partialorder %v2999_v38, 8.507059e+37  ;;  %4391 = vrcp.f32 %v2690_v6 }
 0x5f4   : > { %3262 = vperm.xlu0 %4166, %v2919_v57  }
 0x5f6   : > { %v4388_v51 = vpop.eup %4387 }
 0x5f7   : > { %v2991_v13 = vmul.f32 %v4388_v51, %v2698_v46  ;;  %v4390_v23 = vpop.eup %4389  ;;  %vm2996_vm8 = vweird.f32 %v4388_v51 }
 0x5f8   : > { %1935 = vadd.xlane.f32.xlu1 %v1934_v4  ;;  %v2851_v9 = vmul.f32 %v4390_v23, %v6136_v35  ;;  %vm2997_vm10 = vmor %vm2995_vm9, %vm2996_vm8  ;;  %v3002_v4 = vor.u32 1.1754944e-38, %v3001_v60  ;;  %vm2856_vm12 = vweird.f32 %v4390_v23 }
 0x5f9   : > { %v2992_v55 = vsub.f32 1.0, %v2991_v13  ;;  %vm2857_vm14 = vmor %vm2855_vm13, %vm2856_vm12 }
 0x5fa   : > { %v2852_v33 = vsub.f32 1.0, %v2851_v9 }
 0x5fb   : > { %v2993_v42 = vmul.f32 %v4388_v51, %v2992_v55  ;;  %v2574_v19 = vpop.f32.mrf.mxu0  ;;  %v3388_v55 = vld [vmem:[%s4818_s27 + $0x30] sm:$0xff] }
 0x5fc   : > { %3277 = vperm.xlu0 %4166, %v2961_v58   ;;  %v2853_v46 = vmul.f32 %v4390_v23, %v2852_v33  ;;  %v6758_v58 = vld [vmem:[#allocation44_spill] sm:$0xff]  ;;  %v1815_v33 = vld [vmem:[#allocation4 + $0xb8] sm:$0xff] }
 0x5fd   : > { %v3213_v59 = vpop.permute.xlu1 %3212  ;;  %v2994_v43 = vadd.f32 %v4388_v51, %v2993_v42 }
 0x5fe   : > { %v3354_v21 = vmul.f32 %v3213_v59, %v6757_v30  ;;  %v1921_v1 = vpop.xlane.xlu2 %1920  ;;  %v2854_v42 = vadd.f32 %v4390_v23, %v2853_v46  ;;  %v2859_v59 = vand.u32 2147483647, %v6136_v35  ;;  %v1820_v30 = vld [vmem:[#allocation4 + $0xe0] sm:$0xff] }
 0x5ff   : > { %v1973_v28 = vadd.f32 %v1921_v1, %v1845_v22  ;;  %v2998_v40 = vsel %vm2997_vm10, %v4388_v51, %v2994_v43  ;;  %v4392_v43 = vpop.eup %4391  ;;  %v1852_v1 = vmul.f32 %v5873_v41, %v1820_v30  ;;  %v6763_v30 = vld [vmem:[#allocation31_spill] sm:$0xff] }
 0x600   : > { %v3418_v7 = vadd.f32 %v3386_v27, %v3354_v21  ;;  %v2485_v57 = vpop.f32.mrf.mxu3  ;;  %v3003_v13 = vsel %vm3000_vm11, %v3002_v4, %v2998_v40  ;;  %v2861_v27 = vand.u32 2147483648, %v6136_v35  ;;  %v2858_v22 = vsel %vm2857_vm14, %v4390_v23, %v2854_v42 }
 0x601   : > { %2006 = vst.msk [vmem:[#allocation4 + $0xa8] sm:$0xff] %vm653_vm0, %v1973_v28  ;;  %v2575_v45 = vadd.f32 %v2574_v19, %v2485_v57  ;;  %vm2860_vm15 = vcmp.eq.f32.partialorder %v2859_v59, 8.507059e+37  ;;  %v2879_v21 = vmul.f32 %v4392_v43, %v2690_v6  ;;  %vm2884_vm1 = vweird.f32 %v4392_v43 }
 0x602   : > { %3450 = vst [vmem:[%s6045_s16 + $0x20] sm:$0xff] %v3418_v7  ;;  %v2862_v60 = vor.u32 1.1754944e-38, %v2861_v27  ;;  %v2887_v23 = vand.u32 2147483647, %v2690_v6  ;;  %vm2885_vm3 = vmor %vm2883_vm2, %vm2884_vm1 }
 0x603   : > { %v6148_v63 = vadd.f32 %v2575_v45, %v2239_v62  ;;  %v2880_v28 = vsub.f32 1.0, %v2879_v21  ;;  %v6759_v62 = vld [vmem:[#allocation42_spill] sm:$0xff] }
 0x604   : > { %3292 = vperm.xlu0 %4166, %v3003_v13   ;;  %v2863_v9 = vsel %vm2860_vm15, %v2862_v60, %v2858_v22  ;;  %v6760_v45 = vld [vmem:[#allocation34_spill] sm:$0xff]  ;;  %vm2888_vm4 = vcmp.eq.f32.partialorder %v2887_v23, 8.507059e+37  ;;  %v6761_v13 = vld [vmem:[#allocation89_spill] sm:$0xff]  ;;  %v1943_v60 = vadd.f32 %v6001_v52, %v5999_v32 }
 0x605   : > { %v2881_v7 = vmul.f32 %v4392_v43, %v2880_v28  ;;  %v2527_v4 = vadd.f32 %v6760_v45, %v6759_v62  ;;  %v2220_v46 = vmul.f32 0.0, %v6761_v13  ;;  %v6166_v22 = vld [vmem:[#allocation4 + $0x68] sm:$0xff]  ;;  %v6173_v28 = vld [vmem:[#allocation4 + $0x80] sm:$0xff]  ;;  %v3389_v45 = vld [vmem:[%s4818_s27 + $0x38] sm:$0xff] }
 0x606   : > { %v3223_v10 = vpop.permute.xlu2 %3222  ;;  %vm2897_vm10 = vweird.f32 %v6166_v22  ;;  %vm2939_vm14 = vweird.f32 %v6173_v28 }
 0x607   : > { %v3356_v51 = vmul.f32 %v3223_v10, %v6758_v58  ;;  %v2882_v35 = vadd.f32 %v4392_v43, %v2881_v7  ;;  %v1847_v10 = vmul.f32 %v5824_v8, %v1815_v33  ;;  %v3393_v58 = vld [vmem:[%s4818_s27 + $0x58] sm:$0xff]  ;;  %v6764_v7 = vld [vmem:[#allocation66_spill] sm:$0xff] }
 0x609   : > { %v3420_v48 = vadd.f32 %v3388_v55, %v3356_v51  ;;  %v2886_v57 = vsel %vm2885_vm3, %v4392_v43, %v2882_v35  ;;  %v2590_v55 = vadd.f32 %v2527_v4, %v2220_v46  ;;  %v2216_v35 = vmul.f32 0.0, %v6764_v7  ;;  %v6765_v46 = vld [vmem:[#allocation29_spill] sm:$0xff] }
 0x60b   : > { %3452 = vst [vmem:[%s6045_s16 + $0x30] sm:$0xff] %v3420_v48 }
 0x60d   : > { %1938 = vadd.xlane.f32.xlu2 %v5976_v5  ;;  %v2889_v5 = vand.u32 2147483648, %v2690_v6 }
 0x60f   : > { %v2890_v40 = vor.u32 1.1754944e-38, %v2889_v5 }
 0x611   : > { %3242 = vperm.xlu1 %4167, %v2863_v9   ;;  %v2891_v41 = vsel %vm2888_vm4, %v2890_v40, %v2886_v57  ;;  %v6762_v9 = vld [vmem:[#allocation32_spill] sm:$0xff] }
 0x612   : > { %v2517_v21 = vadd.f32 %v6763_v30, %v6762_v9  ;;  %v6192_v9 = vld [vmem:[#allocation4 + $0x78] sm:$0xff]  ;;  %v3391_v30 = vld [vmem:[%s4818_s27 + $0x48] sm:$0xff] }
 0x614   : > { %v2586_v40 = vadd.f32 %v2517_v21, %v2216_v35 }
 0x615   : > { %v1942_v38 = vpop.xlane.xlu0 %1941 }
 0x616   : > { %v1980_v19 = vadd.f32 %v1942_v38, %v1852_v1  ;;  %v1816_v1 = vld [vmem:[#allocation4 + $0xc0] sm:$0xff] }
 0x617   : > { %v1848_v23 = vmul.f32 %v5860_v50, %v1816_v1 }
 0x618   : > { %2013 = vst.msk [vmem:[#allocation4 + $0xe0] sm:$0xff] %vm653_vm0, %v1980_v19 }
 0x625   : > { %3252 = vperm.xlu2 %4165, %v2891_v41  }
 0x628   : > { %v3248_v51 = vpop.permute.xlu0 %3247  ;;  %v1927_v48 = vpop.xlane.xlu1 %1926 }
 0x629   : > { %v3361_v6 = vmul.f32 %v3248_v51, %v2590_v55  ;;  %v1975_v42 = vadd.f32 %v1927_v48, %v1847_v10  ;;  %v6766_v55 = vld [vmem:[#allocation28_spill] sm:$0xff] }
 0x62a   : > { %v2522_v10 = vadd.f32 %v6766_v55, %v6765_v46  ;;  %v6224_v55 = vld [vmem:[#allocation4 + $0xc8] sm:$0xff] }
 0x62b   : > { %v3425_v27 = vadd.f32 %v3393_v58, %v3361_v6  ;;  %2008 = vst.msk [vmem:[#allocation4 + $0xb8] sm:$0xff] %vm653_vm0, %v1975_v42  ;;  %v6767_v6 = vld [vmem:[#allocation82_spill] sm:$0xff] }
 0x62c   : > { %v2218_v42 = vmul.f32 0.0, %v6767_v6 }
 0x62d   : > { %3457 = vst [vmem:[%s6045_s16 + $0x58] sm:$0xff] %v3425_v27 }
 0x632   : > { %v2701_v59 = vld [vmem:[#allocation4 + $0xb8] sm:$0xff] }
 0x633   : > { %4393 = vrcp.f32 %v2701_v59  ;;  %v3043_v5 = vand.u32 2147483648, %v2701_v59  ;;  %v3041_v32 = vand.u32 2147483647, %v2701_v59  ;;  %vm3037_vm6 = vweird.f32 %v2701_v59 }
 0x634   : > { %4395 = vrcp.f32 %v6166_v22 }
 0x635   : > { %4397 = vrcp.f32 %v6173_v28  ;;  %v3044_v50 = vor.u32 1.1754944e-38, %v3043_v5  ;;  %vm3042_vm8 = vcmp.eq.f32.partialorder %v3041_v32, 8.507059e+37  ;;  %v2903_v32 = vand.u32 2147483648, %v6166_v22 }
 0x639   : > { %v4394_v43 = vpop.eup %4393 }
 0x63a   : > { %v3033_v8 = vmul.f32 %v4394_v43, %v2701_v59  ;;  %v6175_v19 = vpop.eup %4395  ;;  %vm3038_vm5 = vweird.f32 %v4394_v43  ;;  %v6187_v59 = vld [vmem:[#allocation4 + $0x98] sm:$0xff] }
 0x63b   : > { %1944 = vadd.xlane.f32.xlu1 %v1943_v60  ;;  %v2893_v33 = vmul.f32 %v6175_v19, %v6166_v22  ;;  %vm3039_vm7 = vmor %vm3037_vm6, %vm3038_vm5  ;;  %v6189_v60 = vpop.eup %4397  ;;  %4399 = vrcp.f32 %v6187_v59  ;;  %vm2898_vm9 = vweird.f32 %v6175_v19  ;;  %vm2981_vm3 = vweird.f32 %v6187_v59 }
 0x63c   : > { %v3034_v38 = vsub.f32 1.0, %v3033_v8  ;;  %v2588_v8 = vadd.f32 %v2522_v10, %v2218_v42  ;;  %4401 = vrcp.f32 %v6192_v9  ;;  %vm2899_vm11 = vmor %vm2897_vm10, %vm2898_vm9  ;;  %vm2940_vm13 = vweird.f32 %v6189_v60  ;;  %v6235_v42 = vld [vmem:[#allocation4 + $0xa8] sm:$0xff] }
 0x63d   : > { %v2894_v27 = vsub.f32 1.0, %v2893_v33  ;;  %vm2941_vm15 = vmor %vm2939_vm14, %vm2940_vm13  ;;  %vm2925_vm6 = vweird.f32 %v6192_v9 }
 0x63e   : > { %v3035_v57 = vmul.f32 %v4394_v43, %v3034_v38  ;;  %v2935_v38 = vmul.f32 %v6189_v60, %v6173_v28 }
 0x63f   : > { %v1930_v52 = vpop.xlane.xlu2 %1929  ;;  %v2895_v1 = vmul.f32 %v6175_v19, %v2894_v27 }
 0x640   : > { %v1976_v62 = vadd.f32 %v1930_v52, %v1848_v23  ;;  %v3228_v4 = vpop.permute.xlu1 %3227  ;;  %v3036_v41 = vadd.f32 %v4394_v43, %v3035_v57  ;;  %v2936_v5 = vsub.f32 1.0, %v2935_v38  ;;  %v6203_v23 = vld [vmem:[#allocation4 + $0xb0] sm:$0xff]  ;;  %v2901_v52 = vand.u32 2147483647, %v6166_v22 }
 0x641   : > { %v3357_v13 = vmul.f32 %v3228_v4, %v2586_v40  ;;  %v2896_v35 = vadd.f32 %v6175_v19, %v2895_v1  ;;  %v6205_v57 = vpop.eup %4399  ;;  %v6211_v40 = vld [vmem:[#allocation4 + $0x90] sm:$0xff]  ;;  %4403 = vrcp.f32 %v6203_v23 }
 0x642   : > { %2009 = vst.msk [vmem:[#allocation4 + $0xc0] sm:$0xff] %vm653_vm0, %v1976_v62  ;;  %v3040_v58 = vsel %vm3039_vm7, %v4394_v43, %v3036_v41  ;;  %v6213_v62 = vpop.eup %4401  ;;  %v2937_v41 = vmul.f32 %v6189_v60, %v2936_v5  ;;  %v2977_v33 = vmul.f32 %v6205_v57, %v6187_v59  ;;  %4405 = vrcp.f32 %v6211_v40  ;;  %v6251_v5 = vld [vmem:[#allocation4 + $0xe0] sm:$0xff] }
 0x643   : > { %v3421_v51 = vadd.f32 %v3389_v45, %v3357_v13  ;;  %v3045_v48 = vsel %vm3042_vm8, %v3044_v50, %v3040_v58  ;;  %v1823_v45 = vld [vmem:[#allocation4 + $0xf8] sm:$0xff]  ;;  %v2900_v4 = vsel %vm2899_vm11, %v6175_v19, %v2896_v35  ;;  %vm2902_vm12 = vcmp.eq.f32.partialorder %v2901_v52, 8.507059e+37 }
 0x644   : > { %3307 = vperm.xlu0 %4166, %v3045_v48   ;;  %v1855_v22 = vmul.f32 %v5922_v3, %v1823_v45  ;;  %v2921_v13 = vmul.f32 %v6213_v62, %v6192_v9  ;;  %v2938_v19 = vadd.f32 %v6189_v60, %v2937_v41  ;;  %v2978_v58 = vsub.f32 1.0, %v2977_v33 }
 0x645   : > { %3453 = vst [vmem:[%s6045_s16 + $0x38] sm:$0xff] %v3421_v51  ;;  %v2945_v48 = vand.u32 2147483648, %v6173_v28  ;;  %v2943_v3 = vand.u32 2147483647, %v6173_v28  ;;  %4407 = vrcp.f32 %v6224_v55  ;;  %vm2982_vm2 = vweird.f32 %v6205_v57 }
 0x646   : > { %v2922_v6 = vsub.f32 1.0, %v2921_v13  ;;  %4409 = vrcp.f32 %v6235_v42  ;;  %v2985_v52 = vand.u32 2147483647, %v6187_v59  ;;  %vm2926_vm4 = vweird.f32 %v6213_v62  ;;  %vm6262_vm5 = vmor %vm2981_vm3, %vm2982_vm2 }
 0x647   : > { %v3238_v21 = vpop.permute.xlu2 %3237  ;;  %v6228_v51 = vpop.eup %4403  ;;  %vm2944_vm1 = vcmp.eq.f32.partialorder %v2943_v3, 8.507059e+37  ;;  %4411 = vrcp.f32 %v6251_v5  ;;  %vm6278_vm7 = vmor %vm2925_vm6, %vm2926_vm4  ;;  %vm3023_vm11 = vweird.f32 %v6203_v23  ;;  %vm2967_vm14 = vweird.f32 %v6211_v40 }
 0x648   : > { %v3359_v43 = vmul.f32 %v3238_v21, %v2588_v8  ;;  %v6237_v27 = vpop.eup %4405  ;;  %v2942_v8 = vsel %vm2941_vm15, %v6189_v60, %v2938_v19  ;;  %v3019_v21 = vmul.f32 %v6228_v51, %v6203_v23  ;;  %v2923_v28 = vmul.f32 %v6213_v62, %v2922_v6  ;;  %v6772_v6 = vld [vmem:[#allocation35_spill] sm:$0xff] }
 0x649   : > { %v2963_v1 = vmul.f32 %v6237_v27, %v6211_v40  ;;  %v6258_v41 = vld [vmem:[#allocation4 + $0xc0] sm:$0xff]  ;;  %vm2986_vm8 = vcmp.eq.f32.partialorder %v2985_v52, 8.507059e+37  ;;  %vm3024_vm10 = vweird.f32 %v6228_v51  ;;  %v3027_v52 = vand.u32 2147483647, %v6203_v23 }
 0x64a   : > { %v3423_v7 = vadd.f32 %v3391_v30, %v3359_v43  ;;  %v2979_v30 = vmul.f32 %v6205_v57, %v2978_v58  ;;  %v2946_v43 = vor.u32 1.1754944e-38, %v2945_v48  ;;  %v3020_v35 = vsub.f32 1.0, %v3019_v21  ;;  %v1818_v48 = vld [vmem:[#allocation4 + $0xd0] sm:$0xff]  ;;  %vm6307_vm13 = vmor %vm3023_vm11, %vm3024_vm10 }
 0x64b   : > { %v2924_v45 = vadd.f32 %v6213_v62, %v2923_v28  ;;  %4413 = vrcp.f32 %v6258_v41  ;;  %v1850_v21 = vmul.f32 %v5889_v0, %v1818_v48  ;;  %vm3065_vm4 = vweird.f32 %v6224_v55 }
 0x64c   : > { %3455 = vst [vmem:[%s6045_s16 + $0x48] sm:$0xff] %v3423_v7  ;;  %v2947_v38 = vsel %vm2944_vm1, %v2946_v43, %v2942_v8  ;;  %v6247_v7 = vpop.eup %4407  ;;  %v2980_v60 = vadd.f32 %v6205_v57, %v2979_v30  ;;  %vm3028_vm1 = vcmp.eq.f32.partialorder %v3027_v52, 8.507059e+37 }
 0x64d   : > { %v6260_v33 = vpop.eup %4409  ;;  %v3061_v13 = vmul.f32 %v6247_v7, %v6224_v55  ;;  %vm3066_vm2 = vweird.f32 %v6247_v7 }
 0x64e   : > { %1947 = vadd.xlane.f32.xlu2 %v6018_v31  ;;  %v2904_v31 = vor.u32 1.1754944e-38, %v2903_v32  ;;  %v2987_v32 = vand.u32 2147483648, %v6187_v59  ;;  %v2984_v59 = vsel %vm6262_vm5, %v6205_v57, %v2980_v60  ;;  %v2928_v57 = vsel %vm6278_vm7, %v6213_v62, %v2924_v45  ;;  %v6295_v28 = vpop.eup %4411  ;;  %vm6345_vm5 = vmor %vm3065_vm4, %vm3066_vm2 }
 0x64f   : > { %v3005_v3 = vmul.f32 %v6260_v33, %v6235_v42  ;;  %v3062_v30 = vsub.f32 1.0, %v3061_v13  ;;  %v3029_v60 = vand.u32 2147483648, %v6203_v23  ;;  %v2973_v13 = vand.u32 2147483648, %v6211_v40 }
 0x650   : > { %v2905_v46 = vsel %vm2902_vm12, %v2904_v31, %v2900_v4  ;;  %v2964_v4 = vsub.f32 1.0, %v2963_v1  ;;  %v2988_v19 = vor.u32 1.1754944e-38, %v2987_v32  ;;  %vm2968_vm12 = vweird.f32 %v6237_v27 }
 0x651   : > { %v3006_v45 = vsub.f32 1.0, %v3005_v3  ;;  %v3030_v48 = vor.u32 1.1754944e-38, %v3029_v60  ;;  %vm6326_vm15 = vmor %vm2967_vm14, %vm2968_vm12  ;;  %vm3010_vm6 = vweird.f32 %v6260_v33  ;;  %vm3009_vm7 = vweird.f32 %v6235_v42 }
 0x652   : > { %vm3108_vm11 = vweird.f32 %v6295_v28  ;;  %vm3107_vm12 = vweird.f32 %v6251_v5 }
 0x653   : > { %v1951_v50 = vpop.xlane.xlu0 %1950  ;;  %vm3109_vm14 = vmor %vm3107_vm12, %vm3108_vm11 }
 0x654   : > { %v1983_v10 = vadd.f32 %v1951_v50, %v1855_v22  ;;  %3257 = vperm.xlu1 %4167, %v2905_v46   ;;  %v2931_v22 = vand.u32 2147483648, %v6192_v9  ;;  %v2929_v50 = vand.u32 2147483647, %v6192_v9  ;;  %v3021_v46 = vmul.f32 %v6228_v51, %v3020_v35  ;;  %v3396_v35 = vld [vmem:[%s4818_s27 + $0x70] sm:$0xff] }
 0x655   : > { %v2965_v9 = vmul.f32 %v6237_v27, %v2964_v4  ;;  %v6303_v4 = vpop.eup %4413 }
 0x656   : > { %2016 = vst.msk [vmem:[#allocation4 + $0xf8] sm:$0xff] %vm653_vm0, %v1983_v10  ;;  %v2535_v10 = vadd.f32 %v5837_v56, %v5841_v12  ;;  %v2223_v56 = vmul.f32 0.0, %v6772_v6  ;;  %v2989_v12 = vsel %vm2986_vm8, %v2988_v19, %v2984_v59  ;;  %v2932_v8 = vor.u32 1.1754944e-38, %v2931_v22  ;;  %vm3011_vm8 = vmor %vm3009_vm7, %vm3010_vm6 }
 0x657   : > { %vm2930_vm9 = vcmp.eq.f32.partialorder %v2929_v50, 8.507059e+37  ;;  %v3022_v43 = vadd.f32 %v6228_v51, %v3021_v46  ;;  %v2966_v0 = vadd.f32 %v6237_v27, %v2965_v9  ;;  %v3063_v59 = vmul.f32 %v6247_v7, %v3062_v30 }
 0x658   : > { %v2933_v1 = vsel %vm2930_vm9, %v2932_v8, %v2928_v57  ;;  %v2971_v50 = vand.u32 2147483647, %v6211_v40  ;;  %v3103_v46 = vmul.f32 %v6295_v28, %v6251_v5  ;;  %v2542_v19 = vadd.f32 %v5928_v11, %v5930_v14 }
 0x659   : > { %v3026_v23 = vsel %vm6307_vm13, %v6228_v51, %v3022_v43  ;;  %v2970_v40 = vsel %vm6326_vm15, %v6237_v27, %v2966_v0  ;;  %v3007_v51 = vmul.f32 %v6260_v33, %v3006_v45  ;;  %v2974_v9 = vor.u32 1.1754944e-38, %v2973_v13  ;;  %v3399_v43 = vld [vmem:[%s4818_s27 + $0x88] sm:$0xff] }
 0x65a   : > { %v3031_v14 = vsel %vm3028_vm1, %v3030_v48, %v3026_v23  ;;  %v3064_v3 = vadd.f32 %v6247_v7, %v3063_v59  ;;  %vm2972_vm3 = vcmp.eq.f32.partialorder %v2971_v50, 8.507059e+37  ;;  %v3071_v30 = vand.u32 2147483648, %v6224_v55  ;;  %v3402_v48 = vld [vmem:[%s4818_s27 + $0xa0] sm:$0xff] }
 0x65b   : > { %v2975_v27 = vsel %vm2972_vm3, %v2974_v9, %v2970_v40  ;;  %v3008_v60 = vadd.f32 %v6260_v33, %v3007_v51  ;;  %v3015_v0 = vand.u32 2147483648, %v6235_v42  ;;  %v3013_v45 = vand.u32 2147483647, %v6235_v42 }
 0x65c   : > { %3272 = vperm.xlu1 %4167, %v2947_v38   ;;  %v2593_v38 = vadd.f32 %v2535_v10, %v2223_v56  ;;  %v2226_v10 = vmul.f32 0.0, %v5827_v61  ;;  %v3047_v61 = vmul.f32 %v6303_v4, %v6258_v41  ;;  %v3104_v56 = vsub.f32 1.0, %v3103_v46 }
 0x65d   : > { %v6293_v62 = vld [vmem:[#allocation4 + $0xf8] sm:$0xff]  ;;  %v3068_v52 = vsel %vm6345_vm5, %v6247_v7, %v3064_v3  ;;  %v2550_v22 = vadd.f32 %v6030_v25, %v6034_v18  ;;  %v3072_v59 = vor.u32 1.1754944e-38, %v3071_v30  ;;  %v3012_v7 = vsel %vm3011_vm8, %v6260_v33, %v3008_v60 }
 0x65e   : > { %4415 = vrcp.f32 %v6293_v62  ;;  %v2596_v8 = vadd.f32 %v2542_v19, %v2226_v10  ;;  %v2229_v50 = vmul.f32 0.0, %v5897_v2  ;;  %v3016_v46 = vor.u32 1.1754944e-38, %v3015_v0  ;;  %v1819_v30 = vld [vmem:[#allocation4 + $0xd8] sm:$0xff] }
 0x65f   : > { %vm3014_vm10 = vcmp.eq.f32.partialorder %v3013_v45, 8.507059e+37  ;;  %v3113_v33 = vand.u32 2147483648, %v6251_v5  ;;  %v3111_v57 = vand.u32 2147483647, %v6251_v5  ;;  %vm3052_vm13 = vweird.f32 %v6303_v4 }
 0x660   : > { %v3017_v18 = vsel %vm3014_vm10, %v3016_v46, %v3012_v7  ;;  %v2599_v19 = vadd.f32 %v2550_v22, %v2229_v50  ;;  %vm3051_vm15 = vweird.f32 %v6258_v41  ;;  %vm3149_vm5 = vweird.f32 %v6293_v62 }
 0x661   : > { %v3114_v3 = vor.u32 1.1754944e-38, %v3113_v33  ;;  %vm3053_vm1 = vmor %vm3051_vm15, %vm3052_vm13  ;;  %vm3112_vm2 = vcmp.eq.f32.partialorder %v3111_v57, 8.507059e+37 }
 0x664   : > { %3287 = vperm.xlu1 %4167, %v2989_v12   ;;  %v6339_v12 = vpop.eup %4415 }
 0x665   : > { %vm3150_vm4 = vweird.f32 %v6339_v12 }
 0x666   : > { %3267 = vperm.xlu2 %4165, %v2933_v1   ;;  %v3263_v32 = vpop.permute.xlu0 %3262  ;;  %vm3151_vm6 = vmor %vm3149_vm5, %vm3150_vm4 }
 0x667   : > { %v3364_v31 = vmul.f32 %v3263_v32, %v2593_v38  ;;  %v1851_v38 = vmul.f32 %v5917_v20, %v1819_v30 }
 0x669   : > { %v3428_v58 = vadd.f32 %v3396_v35, %v3364_v31  ;;  %v3048_v35 = vsub.f32 1.0, %v3047_v61  ;;  %v3105_v31 = vmul.f32 %v6295_v28, %v3104_v56  ;;  %v3057_v61 = vand.u32 2147483648, %v6258_v41 }
 0x66b   : > { %3460 = vst [vmem:[%s6045_s16 + $0x70] sm:$0xff] %v3428_v58  ;;  %v1936_v11 = vpop.xlane.xlu1 %1935  ;;  %v3049_v23 = vmul.f32 %v6303_v4, %v3048_v35  ;;  %v3106_v10 = vadd.f32 %v6295_v28, %v3105_v31 }
 0x66c   : > { %v1978_v6 = vadd.f32 %v1936_v11, %v1850_v21  ;;  %3302 = vperm.xlu1 %4167, %v3031_v14   ;;  %v3069_v21 = vand.u32 2147483647, %v6224_v55  ;;  %v3145_v55 = vmul.f32 %v6339_v12, %v6293_v62  ;;  %v3055_v14 = vand.u32 2147483647, %v6258_v41 }
 0x66d   : > { %v3050_v40 = vadd.f32 %v6303_v4, %v3049_v23  ;;  %v3110_v11 = vsel %vm3109_vm14, %v6295_v28, %v3106_v10  ;;  %v3155_v41 = vand.u32 2147483648, %v6293_v62 }
 0x66e   : > { %2011 = vst.msk [vmem:[#allocation4 + $0xd0] sm:$0xff] %vm653_vm0, %v1978_v6  ;;  %3282 = vperm.xlu2 %4165, %v2975_v27   ;;  %v3278_v1 = vpop.permute.xlu0 %3277  ;;  %vm3070_vm9 = vcmp.eq.f32.partialorder %v3069_v21, 8.507059e+37  ;;  %v3146_v25 = vsub.f32 1.0, %v3145_v55  ;;  %v3115_v56 = vsel %vm3112_vm2, %v3114_v3, %v3110_v11  ;;  %v3058_v27 = vor.u32 1.1754944e-38, %v3057_v61  ;;  %v3392_v55 = vld [vmem:[%s4818_s27 + $0x50] sm:$0xff] }
 0x66f   : > { %v3367_v32 = vmul.f32 %v3278_v1, %v2596_v8  ;;  %v3073_v42 = vsel %vm3070_vm9, %v3072_v59, %v3068_v52  ;;  %v3054_v6 = vsel %vm3053_vm1, %v6303_v4, %v3050_v40  ;;  %vm3056_vm3 = vcmp.eq.f32.partialorder %v3055_v14, 8.507059e+37 }
 0x670   : > { %v3147_v5 = vmul.f32 %v6339_v12, %v3146_v25  ;;  %v3153_v4 = vand.u32 2147483647, %v6293_v62  ;;  %v2557_v3 = vadd.f32 %v6070_v37, %v6072_v39 }
 0x671   : > { %v3431_v13 = vadd.f32 %v3399_v43, %v3367_v32  ;;  %v3059_v43 = vsel %vm3056_vm3, %v3058_v27, %v3054_v6  ;;  %v3156_v32 = vor.u32 1.1754944e-38, %v3155_v41  ;;  %v2232_v6 = vmul.f32 0.0, %v5951_v47  ;;  %v3405_v27 = vld [vmem:[%s4818_s27 + $0xb8] sm:$0xff] }
 0x672   : > { %v3148_v28 = vadd.f32 %v6339_v12, %v3147_v5  ;;  %vm3154_vm8 = vcmp.eq.f32.partialorder %v3153_v4, 8.507059e+37 }
 0x673   : > { %3463 = vst [vmem:[%s6045_s16 + $0x88] sm:$0xff] %v3431_v13  ;;  %v6779_v13 = vld [vmem:[#allocation30_spill] sm:$0xff] }
 0x674   : > { %3317 = vperm.xlu1 %4167, %v3073_v42   ;;  %v3152_v35 = vsel %vm3151_vm6, %v6339_v12, %v3148_v28  ;;  %v3394_v42 = vld [vmem:[%s4818_s27 + $0x60] sm:$0xff] }
 0x675   : > { %v2704_v58 = vld [vmem:[#allocation4 + $0xd0] sm:$0xff]  ;;  %v3157_v22 = vsel %vm3154_vm8, %v3156_v32, %v3152_v35  ;;  %v3395_v35 = vld [vmem:[%s4818_s27 + $0x68] sm:$0xff] }
 0x676   : > { %3297 = vperm.xlu2 %4165, %v3017_v18   ;;  %v3293_v2 = vpop.permute.xlu0 %3292  ;;  %4417 = vrcp.f32 %v2704_v58  ;;  %v3085_v52 = vand.u32 2147483648, %v2704_v58  ;;  %v3083_v31 = vand.u32 2147483647, %v2704_v58  ;;  %vm3079_vm9 = vweird.f32 %v2704_v58 }
 0x677   : > { %v3370_v51 = vmul.f32 %v3293_v2, %v2599_v19 }
 0x678   : > { %v3086_v12 = vor.u32 1.1754944e-38, %v3085_v52  ;;  %vm3084_vm11 = vcmp.eq.f32.partialorder %v3083_v31, 8.507059e+37 }
 0x679   : > { %v3434_v9 = vadd.f32 %v3402_v48, %v3370_v51 }
 0x67b   : > { %3466 = vst [vmem:[%s6045_s16 + $0xa0] sm:$0xff] %v3434_v9 }
 0x67c   : > { %v4418_v8 = vpop.eup %4417  ;;  %3332 = vperm.xlu1 %4167, %v3115_v56   ;;  %v2602_v56 = vadd.f32 %v2557_v3, %v2232_v6  ;;  %v6783_v6 = vld [vmem:[#allocation47_spill] sm:$0xff] }
 0x67d   : > { %v3075_v1 = vmul.f32 %v4418_v8, %v2704_v58  ;;  %vm3080_vm7 = vweird.f32 %v4418_v8 }
 0x67e   : > { %3312 = vperm.xlu2 %4165, %v3059_v43   ;;  %vm3081_vm10 = vmor %vm3079_vm9, %vm3080_vm7  ;;  %v1822_v43 = vld [vmem:[#allocation4 + $0xf0] sm:$0xff] }
 0x67f   : > { %v3076_v21 = vsub.f32 1.0, %v3075_v1  ;;  %v1854_v1 = vmul.f32 %v5978_v54, %v1822_v43 }
 0x680   : > { %v1939_v60 = vpop.xlane.xlu2 %1938 }
 0x681   : > { %v1979_v0 = vadd.f32 %v1939_v60, %v1851_v38  ;;  %v3077_v45 = vmul.f32 %v4418_v8, %v3076_v21 }
 0x683   : > { %2012 = vst.msk [vmem:[#allocation4 + $0xd8] sm:$0xff] %vm653_vm0, %v1979_v0  ;;  %v3243_v62 = vpop.permute.xlu1 %3242  ;;  %v3078_v20 = vadd.f32 %v4418_v8, %v3077_v45 }
 0x684   : > { %v3360_v59 = vmul.f32 %v3243_v62, %v6779_v13  ;;  %3347 = vperm.xlu1 %4167, %v3157_v22  }
 0x685   : > { %v3082_v7 = vsel %vm3081_vm10, %v4418_v8, %v3078_v20 }
 0x686   : > { %v3424_v23 = vadd.f32 %v3392_v55, %v3360_v59  ;;  %v3087_v50 = vsel %vm3084_vm11, %v3086_v12, %v3082_v7  ;;  %v3397_v55 = vld [vmem:[%s4818_s27 + $0x78] sm:$0xff] }
 0x687   : > { %3322 = vperm.xlu0 %4166, %v3087_v50   ;;  %v3400_v50 = vld [vmem:[%s4818_s27 + $0x90] sm:$0xff] }
 0x688   : > { %3456 = vst [vmem:[%s6045_s16 + $0x50] sm:$0xff] %v3424_v23  ;;  %v3253_v46 = vpop.permute.xlu2 %3252 }
 0x689   : > { %v3362_v10 = vmul.f32 %v3253_v46, %v5791_v26  ;;  %v1821_v26 = vld [vmem:[#allocation4 + $0xe8] sm:$0xff] }
 0x68a   : > { %v2705_v25 = vld [vmem:[#allocation4 + $0xd8] sm:$0xff]  ;;  %v1853_v14 = vmul.f32 %v5946_v53, %v1821_v26 }
 0x68b   : > { %v3426_v18 = vadd.f32 %v3394_v42, %v3362_v10  ;;  %4419 = vrcp.f32 %v2705_v25  ;;  %v3099_v48 = vand.u32 2147483648, %v2705_v25  ;;  %v3097_v57 = vand.u32 2147483647, %v2705_v25 }
 0x68c   : > { %vm3093_vm13 = vweird.f32 %v2705_v25 }
 0x68d   : > { %3458 = vst [vmem:[%s6045_s16 + $0x60] sm:$0xff] %v3426_v18  ;;  %v3100_v51 = vor.u32 1.1754944e-38, %v3099_v48  ;;  %vm3098_vm15 = vcmp.eq.f32.partialorder %v3097_v57, 8.507059e+37 }
 0x691   : > { %v4420_v19 = vpop.eup %4419 }
 0x692   : > { %v3089_v33 = vmul.f32 %v4420_v19, %v2705_v25  ;;  %vm3094_vm12 = vweird.f32 %v4420_v19  ;;  %v2552_v25 = vadd.f32 %v6048_v44, %v6052_v34  ;;  %v3403_v44 = vld [vmem:[%s4818_s27 + $0xa8] sm:$0xff] }
 0x693   : > { %vm3095_vm14 = vmor %vm3093_vm13, %vm3094_vm12 }
 0x694   : > { %v3090_v58 = vsub.f32 1.0, %v3089_v33  ;;  %v2230_v33 = vmul.f32 0.0, %v5919_v29 }
 0x696   : > { %v3091_v2 = vmul.f32 %v4420_v19, %v3090_v58  ;;  %v3401_v58 = vld [vmem:[%s4818_s27 + $0x98] sm:$0xff] }
 0x698   : > { %v3092_v40 = vadd.f32 %v4420_v19, %v3091_v2 }
 0x69a   : > { %v3096_v61 = vsel %vm3095_vm14, %v4420_v19, %v3092_v40  ;;  %v2600_v40 = vadd.f32 %v2552_v25, %v2230_v33  ;;  %v6793_v25 = vld [vmem:[#allocation52_spill] sm:$0xff] }
 0x69b   : > { %v3101_v11 = vsel %vm3098_vm15, %v3100_v51, %v3096_v61  ;;  %v6780_v51 = vld [vmem:[#allocation45_spill] sm:$0xff]  ;;  %v6781_v61 = vld [vmem:[#allocation46_spill] sm:$0xff] }
 0x69c   : > { %3327 = vperm.xlu2 %4165, %v3101_v11   ;;  %v2555_v11 = vadd.f32 %v6781_v61, %v6780_v51 }
 0x6ae   : > { %v1945_v5 = vpop.xlane.xlu1 %1944 }
 0x6af   : > { %v1981_v9 = vadd.f32 %v1945_v5, %v1853_v14 }
 0x6b1   : > { %2014 = vst.msk [vmem:[#allocation4 + $0xe8] sm:$0xff] %vm653_vm0, %v1981_v9  ;;  %v6782_v9 = vld [vmem:[#allocation39_spill] sm:$0xff] }
 0x6b2   : > { %v2231_v3 = vmul.f32 0.0, %v6782_v9 }
 0x6b6   : > { %v3308_v8 = vpop.permute.xlu0 %3307 }
 0x6b7   : > { %v3373_v30 = vmul.f32 %v3308_v8, %v2602_v56  ;;  %v6784_v56 = vld [vmem:[#allocation50_spill] sm:$0xff] }
 0x6b8   : > { %v2707_v28 = vld [vmem:[#allocation4 + $0xe8] sm:$0xff] }
 0x6b9   : > { %v3437_v41 = vadd.f32 %v3405_v27, %v3373_v30  ;;  %4421 = vrcp.f32 %v2707_v28  ;;  %v3127_v21 = vand.u32 2147483648, %v2707_v28  ;;  %v3125_v60 = vand.u32 2147483647, %v2707_v28 }
 0x6ba   : > { %vm3121_vm2 = vweird.f32 %v2707_v28  ;;  %v2560_v27 = vadd.f32 %v6784_v56, %v6783_v6  ;;  %v3408_v56 = vld [vmem:[%s4818_s27 + $0xd0] sm:$0xff] }
 0x6bb   : > { %3469 = vst [vmem:[%s6045_s16 + $0xb8] sm:$0xff] %v3437_v41  ;;  %v3128_v54 = vor.u32 1.1754944e-38, %v3127_v21  ;;  %vm3126_vm4 = vcmp.eq.f32.partialorder %v3125_v60, 8.507059e+37  ;;  %v6785_v41 = vld [vmem:[#allocation36_spill] sm:$0xff] }
 0x6bc   : > { %v2233_v43 = vmul.f32 0.0, %v6785_v41  ;;  %v3406_v60 = vld [vmem:[%s4818_s27 + $0xc0] sm:$0xff] }
 0x6bf   : > { %v4422_v53 = vpop.eup %4421 }
 0x6c0   : > { %v3117_v4 = vmul.f32 %v4422_v53, %v2707_v28  ;;  %vm3122_vm1 = vweird.f32 %v4422_v53  ;;  %v2601_v28 = vadd.f32 %v2555_v11, %v2231_v3  ;;  %v6798_v11 = vld [vmem:[#allocation40_spill] sm:$0xff] }
 0x6c1   : > { %v1948_v38 = vpop.xlane.xlu2 %1947  ;;  %vm3123_vm3 = vmor %vm3121_vm2, %vm3122_vm1 }
 0x6c2   : > { %v1982_v37 = vadd.f32 %v1948_v38, %v1854_v1  ;;  %v3118_v39 = vsub.f32 1.0, %v3117_v4  ;;  %v2603_v38 = vadd.f32 %v2560_v27, %v2233_v43 }
 0x6c4   : > { %2015 = vst.msk [vmem:[#allocation4 + $0xf0] sm:$0xff] %vm653_vm0, %v1982_v37  ;;  %v3119_v47 = vmul.f32 %v4422_v53, %v3118_v39  ;;  %v6786_v37 = vld [vmem:[#allocation55_spill] sm:$0xff]  ;;  %v6787_v39 = vld [vmem:[#allocation48_spill] sm:$0xff] }
 0x6c5   : > { %v2562_v21 = vadd.f32 %v6787_v39, %v6786_v37 }
 0x6c6   : > { %v3258_v32 = vpop.permute.xlu1 %3257  ;;  %v3120_v52 = vadd.f32 %v4422_v53, %v3119_v47 }
 0x6c7   : > { %v3363_v0 = vmul.f32 %v3258_v32, %v5796_v16  ;;  %v3398_v16 = vld [vmem:[%s4818_s27 + $0x80] sm:$0xff] }
 0x6c8   : > { %v3124_v45 = vsel %vm3123_vm3, %v4422_v53, %v3120_v52  ;;  %v3404_v53 = vld [vmem:[%s4818_s27 + $0xb0] sm:$0xff]  ;;  %v6788_v52 = vld [vmem:[#allocation37_spill] sm:$0xff] }
 0x6c9   : > { %v3427_v31 = vadd.f32 %v3395_v35, %v3363_v0  ;;  %v3268_v62 = vpop.permute.xlu2 %3267  ;;  %v3129_v22 = vsel %vm3126_vm4, %v3128_v54, %v3124_v45  ;;  %v2234_v0 = vmul.f32 0.0, %v6788_v52 }
 0x6ca   : > { %v3365_v20 = vmul.f32 %v3268_v62, %v5853_v24  ;;  %3337 = vperm.xlu0 %4166, %v3129_v22   ;;  %v6789_v22 = vld [vmem:[#allocation57_spill] sm:$0xff] }
 0x6cb   : > { %3459 = vst [vmem:[%s6045_s16 + $0x68] sm:$0xff] %v3427_v31  ;;  %v2708_v13 = vld [vmem:[#allocation4 + $0xf0] sm:$0xff]  ;;  %v2604_v45 = vadd.f32 %v2562_v21, %v2234_v0  ;;  %v3407_v31 = vld [vmem:[%s4818_s27 + $0xc8] sm:$0xff] }
 0x6cc   : > { %v3429_v59 = vadd.f32 %v3397_v55, %v3365_v20  ;;  %4423 = vrcp.f32 %v2708_v13  ;;  %vm3135_vm5 = vweird.f32 %v2708_v13  ;;  %v6790_v20 = vld [vmem:[#allocation56_spill] sm:$0xff] }
 0x6ce   : > { %3461 = vst [vmem:[%s6045_s16 + $0x78] sm:$0xff] %v3429_v59  ;;  %v3273_v12 = vpop.permute.xlu1 %3272 }
 0x6cf   : > { %v3366_v7 = vmul.f32 %v3273_v12, %v5868_v17  ;;  %v3141_v17 = vand.u32 2147483648, %v2708_v13 }
 0x6d1   : > { %v3430_v23 = vadd.f32 %v3398_v16, %v3366_v7  ;;  %v3283_v42 = vpop.permute.xlu2 %3282  ;;  %v3142_v5 = vor.u32 1.1754944e-38, %v3141_v17  ;;  %v6791_v16 = vld [vmem:[#allocation41_spill] sm:$0xff]  ;;  %v6795_v17 = vld [vmem:[#allocation43_spill] sm:$0xff] }
 0x6d2   : > { %v4424_v46 = vpop.eup %4423  ;;  %v3368_v10 = vmul.f32 %v3283_v42, %v5939_v15  ;;  %v3139_v15 = vand.u32 2147483647, %v2708_v13  ;;  %v2237_v12 = vmul.f32 0.0, %v6791_v16 }
 0x6d3   : > { %3462 = vst [vmem:[%s6045_s16 + $0x80] sm:$0xff] %v3430_v23  ;;  %v3131_v24 = vmul.f32 %v4424_v46, %v2708_v13  ;;  %vm3136_vm0 = vweird.f32 %v4424_v46  ;;  %v2570_v13 = vadd.f32 %v6790_v20, %v6789_v22  ;;  %v2487_v23 = vpop.f32.mrf.mxu3 }
 0x6d4   : > { %v3432_v18 = vadd.f32 %v3400_v50, %v3368_v10  ;;  %vm3137_vm6 = vmor %vm3135_vm5, %vm3136_vm0  ;;  %vm3140_vm7 = vcmp.eq.f32.partialorder %v3139_v15, 8.507059e+37  ;;  %v3410_v50 = vld [vmem:[%s4818_s27 + $0xe0] sm:$0xff]  ;;  %v2576_v10 = vpop.f32.mrf.mxu0  ;;  %v6797_v15 = vld [vmem:[#allocation51_spill] sm:$0xff] }
 0x6d5   : > { %v3132_v19 = vsub.f32 1.0, %v3131_v24  ;;  %v2607_v7 = vadd.f32 %v2570_v13, %v2237_v12  ;;  %v6792_v24 = vld [vmem:[#allocation58_spill] sm:$0xff] }
 0x6d6   : > { %3464 = vst [vmem:[%s6045_s16 + $0x90] sm:$0xff] %v3432_v18  ;;  %v3288_v48 = vpop.permute.xlu1 %3287  ;;  %v2567_v18 = vadd.f32 %v6793_v25, %v6792_v24 }
 0x6d7   : > { %v3369_v2 = vmul.f32 %v3288_v48, %v5948_v49  ;;  %v3133_v57 = vmul.f32 %v4424_v46, %v3132_v19  ;;  %v2577_v19 = vadd.f32 %v2576_v10, %v2487_v23 }
 0x6d9   : > { %v3433_v26 = vadd.f32 %v3401_v58, %v3369_v2  ;;  %v3298_v34 = vpop.permute.xlu2 %3297  ;;  %v3134_v14 = vadd.f32 %v4424_v46, %v3133_v57  ;;  %v6794_v58 = vld [vmem:[#allocation38_spill] sm:$0xff]  ;;  %v2240_v2 = vmul.f32 0.0, %v6795_v17  ;;  %v6796_v57 = vld [vmem:[#allocation53_spill] sm:$0xff] }
 0x6da   : > { %v3371_v29 = vmul.f32 %v3298_v34, %v2600_v40  ;;  %v2236_v48 = vmul.f32 0.0, %v6794_v58  ;;  %v2565_v40 = vadd.f32 %v6797_v15, %v6796_v57 }
 0x6db   : > { %3465 = vst [vmem:[%s6045_s16 + $0x98] sm:$0xff] %v3433_v26  ;;  %v3138_v49 = vsel %vm3137_vm6, %v4424_v46, %v3134_v14  ;;  %v2610_v61 = vadd.f32 %v2577_v19, %v2240_v2  ;;  %v2235_v26 = vmul.f32 0.0, %v6798_v11  ;;  %v3413_v14 = vld [vmem:[%s4818_s27 + $0xf8] sm:$0xff] }
 0x6dc   : > { %v3435_v8 = vadd.f32 %v3403_v44, %v3371_v29  ;;  %v3143_v30 = vsel %vm3140_vm7, %v3142_v5, %v3138_v49  ;;  %v2606_v51 = vadd.f32 %v2567_v18, %v2236_v48  ;;  %v3409_v44 = vld [vmem:[%s4818_s27 + $0xd8] sm:$0xff] }
 0x6dd   : > { %3342 = vperm.xlu2 %4165, %v3143_v30   ;;  %v2605_v3 = vadd.f32 %v2565_v40, %v2235_v26 }
 0x6de   : > { %3467 = vst [vmem:[%s6045_s16 + $0xa8] sm:$0xff] %v3435_v8  ;;  %v3303_v1 = vpop.permute.xlu1 %3302 }
 0x6df   : > { %v3372_v4 = vmul.f32 %v3303_v1, %v2601_v28  ;;  %v3412_v28 = vld [vmem:[%s4818_s27 + $0xf0] sm:$0xff]  ;;  %v3411_v1 = vld [vmem:[%s4818_s27 + $0xe8] sm:$0xff] }
 0x6e1   : > { %v3436_v47 = vadd.f32 %v3404_v53, %v3372_v4  ;;  %v3313_v35 = vpop.permute.xlu2 %3312 }
 0x6e2   : > { %v3374_v32 = vmul.f32 %v3313_v35, %v2603_v38 }
 0x6e3   : > { %3468 = vst [vmem:[%s6045_s16 + $0xb0] sm:$0xff] %v3436_v47 }
 0x6e4   : > { %v3438_v54 = vadd.f32 %v3406_v60, %v3374_v32 }
 0x6e6   : > { %3470 = vst [vmem:[%s6045_s16 + $0xc0] sm:$0xff] %v3438_v54  ;;  %v3318_v55 = vpop.permute.xlu1 %3317 }
 0x6e7   : > { %v3375_v62 = vmul.f32 %v3318_v55, %v2604_v45 }
 0x6e9   : > { %v3439_v59 = vadd.f32 %v3407_v31, %v3375_v62 }
 0x6eb   : > { %3471 = vst [vmem:[%s6045_s16 + $0xc8] sm:$0xff] %v3439_v59 }
 0x6ee   : > { %v3333_v42 = vpop.permute.xlu1 %3332 }
 0x6ef   : > { %v3378_v46 = vmul.f32 %v3333_v42, %v2607_v7 }
 0x6f1   : > { %v3442_v33 = vadd.f32 %v3410_v50, %v3378_v46 }
 0x6f3   : > { %3474 = vst [vmem:[%s6045_s16 + $0xe0] sm:$0xff] %v3442_v33 }
 0x6f6   : > { %v3328_v34 = vpop.permute.xlu2 %3327  ;;  %v3348_v29 = vpop.permute.xlu1 %3347 }
 0x6f7   : > { %v3377_v5 = vmul.f32 %v3328_v34, %v2606_v51  ;;  %v3381_v9 = vmul.f32 %v3348_v29, %v2610_v61 }
 0x6f9   : > { %v3441_v49 = vadd.f32 %v3409_v44, %v3377_v5  ;;  %v3445_v6 = vadd.f32 %v3413_v14, %v3381_v9  ;;  %v3323_v27 = vpop.permute.xlu0 %3322 }
 0x6fa   : > { %v3376_v8 = vmul.f32 %v3323_v27, %v2605_v3 }
 0x6fb   : > { %3473 = vst [vmem:[%s6045_s16 + $0xd8] sm:$0xff] %v3441_v49 }
 0x6fc   : > { %3477 = vst [vmem:[%s6045_s16 + $0xf8] sm:$0xff] %v3445_v6  ;;  %v3440_v30 = vadd.f32 %v3408_v56, %v3376_v8 }
 0x6fe   : > { %3472 = vst [vmem:[%s6045_s16 + $0xd0] sm:$0xff] %v3440_v30 }
 0x737   : > { %v3343_v41 = vpop.permute.xlu2 %3342 }
 0x738   : > { %v3380_v43 = vmul.f32 %v3343_v41, %v6148_v63 }
 0x73a   : > { %v3444_v53 = vadd.f32 %v3412_v28, %v3380_v43 }
 0x73c   : > { %3476 = vst [vmem:[%s6045_s16 + $0xf0] sm:$0xff] %v3444_v53  ;;  %v3338_v4 = vpop.permute.xlu0 %3337 }
 0x73d   : > { %v3379_v38 = vmul.f32 %v3338_v4, %v6120_v36 }
 0x73f   : > { %v3443_v37 = vadd.f32 %v3411_v1, %v3379_v38 }
 0x741   : > { %3475 = vst [vmem:[%s6045_s16 + $0xe8] sm:$0xff] %v3443_v37 }
 0x742   : > { %4572 = shalt.err (!%p4569_p13)
}
 0x743   : > { %s4645_s1 = smov 128   ;;  %s4646_s27 = smov 8  }
 0x744   : > { %4083 = dma.vmem_to_hbm [thread:$0]  (%p4770_p0), %s3494_s12, 4096, %s3496_s25, %s3479_s21, %s4645_s1, %s4645_s1, %s4646_s27  }
 0x745 PF: > { %s6800_s23 = sld [smem:[#allocation20_spill]]  ;;  %s3510_s24 = sand.u32 1, %s4615_s18  }
 0x746   : > { %p4100_p3 = pnand %p3649_p4, %p4774_p2  ;;  %s3511_s29 = scalar_lea.sflag [#allocation8], %s3510_s24 }
 0x748   : > { %p4101_p5 = pneg %p4100_p3 }
 0x74a   : > { %4610 = dma.done.wait (%p4101_p5), %s3511_s29, 4096  }
 0x74b   : > { %4612 = vsyncadd (%p4101_p5), %s3511_s29, 4294963200  ;;  %s25_s23 = sadd.s32 1, %s6800_s23   ;;  %s6801_s30 = sld [smem:[#allocation19_spill]] }
 0x74c   : > { %p22_p1 = scmp.ge.s32.totalorder %s25_s23, 4   ;;  %s6802_s20 = sld [smem:[#allocation22_spill]] }
 0x74d   : > { %s6803_s7 = sld [smem:[#allocation21_spill]]  ;;  %s6804_s18 = smov %s4619_s19 }
 0x74e   : > { %s6806_s21 = smov %s4631_s22 }
 0x74f   :  { %24 = sbr.rel (!%p22_p1) target bundleno = 13 (0xd), region = 121 }
 0x751   : > { %s6805_s19 = smov %s6801_s30 }
 0x753   : > { %s6807_s22 = smov %s6803_s7 }
 0x754   :  { %3517 = vsyncpa [#allocation7], 1 }
 0x755   :  { %3519 = vsyncpa [#allocation7 + $0x1], 1 }
 0x756   :  { %3520 = vsyncpa [#allocation10], 1 }
 0x757   :  { %3522 = vsyncpa [#allocation10 + $0x1], 1 }
 0x758   :  { %3523 = vsyncpa [#allocation13], 1 }
 0x759   :  { %3524 = vsyncpa [#allocation8], 1 }
 0x75a   :  { %3526 = vsyncpa [#allocation8 + $0x1], 1 }

</bundles_post_ra>
